<compile_context>
chip_gen: v7x
topology: tpu7x:2x2x1
jax: 0.10.0
libtpu: 0.0.40
codegen_flags: <defaults>
</compile_context>

<pallas_src>
import functools

import jax
import jax.numpy as jnp
from jax import lax
from jax.experimental import pallas as pl
from jax.experimental.pallas import tpu as pltpu

# GaussianKernel(alpha=0.5), GaussianKernel(alpha=1.), GaussianKernel(alpha=2.)
# with track_running_stats semantics: sigma_u^2 = alpha_u * mean(||f_i-f_j||^2)
KERNEL_ALPHAS = (0.5, 1.0, 2.0)

_LANE = 128
_SUBLANE = 8


def _round_up(x, m):
    return ((x + m - 1) // m) * m


def _pick_vmem_limit():
    """Half the physical VMEM, capped at 64 MiB (v7x-safe), floor 32 MiB."""
    try:
        cap = int(pltpu.get_tpu_info().vmem_capacity_bytes)
        return max(32 * 1024 * 1024, min(cap // 2, 64 * 1024 * 1024))
    except Exception:  # pragma: no cover - conservative fallback
        return 32 * 1024 * 1024


def _build_index_matrix(alpha, batch_size, linear=False):
    """Plain-JAX equivalent of _update_index_matrix (setup glue, not hot path)."""
    b = batch_size
    alpha = jnp.asarray(alpha, jnp.float32)
    if linear:
        # O(B) scatters, setup only (matches the PyTorch loop exactly).
        m = jnp.zeros((2 * b, 2 * b), jnp.float32)
        for i in range(b):
            s1, s2 = i, (i + 1) % b
            t1, t2 = s1 + b, s2 + b
            m = m.at[s1, s2].set(alpha[s1] * alpha[s2] / float(b))
            m = m.at[t1, t2].set(1.0 / float(b))
            m = m.at[s1, t2].set(-alpha[s1] / float(b))
            m = m.at[s2, t1].set(-alpha[s2] / float(b))
        return m
    off_diag = 1.0 - jnp.eye(b, dtype=jnp.float32)
    a_s = alpha[:b]
    a_t = alpha[b:2 * b]
    ss = (a_s[:, None] * a_s[None, :]) * off_diag / float(b * (b - 1))
    tt = off_diag / float(b * (b - 1))
    st = jnp.broadcast_to(-a_s[:, None] / float(b * b), (b, b))
    ts = jnp.broadcast_to(-a_t[:, None] / float(b * b), (b, b))
    return jnp.concatenate(
        [jnp.concatenate([ss, st], axis=1),
         jnp.concatenate([ts, tt], axis=1)], axis=0)


def _multi_gaussian_sum(d2, c, kernel_alphas):
    """sum_u exp(-d2 / (2 * alpha_u * mean_d2)), with c = 1 / (2 * mean_d2).

    exp(-d2*c/alpha) = e ** (1/alpha) with e = exp(-d2*c): for the standard
    alphas (0.5, 1, 2) this needs a single EUP exp (plus a sqrt and a mul).
    """
    e = jnp.exp(-d2 * c)
    ksum = None
    for a in kernel_alphas:
        a = float(a)
        if a == 1.0:
            term = e
        elif a == 0.5:
            term = e * e
        elif a == 2.0:
            term = jnp.sqrt(e)
        else:  # generic fallback (one extra exp) for non-standard alphas
            term = jnp.exp(-d2 * (c * (1.0 / a)))
        ksum = term if ksum is None else ksum + term
    return ksum


def _mkmmd_alpha_kernel(ti_ref, tj_ref, vld_ref, coeff_ref,
                        f_row_ref, f_col_ref, sq_row_ref, sq_col_ref,
                        av_row_ref, av_col_ref, vv_row_ref, vv_col_ref,
                        out_ref, acc_ref,
                        *, kernel_alphas, gh, scale_same, scale_cross,
                        steps_per_core):
    """Upper-triangle MK-MMD tile (non-linear path, weights rebuilt from alpha).

    Tiles are quadrant-aligned, so the index-matrix weight of a whole tile is
    one of three cheap broadcast products selected by a scalar branch:
      ss : 2/(b(b-1)) * a_r * a_c        (symmetric pair folded -> doubled)
      tt : 2/(b(b-1)) * v_r * v_c
      st : -(a_r + a_c)/b^2  (st + mirrored ts folded), masked by validity.
    Diagonal tiles additionally get a strict-upper mask (built only there).
    """
    c = pl.program_id(0)
    s = pl.program_id(1)
    idx = c * steps_per_core + s
    ti = ti_ref[idx]
    tj = tj_ref[idx]

    @pl.when(s == 0)
    def _():
        acc_ref[...] = jnp.zeros_like(acc_ref)

    def _accumulate(kvals):
        row_src = ti < gh          # scalar: row tile lies in the source half
        col_src = tj < gh

        @pl.when(jnp.logical_and(row_src, col_src))            # source-source
        def _():
            w = (av_row_ref[...] * scale_same) * av_col_ref[...]
            acc_ref[...] += jnp.sum(kvals * w)

        @pl.when(jnp.logical_and(jnp.logical_not(row_src),
                                 jnp.logical_not(col_src)))    # target-target
        def _():
            w = (vv_row_ref[...] * scale_same) * vv_col_ref[...]
            acc_ref[...] += jnp.sum(kvals * w)

        @pl.when(jnp.logical_and(row_src, jnp.logical_not(col_src)))  # cross
        def _():
            w = scale_cross * (av_row_ref[...] * vv_col_ref[...]
                               + vv_row_ref[...] * av_col_ref[...])
            acc_ref[...] += jnp.sum(kvals * w)

    @pl.when(vld_ref[idx] != 0)
    def _():
        # Pairwise squared distances: bf16 Gram on the MXU, fp32 accumulation,
        # fp32 squared norms from the prologue (features are mean-centered).
        gram = lax.dot_general(f_row_ref[...], f_col_ref[...],
                               (((1,), (1,)), ((), ())),
                               preferred_element_type=jnp.float32)
        d2 = jnp.maximum(sq_row_ref[...] + sq_col_ref[...] - 2.0 * gram, 0.0)
        ksum = _multi_gaussian_sum(d2, coeff_ref[0], kernel_alphas)

        @pl.when(ti != tj)                 # off-diagonal tile: no masking at all
        def _():
            _accumulate(ksum)

        @pl.when(ti == tj)                 # diagonal tile: strict upper triangle
        def _():
            rows = lax.broadcasted_iota(jnp.int32, ksum.shape, 0)
            cols = lax.broadcasted_iota(jnp.int32, ksum.shape, 1)
            _accumulate(jnp.where(rows < cols, ksum, 0.0))

    @pl.when(s == pl.num_programs(1) - 1)
    def _():
        out_ref[...] = acc_ref[...]        # one lane-dense (8,128) store / core


def _mkmmd_w_kernel(ti_ref, tj_ref, vld_ref, coeff_ref,
                    f_row_ref, f_col_ref, sq_row_ref, sq_col_ref, w_ref,
                    out_ref, acc_ref, *, kernel_alphas, steps_per_core):
    """Upper-triangle MK-MMD tile against a pre-folded weight tile (linear path)."""
    s = pl.program_id(1)
    idx = pl.program_id(0) * steps_per_core + s

    @pl.when(s == 0)
    def _():
        acc_ref[...] = jnp.zeros_like(acc_ref)

    @pl.when(vld_ref[idx] != 0)
    def _():
        gram = lax.dot_general(f_row_ref[...], f_col_ref[...],
                               (((1,), (1,)), ((), ())),
                               preferred_element_type=jnp.float32)
        d2 = jnp.maximum(sq_row_ref[...] + sq_col_ref[...] - 2.0 * gram, 0.0)
        ksum = _multi_gaussian_sum(d2, coeff_ref[0], kernel_alphas)
        acc_ref[...] += jnp.sum(ksum * w_ref[...])

    @pl.when(s == pl.num_programs(1) - 1)
    def _():
        out_ref[...] = acc_ref[...]


def mk_mmd(z_s, z_t, alpha, *, kernel_alphas=KERNEL_ALPHAS, linear=False,
           tile=256, gram_dtype=jnp.bfloat16):
    """Forward pass of MultipleKernelMaximumMeanDiscrepancy. Returns a scalar."""
    assert z_s.shape == z_t.shape and z_s.ndim == 2
    b = int(z_s.shape[0])
    assert b >= 2, "MK-MMD requires batch_size >= 2 (loss adds 2/(b-1))"
    n = 2 * b
    d = int(z_s.shape[1])

    features = jnp.concatenate([z_s, z_t], axis=0).astype(jnp.float32)   # (n, d)
    alpha = jnp.asarray(alpha, jnp.float32).reshape(n)

    # --- cheap JAX prologue, O(N*D) --------------------------------------
    # Mean-center: pairwise distances are invariant, bf16 Gram cancellation
    # error shrinks, and the analytic sum_d2 becomes well conditioned.
    fc = features - jnp.mean(features, axis=0, keepdims=True)
    sq_real = jnp.sum(fc * fc, axis=1)                  # (n,) fp32 ||f||^2
    colsum = jnp.sum(fc, axis=0)                        # (d,)  ~ 0 after centering
    # sum_ij ||f_i - f_j||^2 = 2*N*sum_i||f_i||^2 - 2*||sum_i f_i||^2
    sum_d2 = 2.0 * n * jnp.sum(sq_real) - 2.0 * jnp.dot(colsum, colsum)
    mean_d2 = jnp.maximum(sum_d2 / float(n * n), 1e-12)  # identical-feature guard
    coeff = (0.5 / mean_d2).astype(jnp.float32).reshape(1)   # scalar-prefetch

    # --- quadrant-aligned tiling geometry ---------------------------------
    dp = _round_up(max(d, _LANE), _LANE)                 # lane-dense feature dim
    t = max(_LANE, min(_round_up(int(tile), _LANE), _round_up(b, _LANE)))
    h_pad = _round_up(b, t)                              # each half padded alone
    n_pad = 2 * h_pad
    gh = h_pad // t                                      # tiles per half
    g = 2 * gh                                           # tiles per axis

    # Padded layout: source rows [0, b), target rows [h_pad, h_pad + b).
    f_pad = jnp.zeros((n_pad, dp), jnp.float32)
    f_pad = f_pad.at[0:b, 0:d].set(fc[:b]).at[h_pad:h_pad + b, 0:d].set(fc[b:])
    sq_pad = jnp.zeros((n_pad,), jnp.float32)
    sq_pad = sq_pad.at[0:b].set(sq_real[:b]).at[h_pad:h_pad + b].set(sq_real[b:])
    av = jnp.zeros((n_pad,), jnp.float32)                # alpha, 0 on padding
    av = av.at[0:b].set(alpha[:b]).at[h_pad:h_pad + b].set(alpha[b:])
    vv = jnp.zeros((n_pad,), jnp.float32)                # validity, 0 on padding
    vv = vv.at[0:b].set(1.0).at[h_pad:h_pad + b].set(1.0)

    f_mxu = f_pad.astype(gram_dtype)                     # bf16 operands for MXU

    # --- upper-triangle tile schedule (symmetry fold) ----------------------
    tri = [(i, j) for i in range(g) for j in range(i, g)]
    num_tiles = len(tri)                                 # g*(g+1)/2
    num_cores = 2                                        # feed both v7x TCs
    steps = -(-num_tiles // num_cores)                   # steps per core
    total = num_cores * steps
    ti_tab = jnp.asarray([p[0] for p in tri] + [0] * (total - num_tiles), jnp.int32)
    tj_tab = jnp.asarray([p[1] for p in tri] + [0] * (total - num_tiles), jnp.int32)
    vl_tab = jnp.asarray([1] * num_tiles + [0] * (total - num_tiles), jnp.int32)

    grid = (num_cores, steps)

    def rmap(c, s, ti, tj, vl, cf):     # row-tile indexed operands
        return (ti[c * steps + s], 0)

    def cmap(c, s, ti, tj, vl, cf):     # column-tile indexed (t, dp) operand
        return (tj[c * steps + s], 0)

    def cmap_t(c, s, ti, tj, vl, cf):   # column-tile indexed (1, t) operands
        return (0, tj[c * steps + s])

    f_row_spec = pl.BlockSpec((t, dp), rmap)
    f_col_spec = pl.BlockSpec((t, dp), cmap)
    sq_row_spec = pl.BlockSpec((t, 1), rmap)
    sq_col_spec = pl.BlockSpec((1, t), cmap_t)
    out_spec = pl.BlockSpec((_SUBLANE, _LANE), lambda c, s, ti, tj, vl, cf: (c, 0))
    out_shape = jax.ShapeDtypeStruct((num_cores * _SUBLANE, _LANE), jnp.float32)
    scratch = [pltpu.VMEM((_SUBLANE, _LANE), jnp.float32)]

    compiler_params = pltpu.CompilerParams(
        dimension_semantics=("parallel", "arbitrary"),
        vmem_limit_bytes=_pick_vmem_limit(),
    )

    if linear:
        # Linear DAN variant: fold the (sparse) index matrix with its transpose
        # onto the upper triangle once in the prologue and stream (t, t) tiles.
        w_full = _build_index_matrix(alpha, b, linear=True)
        w_tri = jnp.triu(w_full + w_full.T, k=1) + jnp.diag(jnp.diag(w_full))
        w_pad = jnp.zeros((n_pad, n_pad), jnp.float32)
        w_pad = w_pad.at[0:b, 0:b].set(w_tri[:b, :b])
        w_pad = w_pad.at[0:b, h_pad:h_pad + b].set(w_tri[:b, b:])
        w_pad = w_pad.at[h_pad:h_pad + b, h_pad:h_pad + b].set(w_tri[b:, b:])
        w_spec = pl.BlockSpec(
            (t, t), lambda c, s, ti, tj, vl, cf: (ti[c * steps + s],
                                                  tj[c * steps + s]))
        kern = functools.partial(_mkmmd_w_kernel,
                                 kernel_alphas=tuple(kernel_alphas),
                                 steps_per_core=steps)
        in_specs = [f_row_spec, f_col_spec, sq_row_spec, sq_col_spec, w_spec]
        args = (ti_tab, tj_tab, vl_tab, coeff, f_mxu, f_mxu,
                sq_pad.reshape(n_pad, 1), sq_pad.reshape(1, n_pad), w_pad)
        w_bytes = total * t * t * 4
    else:
        kern = functools.partial(_mkmmd_alpha_kernel,
                                 kernel_alphas=tuple(kernel_alphas),
                                 gh=gh,
                                 scale_same=2.0 / float(b * (b - 1)),
                                 scale_cross=-1.0 / float(b * b),
                                 steps_per_core=steps)
        in_specs = [f_row_spec, f_col_spec, sq_row_spec, sq_col_spec,
                    pl.BlockSpec((t, 1), rmap), pl.BlockSpec((1, t), cmap_t),
                    pl.BlockSpec((t, 1), rmap), pl.BlockSpec((1, t), cmap_t)]
        args = (ti_tab, tj_tab, vl_tab, coeff, f_mxu, f_mxu,
                sq_pad.reshape(n_pad, 1), sq_pad.reshape(1, n_pad),
                av.reshape(n_pad, 1), av.reshape(1, n_pad),
                vv.reshape(n_pad, 1), vv.reshape(1, n_pad))
        w_bytes = 0

    itemsize = int(jnp.dtype(gram_dtype).itemsize)
    work = num_tiles * t * t
    cost = pl.CostEstimate(
        flops=2 * work * dp + 14 * work,
        transcendentals=2 * work,                      # exp + sqrt per element
        bytes_accessed=total * 2 * t * dp * itemsize + w_bytes + 6 * n_pad * 4,
    )

    grid_spec = pltpu.PrefetchScalarGridSpec(
        num_scalar_prefetch=4, grid=grid,
        in_specs=in_specs, out_specs=out_spec, scratch_shapes=scratch)

    out = pl.pallas_call(
        kern,
        out_shape=out_shape,
        grid_spec=grid_spec,
        compiler_params=compiler_params,
        cost_estimate=cost,
    )(*args)

    partials = out.reshape(num_cores, _SUBLANE, _LANE)[:, 0, 0]   # one per core
    return jnp.sum(partials) + 2.0 / float(b - 1)


def _mk_mmd_reference(z_s, z_t, alpha, *, kernel_alphas=KERNEL_ALPHAS, linear=False):
    """Pure-JAX fp32 reference mirroring the PyTorch forward (explicit pairwise diff)."""
    b = z_s.shape[0]
    features = jnp.concatenate([z_s, z_t], axis=0).astype(jnp.float32)
    diff = features[None, :, :] - features[:, None, :]
    d2 = jnp.sum(diff * diff, axis=2)
    kmat = jnp.zeros_like(d2)
    for a in kernel_alphas:
        sigma_sq = a * jnp.mean(d2)
        kmat = kmat + jnp.exp(-d2 / (2.0 * sigma_sq))
    index_matrix = _build_index_matrix(alpha, b, linear)
    return jnp.sum(kmat * index_matrix) + 2.0 / float(b - 1)


if __name__ == "__main__":
    key = jax.random.PRNGKey(0)
    k1, k2, k3, k4, k5, k6, k7, k8, k9 = jax.random.split(key, 9)

    # bf16 MXU operands (fp32 accumulation, mean-centered features) => compare
    # against the fp32 reference at a few-1e-3 absolute tolerance.
    tol = 3e-3

    # --- small demo shape (single tile per half), non-linear + linear ------
    batch_size, feature_dim = 8, 32
    z_s = jax.random.normal(k1, (batch_size, feature_dim), jnp.float32)
    z_t = jax.random.normal(k2, (batch_size, feature_dim), jnp.float32)
    alpha = jax.random.uniform(k3, (2 * batch_size,), jnp.float32, 0.5, 1.5)

    loss = jax.block_until_ready(mk_mmd(z_s, z_t, alpha, linear=False))
    ref = jax.block_until_ready(_mk_mmd_reference(z_s, z_t, alpha, linear=False))
    assert jnp.isfinite(loss), "non-linear loss is not finite"
    assert abs(float(loss) - float(ref)) < tol, (float(loss), float(ref))

    loss_lin = jax.block_until_ready(mk_mmd(z_s, z_t, alpha, linear=True))
    ref_lin = jax.block_until_ready(_mk_mmd_reference(z_s, z_t, alpha, linear=True))
    assert jnp.isfinite(loss_lin), "linear loss is not finite"
    assert abs(float(loss_lin) - float(ref_lin)) < tol, (float(loss_lin), float(ref_lin))

    # --- shape with per-half padding (b not a multiple of the tile) --------
    batch_size2, feature_dim2 = 80, 96
    z_s2 = jax.random.normal(k4, (batch_size2, feature_dim2), jnp.float32)
    z_t2 = jax.random.normal(k5, (batch_size2, feature_dim2), jnp.float32)
    alpha2 = jax.random.uniform(k6, (2 * batch_size2,), jnp.float32, 0.5, 1.5)

    loss2 = jax.block_until_ready(mk_mmd(z_s2, z_t2, alpha2, linear=False, tile=128))
    ref2 = jax.block_until_ready(_mk_mmd_reference(z_s2, z_t2, alpha2, linear=False))
    assert jnp.isfinite(loss2), "padded-tile loss is not finite"
    assert abs(float(loss2) - float(ref2)) < tol, (float(loss2), float(ref2))

    # --- multiple tiles per half (exercises off-diag ss/tt + cross tiles) ---
    batch_size3, feature_dim3 = 160, 64
    z_s3 = jax.random.normal(k7, (batch_size3, feature_dim3), jnp.float32)
    z_t3 = jax.random.normal(k8, (batch_size3, feature_dim3), jnp.float32)
    alpha3 = jax.random.uniform(k9, (2 * batch_size3,), jnp.float32, 0.5, 1.5)

    loss3 = jax.block_until_ready(mk_mmd(z_s3, z_t3, alpha3, linear=False, tile=128))
    ref3 = jax.block_until_ready(_mk_mmd_reference(z_s3, z_t3, alpha3, linear=False))
    assert jnp.isfinite(loss3), "multi-tile loss is not finite"
    assert abs(float(loss3) - float(ref3)) < tol, (float(loss3), float(ref3))

    print("KERNEL_OK")
</pallas_src>

<mosaic_0001>
module attributes {stable_mosaic.version = 11 : i64} {
  func.func @_mkmmd_alpha_kernel(%arg0: i32, %arg1: i32, %arg2: memref<4xi32, #tpu.memory_space<smem>>, %arg3: memref<4xi32, #tpu.memory_space<smem>>, %arg4: memref<4xi32, #tpu.memory_space<smem>>, %arg5: memref<1xf32, #tpu.memory_space<smem>>, %arg6: memref<128x128xbf16, #tpu.memory_space<vmem>>, %arg7: memref<128x128xbf16, #tpu.memory_space<vmem>>, %arg8: memref<128x1xf32, #tpu.memory_space<vmem>>, %arg9: memref<1x128xf32, #tpu.memory_space<vmem>>, %arg10: memref<128x1xf32, #tpu.memory_space<vmem>>, %arg11: memref<1x128xf32, #tpu.memory_space<vmem>>, %arg12: memref<128x1xf32, #tpu.memory_space<vmem>>, %arg13: memref<1x128xf32, #tpu.memory_space<vmem>>, %arg14: memref<8x128xf32, #tpu.memory_space<vmem>>, %arg15: memref<8x128xf32, #tpu.memory_space<vmem>>) attributes {dimension_semantics = [#tpu.dimension_semantics<parallel>, #tpu.dimension_semantics<arbitrary>], iteration_bounds = array<i64: 2, 2>, scalar_prefetch = 4 : i64, scratch_operands = 1 : i64, tpu.core_type = #tpu.core_type<tc>, window_params = [{transform_indices = @transform_0, window_bounds = array<i64: 128, 128>}, {transform_indices = @transform_1, window_bounds = array<i64: 128, 128>}, {transform_indices = @transform_2, window_bounds = array<i64: 128, 1>}, {transform_indices = @transform_3, window_bounds = array<i64: 1, 128>}, {transform_indices = @transform_4, window_bounds = array<i64: 128, 1>}, {transform_indices = @transform_5, window_bounds = array<i64: 1, 128>}, {transform_indices = @transform_6, window_bounds = array<i64: 128, 1>}, {transform_indices = @transform_7, window_bounds = array<i64: 1, 128>}, {transform_indices = @transform_8, window_bounds = array<i64: 8, 128>}]} {
    %c2_i32 = arith.constant 2 : i32
    %0 = arith.muli %arg0, %c2_i32 : i32
    %1 = arith.addi %0, %arg1 : i32
    %2 = arith.index_cast %1 : i32 to index
    %3 = memref.load %arg2[%2] : memref<4xi32, #tpu.memory_space<smem>>
    %4 = arith.index_cast %1 : i32 to index
    %5 = memref.load %arg3[%4] : memref<4xi32, #tpu.memory_space<smem>>
    %c0_i32 = arith.constant 0 : i32
    %6 = arith.cmpi eq, %arg1, %c0_i32 : i32
    %7 = arith.extui %6 : i1 to i32
    %c0_i32_0 = arith.constant 0 : i32
    %8 = arith.cmpi ne, %7, %c0_i32_0 : i32
    scf.if %8 {
      %cst = arith.constant 0.000000e+00 : f32
      %17 = vector.broadcast %cst : f32 to vector<8x128xf32>
      %c0 = arith.constant 0 : index
      %c0_4 = arith.constant 0 : index
      %18 = vector.load %arg15[%c0, %c0_4] : memref<8x128xf32, #tpu.memory_space<vmem>>, vector<8x128xf32>
      tpu.vector_store %arg15[%c0, %c0_4], %17 {strides = array<i32>} : memref<8x128xf32, #tpu.memory_space<vmem>>, vector<8x128xf32>,
    } else {
    }
    %9 = arith.index_cast %1 : i32 to index
    %10 = memref.load %arg4[%9] : memref<4xi32, #tpu.memory_space<smem>>
    %c0_i32_1 = arith.constant 0 : i32
    %11 = arith.cmpi ne, %10, %c0_i32_1 : i32
    %12 = arith.extui %11 : i1 to i32
    %c0_i32_2 = arith.constant 0 : i32
    %13 = arith.cmpi ne, %12, %c0_i32_2 : i32
    scf.if %13 {
      %c0 = arith.constant 0 : index
      %c0_4 = arith.constant 0 : index
      %17 = vector.load %arg6[%c0, %c0_4] : memref<128x128xbf16, #tpu.memory_space<vmem>>, vector<128x128xbf16>
      %c0_5 = arith.constant 0 : index
      %c0_6 = arith.constant 0 : index
      %18 = vector.load %arg7[%c0_5, %c0_6] : memref<128x128xbf16, #tpu.memory_space<vmem>>, vector<128x128xbf16>
      %cst = arith.constant dense<0.000000e+00> : vector<128x128xf32>
      %19 = tpu.matmul %17, %18, %cst {dimension_numbers = #tpu.dot_dimension_numbers<[1], [1], [0], [0], [0, 0, 1, 0], [], []>} : vector<128x128xbf16>, vector<128x128xbf16>, vector<128x128xf32> -> vector<128x128xf32>
      %c0_7 = arith.constant 0 : index
      %c0_8 = arith.constant 0 : index
      %20 = vector.load %arg8[%c0_7, %c0_8] : memref<128x1xf32, #tpu.memory_space<vmem>>, vector<128x1xf32>
      %c0_9 = arith.constant 0 : index
      %c0_10 = arith.constant 0 : index
      %21 = vector.load %arg9[%c0_9, %c0_10] : memref<1x128xf32, #tpu.memory_space<vmem>>, vector<1x128xf32>
      %22 = vector.broadcast %20 : vector<128x1xf32> to vector<128x128xf32>
      %23 = vector.broadcast %21 : vector<1x128xf32> to vector<128x128xf32>
      %24 = arith.addf %22, %23 : vector<128x128xf32>
      %cst_11 = arith.constant 2.000000e+00 : f32
      %25 = vector.broadcast %cst_11 : f32 to vector<128x128xf32>
      %26 = arith.mulf %25, %19 : vector<128x128xf32>
      %27 = arith.subf %24, %26 : vector<128x128xf32>
      %cst_12 = arith.constant 0.000000e+00 : f32
      %28 = vector.broadcast %cst_12 : f32 to vector<128x128xf32>
      %29 = arith.maximumf %27, %28 : vector<128x128xf32>
      %c0_13 = arith.constant 0 : index
      %30 = memref.load %arg5[%c0_13] : memref<1xf32, #tpu.memory_space<smem>>
      %cst_14 = arith.constant 0.000000e+00 : f32
      %31 = vector.broadcast %cst_14 : f32 to vector<128x128xf32>
      %32 = arith.subf %31, %29 : vector<128x128xf32>
      %33 = vector.broadcast %30 : f32 to vector<128x128xf32>
      %34 = arith.mulf %32, %33 : vector<128x128xf32>
      %35 = math.exp %34 : vector<128x128xf32>
      %36 = arith.mulf %35, %35 : vector<128x128xf32>
      %37 = arith.addf %36, %35 : vector<128x128xf32>
      %38 = math.sqrt %35 : vector<128x128xf32>
      %39 = arith.addf %37, %38 : vector<128x128xf32>
      %40 = arith.cmpi ne, %3, %5 : i32
      %41 = arith.extui %40 : i1 to i32
      %c0_i32_15 = arith.constant 0 : i32
      %42 = arith.cmpi ne, %41, %c0_i32_15 : i32
      scf.if %42 {
        %c1_i32_17 = arith.constant 1 : i32
        %46 = arith.cmpi slt, %3, %c1_i32_17 : i32
        %c1_i32_18 = arith.constant 1 : i32
        %47 = arith.cmpi slt, %5, %c1_i32_18 : i32
        %48 = arith.andi %46, %47 : i1
        %49 = arith.extui %48 : i1 to i32
        %c0_i32_19 = arith.constant 0 : i32
        %50 = arith.cmpi ne, %49, %c0_i32_19 : i32
        scf.if %50 {
          %c0_24 = arith.constant 0 : index
          %c0_25 = arith.constant 0 : index
          %60 = vector.load %arg10[%c0_24, %c0_25] : memref<128x1xf32, #tpu.memory_space<vmem>>, vector<128x1xf32>
          %cst_26 = arith.constant 0.0357142873 : f32
          %61 = vector.broadcast %cst_26 : f32 to vector<128x1xf32>
          %62 = arith.mulf %60, %61 : vector<128x1xf32>
          %c0_27 = arith.constant 0 : index
          %c0_28 = arith.constant 0 : index
          %63 = vector.load %arg11[%c0_27, %c0_28] : memref<1x128xf32, #tpu.memory_space<vmem>>, vector<1x128xf32>
          %64 = vector.broadcast %62 : vector<128x1xf32> to vector<128x128xf32>
          %65 = vector.broadcast %63 : vector<1x128xf32> to vector<128x128xf32>
          %66 = arith.mulf %64, %65 : vector<128x128xf32>
          %c0_29 = arith.constant 0 : index
          %c0_30 = arith.constant 0 : index
          %67 = vector.load %arg15[%c0_29, %c0_30] : memref<8x128xf32, #tpu.memory_space<vmem>>, vector<8x128xf32>
          %68 = arith.mulf %39, %66 : vector<128x128xf32>
          %69 = vector.shape_cast %68 : vector<128x128xf32> to vector<1x128x128xf32>
          %cst_31 = arith.constant dense<0.000000e+00> : vector<1xf32>
          %70 = vector.multi_reduction <add>, %69, %cst_31 [1, 2] : vector<1x128x128xf32> to vector<1xf32>
          %71 = vector.shape_cast %70 : vector<1xf32> to vector<1x1x1xf32>
          %72 = vector.extract %71[0, 0, 0] : f32 from vector<1x1x1xf32>
          %73 = vector.broadcast %72 : f32 to vector<8x128xf32>
          %74 = arith.addf %67, %73 : vector<8x128xf32>
          %c0_32 = arith.constant 0 : index
          %c0_33 = arith.constant 0 : index
          %75 = vector.load %arg15[%c0_32, %c0_33] : memref<8x128xf32, #tpu.memory_space<vmem>>, vector<8x128xf32>
          tpu.vector_store %arg15[%c0_32, %c0_33], %74 {strides = array<i32>} : memref<8x128xf32, #tpu.memory_space<vmem>>, vector<8x128xf32>,
        } else {
        }
        %true = arith.constant true
        %51 = arith.xori %46, %true : i1
        %true_20 = arith.constant true
        %52 = arith.xori %47, %true_20 : i1
        %53 = arith.andi %51, %52 : i1
        %54 = arith.extui %53 : i1 to i32
        %c0_i32_21 = arith.constant 0 : i32
        %55 = arith.cmpi ne, %54, %c0_i32_21 : i32
        scf.if %55 {
          %c0_24 = arith.constant 0 : index
          %c0_25 = arith.constant 0 : index
          %60 = vector.load %arg12[%c0_24, %c0_25] : memref<128x1xf32, #tpu.memory_space<vmem>>, vector<128x1xf32>
          %cst_26 = arith.constant 0.0357142873 : f32
          %61 = vector.broadcast %cst_26 : f32 to vector<128x1xf32>
          %62 = arith.mulf %60, %61 : vector<128x1xf32>
          %c0_27 = arith.constant 0 : index
          %c0_28 = arith.constant 0 : index
          %63 = vector.load %arg13[%c0_27, %c0_28] : memref<1x128xf32, #tpu.memory_space<vmem>>, vector<1x128xf32>
          %64 = vector.broadcast %62 : vector<128x1xf32> to vector<128x128xf32>
          %65 = vector.broadcast %63 : vector<1x128xf32> to vector<128x128xf32>
          %66 = arith.mulf %64, %65 : vector<128x128xf32>
          %c0_29 = arith.constant 0 : index
          %c0_30 = arith.constant 0 : index
          %67 = vector.load %arg15[%c0_29, %c0_30] : memref<8x128xf32, #tpu.memory_space<vmem>>, vector<8x128xf32>
          %68 = arith.mulf %39, %66 : vector<128x128xf32>
          %69 = vector.shape_cast %68 : vector<128x128xf32> to vector<1x128x128xf32>
          %cst_31 = arith.constant dense<0.000000e+00> : vector<1xf32>
          %70 = vector.multi_reduction <add>, %69, %cst_31 [1, 2] : vector<1x128x128xf32> to vector<1xf32>
          %71 = vector.shape_cast %70 : vector<1xf32> to vector<1x1x1xf32>
          %72 = vector.extract %71[0, 0, 0] : f32 from vector<1x1x1xf32>
          %73 = vector.broadcast %72 : f32 to vector<8x128xf32>
          %74 = arith.addf %67, %73 : vector<8x128xf32>
          %c0_32 = arith.constant 0 : index
          %c0_33 = arith.constant 0 : index
          %75 = vector.load %arg15[%c0_32, %c0_33] : memref<8x128xf32, #tpu.memory_space<vmem>>, vector<8x128xf32>
          tpu.vector_store %arg15[%c0_32, %c0_33], %74 {strides = array<i32>} : memref<8x128xf32, #tpu.memory_space<vmem>>, vector<8x128xf32>,
        } else {
        }
        %true_22 = arith.constant true
        %56 = arith.xori %47, %true_22 : i1
        %57 = arith.andi %46, %56 : i1
        %58 = arith.extui %57 : i1 to i32
        %c0_i32_23 = arith.constant 0 : i32
        %59 = arith.cmpi ne, %58, %c0_i32_23 : i32
        scf.if %59 {
          %c0_24 = arith.constant 0 : index
          %c0_25 = arith.constant 0 : index
          %60 = vector.load %arg10[%c0_24, %c0_25] : memref<128x1xf32, #tpu.memory_space<vmem>>, vector<128x1xf32>
          %c0_26 = arith.constant 0 : index
          %c0_27 = arith.constant 0 : index
          %61 = vector.load %arg13[%c0_26, %c0_27] : memref<1x128xf32, #tpu.memory_space<vmem>>, vector<1x128xf32>
          %62 = vector.broadcast %60 : vector<128x1xf32> to vector<128x128xf32>
          %63 = vector.broadcast %61 : vector<1x128xf32> to vector<128x128xf32>
          %64 = arith.mulf %62, %63 : vector<128x128xf32>
          %c0_28 = arith.constant 0 : index
          %c0_29 = arith.constant 0 : index
          %65 = vector.load %arg12[%c0_28, %c0_29] : memref<128x1xf32, #tpu.memory_space<vmem>>, vector<128x1xf32>
          %c0_30 = arith.constant 0 : index
          %c0_31 = arith.constant 0 : index
          %66 = vector.load %arg11[%c0_30, %c0_31] : memref<1x128xf32, #tpu.memory_space<vmem>>, vector<1x128xf32>
          %67 = vector.broadcast %65 : vector<128x1xf32> to vector<128x128xf32>
          %68 = vector.broadcast %66 : vector<1x128xf32> to vector<128x128xf32>
          %69 = arith.mulf %67, %68 : vector<128x128xf32>
          %70 = arith.addf %64, %69 : vector<128x128xf32>
          %cst_32 = arith.constant -1.562500e-02 : f32
          %71 = vector.broadcast %cst_32 : f32 to vector<128x128xf32>
          %72 = arith.mulf %71, %70 : vector<128x128xf32>
          %c0_33 = arith.constant 0 : index
          %c0_34 = arith.constant 0 : index
          %73 = vector.load %arg15[%c0_33, %c0_34] : memref<8x128xf32, #tpu.memory_space<vmem>>, vector<8x128xf32>
          %74 = arith.mulf %39, %72 : vector<128x128xf32>
          %75 = vector.shape_cast %74 : vector<128x128xf32> to vector<1x128x128xf32>
          %cst_35 = arith.constant dense<0.000000e+00> : vector<1xf32>
          %76 = vector.multi_reduction <add>, %75, %cst_35 [1, 2] : vector<1x128x128xf32> to vector<1xf32>
          %77 = vector.shape_cast %76 : vector<1xf32> to vector<1x1x1xf32>
          %78 = vector.extract %77[0, 0, 0] : f32 from vector<1x1x1xf32>
          %79 = vector.broadcast %78 : f32 to vector<8x128xf32>
          %80 = arith.addf %73, %79 : vector<8x128xf32>
          %c0_36 = arith.constant 0 : index
          %c0_37 = arith.constant 0 : index
          %81 = vector.load %arg15[%c0_36, %c0_37] : memref<8x128xf32, #tpu.memory_space<vmem>>, vector<8x128xf32>
          tpu.vector_store %arg15[%c0_36, %c0_37], %80 {strides = array<i32>} : memref<8x128xf32, #tpu.memory_space<vmem>>, vector<8x128xf32>,
        } else {
        }
      } else {
      }
      %43 = arith.cmpi eq, %3, %5 : i32
      %44 = arith.extui %43 : i1 to i32
      %c0_i32_16 = arith.constant 0 : i32
      %45 = arith.cmpi ne, %44, %c0_i32_16 : i32
      scf.if %45 {
        %46 = tpu.iota {dimensions = array<i32: 0>} : vector<128x128xi32>
        %47 = tpu.iota {dimensions = array<i32: 1>} : vector<128x128xi32>
        %48 = arith.cmpi slt, %46, %47 : vector<128x128xi32>
        %cst_17 = arith.constant 0.000000e+00 : f32
        %49 = vector.broadcast %cst_17 : f32 to vector<128x128xf32>
        %50 = arith.select %48, %39, %49 : vector<128x128xi1>, vector<128x128xf32>
        %c1_i32_18 = arith.constant 1 : i32
        %51 = arith.cmpi slt, %3, %c1_i32_18 : i32
        %c1_i32_19 = arith.constant 1 : i32
        %52 = arith.cmpi slt, %5, %c1_i32_19 : i32
        %53 = arith.andi %51, %52 : i1
        %54 = arith.extui %53 : i1 to i32
        %c0_i32_20 = arith.constant 0 : i32
        %55 = arith.cmpi ne, %54, %c0_i32_20 : i32
        scf.if %55 {
          %c0_25 = arith.constant 0 : index
          %c0_26 = arith.constant 0 : index
          %65 = vector.load %arg10[%c0_25, %c0_26] : memref<128x1xf32, #tpu.memory_space<vmem>>, vector<128x1xf32>
          %cst_27 = arith.constant 0.0357142873 : f32
          %66 = vector.broadcast %cst_27 : f32 to vector<128x1xf32>
          %67 = arith.mulf %65, %66 : vector<128x1xf32>
          %c0_28 = arith.constant 0 : index
          %c0_29 = arith.constant 0 : index
          %68 = vector.load %arg11[%c0_28, %c0_29] : memref<1x128xf32, #tpu.memory_space<vmem>>, vector<1x128xf32>
          %69 = vector.broadcast %67 : vector<128x1xf32> to vector<128x128xf32>
          %70 = vector.broadcast %68 : vector<1x128xf32> to vector<128x128xf32>
          %71 = arith.mulf %69, %70 : vector<128x128xf32>
          %c0_30 = arith.constant 0 : index
          %c0_31 = arith.constant 0 : index
          %72 = vector.load %arg15[%c0_30, %c0_31] : memref<8x128xf32, #tpu.memory_space<vmem>>, vector<8x128xf32>
          %73 = arith.mulf %50, %71 : vector<128x128xf32>
          %74 = vector.shape_cast %73 : vector<128x128xf32> to vector<1x128x128xf32>
          %cst_32 = arith.constant dense<0.000000e+00> : vector<1xf32>
          %75 = vector.multi_reduction <add>, %74, %cst_32 [1, 2] : vector<1x128x128xf32> to vector<1xf32>
          %76 = vector.shape_cast %75 : vector<1xf32> to vector<1x1x1xf32>
          %77 = vector.extract %76[0, 0, 0] : f32 from vector<1x1x1xf32>
          %78 = vector.broadcast %77 : f32 to vector<8x128xf32>
          %79 = arith.addf %72, %78 : vector<8x128xf32>
          %c0_33 = arith.constant 0 : index
          %c0_34 = arith.constant 0 : index
          %80 = vector.load %arg15[%c0_33, %c0_34] : memref<8x128xf32, #tpu.memory_space<vmem>>, vector<8x128xf32>
          tpu.vector_store %arg15[%c0_33, %c0_34], %79 {strides = array<i32>} : memref<8x128xf32, #tpu.memory_space<vmem>>, vector<8x128xf32>,
        } else {
        }
        %true = arith.constant true
        %56 = arith.xori %51, %true : i1
        %true_21 = arith.constant true
        %57 = arith.xori %52, %true_21 : i1
        %58 = arith.andi %56, %57 : i1
        %59 = arith.extui %58 : i1 to i32
        %c0_i32_22 = arith.constant 0 : i32
        %60 = arith.cmpi ne, %59, %c0_i32_22 : i32
        scf.if %60 {
          %c0_25 = arith.constant 0 : index
          %c0_26 = arith.constant 0 : index
          %65 = vector.load %arg12[%c0_25, %c0_26] : memref<128x1xf32, #tpu.memory_space<vmem>>, vector<128x1xf32>
          %cst_27 = arith.constant 0.0357142873 : f32
          %66 = vector.broadcast %cst_27 : f32 to vector<128x1xf32>
          %67 = arith.mulf %65, %66 : vector<128x1xf32>
          %c0_28 = arith.constant 0 : index
          %c0_29 = arith.constant 0 : index
          %68 = vector.load %arg13[%c0_28, %c0_29] : memref<1x128xf32, #tpu.memory_space<vmem>>, vector<1x128xf32>
          %69 = vector.broadcast %67 : vector<128x1xf32> to vector<128x128xf32>
          %70 = vector.broadcast %68 : vector<1x128xf32> to vector<128x128xf32>
          %71 = arith.mulf %69, %70 : vector<128x128xf32>
          %c0_30 = arith.constant 0 : index
          %c0_31 = arith.constant 0 : index
          %72 = vector.load %arg15[%c0_30, %c0_31] : memref<8x128xf32, #tpu.memory_space<vmem>>, vector<8x128xf32>
          %73 = arith.mulf %50, %71 : vector<128x128xf32>
          %74 = vector.shape_cast %73 : vector<128x128xf32> to vector<1x128x128xf32>
          %cst_32 = arith.constant dense<0.000000e+00> : vector<1xf32>
          %75 = vector.multi_reduction <add>, %74, %cst_32 [1, 2] : vector<1x128x128xf32> to vector<1xf32>
          %76 = vector.shape_cast %75 : vector<1xf32> to vector<1x1x1xf32>
          %77 = vector.extract %76[0, 0, 0] : f32 from vector<1x1x1xf32>
          %78 = vector.broadcast %77 : f32 to vector<8x128xf32>
          %79 = arith.addf %72, %78 : vector<8x128xf32>
          %c0_33 = arith.constant 0 : index
          %c0_34 = arith.constant 0 : index
          %80 = vector.load %arg15[%c0_33, %c0_34] : memref<8x128xf32, #tpu.memory_space<vmem>>, vector<8x128xf32>
          tpu.vector_store %arg15[%c0_33, %c0_34], %79 {strides = array<i32>} : memref<8x128xf32, #tpu.memory_space<vmem>>, vector<8x128xf32>,
        } else {
        }
        %true_23 = arith.constant true
        %61 = arith.xori %52, %true_23 : i1
        %62 = arith.andi %51, %61 : i1
        %63 = arith.extui %62 : i1 to i32
        %c0_i32_24 = arith.constant 0 : i32
        %64 = arith.cmpi ne, %63, %c0_i32_24 : i32
        scf.if %64 {
          %c0_25 = arith.constant 0 : index
          %c0_26 = arith.constant 0 : index
          %65 = vector.load %arg10[%c0_25, %c0_26] : memref<128x1xf32, #tpu.memory_space<vmem>>, vector<128x1xf32>
          %c0_27 = arith.constant 0 : index
          %c0_28 = arith.constant 0 : index
          %66 = vector.load %arg13[%c0_27, %c0_28] : memref<1x128xf32, #tpu.memory_space<vmem>>, vector<1x128xf32>
          %67 = vector.broadcast %65 : vector<128x1xf32> to vector<128x128xf32>
          %68 = vector.broadcast %66 : vector<1x128xf32> to vector<128x128xf32>
          %69 = arith.mulf %67, %68 : vector<128x128xf32>
          %c0_29 = arith.constant 0 : index
          %c0_30 = arith.constant 0 : index
          %70 = vector.load %arg12[%c0_29, %c0_30] : memref<128x1xf32, #tpu.memory_space<vmem>>, vector<128x1xf32>
          %c0_31 = arith.constant 0 : index
          %c0_32 = arith.constant 0 : index
          %71 = vector.load %arg11[%c0_31, %c0_32] : memref<1x128xf32, #tpu.memory_space<vmem>>, vector<1x128xf32>
          %72 = vector.broadcast %70 : vector<128x1xf32> to vector<128x128xf32>
          %73 = vector.broadcast %71 : vector<1x128xf32> to vector<128x128xf32>
          %74 = arith.mulf %72, %73 : vector<128x128xf32>
          %75 = arith.addf %69, %74 : vector<128x128xf32>
          %cst_33 = arith.constant -1.562500e-02 : f32
          %76 = vector.broadcast %cst_33 : f32 to vector<128x128xf32>
          %77 = arith.mulf %76, %75 : vector<128x128xf32>
          %c0_34 = arith.constant 0 : index
          %c0_35 = arith.constant 0 : index
          %78 = vector.load %arg15[%c0_34, %c0_35] : memref<8x128xf32, #tpu.memory_space<vmem>>, vector<8x128xf32>
          %79 = arith.mulf %50, %77 : vector<128x128xf32>
          %80 = vector.shape_cast %79 : vector<128x128xf32> to vector<1x128x128xf32>
          %cst_36 = arith.constant dense<0.000000e+00> : vector<1xf32>
          %81 = vector.multi_reduction <add>, %80, %cst_36 [1, 2] : vector<1x128x128xf32> to vector<1xf32>
          %82 = vector.shape_cast %81 : vector<1xf32> to vector<1x1x1xf32>
          %83 = vector.extract %82[0, 0, 0] : f32 from vector<1x1x1xf32>
          %84 = vector.broadcast %83 : f32 to vector<8x128xf32>
          %85 = arith.addf %78, %84 : vector<8x128xf32>
          %c0_37 = arith.constant 0 : index
          %c0_38 = arith.constant 0 : index
          %86 = vector.load %arg15[%c0_37, %c0_38] : memref<8x128xf32, #tpu.memory_space<vmem>>, vector<8x128xf32>
          tpu.vector_store %arg15[%c0_37, %c0_38], %85 {strides = array<i32>} : memref<8x128xf32, #tpu.memory_space<vmem>>, vector<8x128xf32>,
        } else {
        }
      } else {
      }
    } else {
    }
    %c1_i32 = arith.constant 1 : i32
    %14 = arith.cmpi eq, %arg1, %c1_i32 : i32
    %15 = arith.extui %14 : i1 to i32
    %c0_i32_3 = arith.constant 0 : i32
    %16 = arith.cmpi ne, %15, %c0_i32_3 : i32
    scf.if %16 {
      %c0 = arith.constant 0 : index
      %c0_4 = arith.constant 0 : index
      %17 = vector.load %arg15[%c0, %c0_4] : memref<8x128xf32, #tpu.memory_space<vmem>>, vector<8x128xf32>
      %c0_5 = arith.constant 0 : index
      %c0_6 = arith.constant 0 : index
      %18 = vector.load %arg14[%c0_5, %c0_6] : memref<8x128xf32, #tpu.memory_space<vmem>>, vector<8x128xf32>
      tpu.vector_store %arg14[%c0_5, %c0_6], %17 {strides = array<i32>} : memref<8x128xf32, #tpu.memory_space<vmem>>, vector<8x128xf32>,
    } else {
    }
    return
  }
  func.func @transform_0(%arg0: i32, %arg1: i32, %arg2: memref<4xi32, #tpu.memory_space<smem>>, %arg3: memref<4xi32, #tpu.memory_space<smem>>, %arg4: memref<4xi32, #tpu.memory_space<smem>>, %arg5: memref<1xf32, #tpu.memory_space<smem>>) -> (i32, i32) {
    %c2_i32 = arith.constant 2 : i32
    %0 = arith.muli %arg0, %c2_i32 : i32
    %1 = arith.addi %0, %arg1 : i32
    %2 = arith.index_cast %1 : i32 to index
    %3 = memref.load %arg2[%2] : memref<4xi32, #tpu.memory_space<smem>>
    %c0_i32 = arith.constant 0 : i32
    %c0_i32_0 = arith.constant 0 : i32
    return %3, %c0_i32 : i32, i32
  }
  func.func @transform_1(%arg0: i32, %arg1: i32, %arg2: memref<4xi32, #tpu.memory_space<smem>>, %arg3: memref<4xi32, #tpu.memory_space<smem>>, %arg4: memref<4xi32, #tpu.memory_space<smem>>, %arg5: memref<1xf32, #tpu.memory_space<smem>>) -> (i32, i32) {
    %c2_i32 = arith.constant 2 : i32
    %0 = arith.muli %arg0, %c2_i32 : i32
    %1 = arith.addi %0, %arg1 : i32
    %2 = arith.index_cast %1 : i32 to index
    %3 = memref.load %arg3[%2] : memref<4xi32, #tpu.memory_space<smem>>
    %c0_i32 = arith.constant 0 : i32
    %c0_i32_0 = arith.constant 0 : i32
    return %3, %c0_i32 : i32, i32
  }
  func.func @transform_2(%arg0: i32, %arg1: i32, %arg2: memref<4xi32, #tpu.memory_space<smem>>, %arg3: memref<4xi32, #tpu.memory_space<smem>>, %arg4: memref<4xi32, #tpu.memory_space<smem>>, %arg5: memref<1xf32, #tpu.memory_space<smem>>) -> (i32, i32) {
    %c2_i32 = arith.constant 2 : i32
    %0 = arith.muli %arg0, %c2_i32 : i32
    %1 = arith.addi %0, %arg1 : i32
    %2 = arith.index_cast %1 : i32 to index
    %3 = memref.load %arg2[%2] : memref<4xi32, #tpu.memory_space<smem>>
    %c0_i32 = arith.constant 0 : i32
    %c0_i32_0 = arith.constant 0 : i32
    return %3, %c0_i32 : i32, i32
  }
  func.func @transform_3(%arg0: i32, %arg1: i32, %arg2: memref<4xi32, #tpu.memory_space<smem>>, %arg3: memref<4xi32, #tpu.memory_space<smem>>, %arg4: memref<4xi32, #tpu.memory_space<smem>>, %arg5: memref<1xf32, #tpu.memory_space<smem>>) -> (i32, i32) {
    %c2_i32 = arith.constant 2 : i32
    %0 = arith.muli %arg0, %c2_i32 : i32
    %1 = arith.addi %0, %arg1 : i32
    %2 = arith.index_cast %1 : i32 to index
    %3 = memref.load %arg3[%2] : memref<4xi32, #tpu.memory_space<smem>>
    %c0_i32 = arith.constant 0 : i32
    %c0_i32_0 = arith.constant 0 : i32
    return %c0_i32, %3 : i32, i32
  }
  func.func @transform_4(%arg0: i32, %arg1: i32, %arg2: memref<4xi32, #tpu.memory_space<smem>>, %arg3: memref<4xi32, #tpu.memory_space<smem>>, %arg4: memref<4xi32, #tpu.memory_space<smem>>, %arg5: memref<1xf32, #tpu.memory_space<smem>>) -> (i32, i32) {
    %c2_i32 = arith.constant 2 : i32
    %0 = arith.muli %arg0, %c2_i32 : i32
    %1 = arith.addi %0, %arg1 : i32
    %2 = arith.index_cast %1 : i32 to index
    %3 = memref.load %arg2[%2] : memref<4xi32, #tpu.memory_space<smem>>
    %c0_i32 = arith.constant 0 : i32
    %c0_i32_0 = arith.constant 0 : i32
    return %3, %c0_i32 : i32, i32
  }
  func.func @transform_5(%arg0: i32, %arg1: i32, %arg2: memref<4xi32, #tpu.memory_space<smem>>, %arg3: memref<4xi32, #tpu.memory_space<smem>>, %arg4: memref<4xi32, #tpu.memory_space<smem>>, %arg5: memref<1xf32, #tpu.memory_space<smem>>) -> (i32, i32) {
    %c2_i32 = arith.constant 2 : i32
    %0 = arith.muli %arg0, %c2_i32 : i32
    %1 = arith.addi %0, %arg1 : i32
    %2 = arith.index_cast %1 : i32 to index
    %3 = memref.load %arg3[%2] : memref<4xi32, #tpu.memory_space<smem>>
    %c0_i32 = arith.constant 0 : i32
    %c0_i32_0 = arith.constant 0 : i32
    return %c0_i32, %3 : i32, i32
  }
  func.func @transform_6(%arg0: i32, %arg1: i32, %arg2: memref<4xi32, #tpu.memory_space<smem>>, %arg3: memref<4xi32, #tpu.memory_space<smem>>, %arg4: memref<4xi32, #tpu.memory_space<smem>>, %arg5: memref<1xf32, #tpu.memory_space<smem>>) -> (i32, i32) {
    %c2_i32 = arith.constant 2 : i32
    %0 = arith.muli %arg0, %c2_i32 : i32
    %1 = arith.addi %0, %arg1 : i32
    %2 = arith.index_cast %1 : i32 to index
    %3 = memref.load %arg2[%2] : memref<4xi32, #tpu.memory_space<smem>>
    %c0_i32 = arith.constant 0 : i32
    %c0_i32_0 = arith.constant 0 : i32
    return %3, %c0_i32 : i32, i32
  }
  func.func @transform_7(%arg0: i32, %arg1: i32, %arg2: memref<4xi32, #tpu.memory_space<smem>>, %arg3: memref<4xi32, #tpu.memory_space<smem>>, %arg4: memref<4xi32, #tpu.memory_space<smem>>, %arg5: memref<1xf32, #tpu.memory_space<smem>>) -> (i32, i32) {
    %c2_i32 = arith.constant 2 : i32
    %0 = arith.muli %arg0, %c2_i32 : i32
    %1 = arith.addi %0, %arg1 : i32
    %2 = arith.index_cast %1 : i32 to index
    %3 = memref.load %arg3[%2] : memref<4xi32, #tpu.memory_space<smem>>
    %c0_i32 = arith.constant 0 : i32
    %c0_i32_0 = arith.constant 0 : i32
    return %c0_i32, %3 : i32, i32
  }
  func.func @transform_8(%arg0: i32, %arg1: i32, %arg2: memref<4xi32, #tpu.memory_space<smem>>, %arg3: memref<4xi32, #tpu.memory_space<smem>>, %arg4: memref<4xi32, #tpu.memory_space<smem>>, %arg5: memref<1xf32, #tpu.memory_space<smem>>) -> (i32, i32) {
    %c0_i32 = arith.constant 0 : i32
    %c0_i32_0 = arith.constant 0 : i32
    return %arg0, %c0_i32 : i32, i32
  }
}

</mosaic_0001>

<bundles_post_ra>
// kernel: tpu_custom_call.1
= control target key start
LH: loop header
LB: loop body
LE: loop exit
PB: predicated region body
PF: predicated region fallthrough
CT: control target
= control target key end

     0   :  { %s4339_s0 = inlined_call_operand.vmem [shape: s32[4], index: 0, kind: input, shape index: {}]   ;;  %s4340_s4 = inlined_call_operand.vmem [shape: bf16[256,128], index: 4, kind: input, shape index: {}]   ;;  %s4341_s5 = inlined_call_operand.vmem [shape: bf16[256,128], index: 5, kind: input, shape index: {}]   ;;  %s4342_s6 = inlined_call_operand.vmem [shape: f32[256,1], index: 6, kind: input, shape index: {}]   ;;  %s4343_s7 = inlined_call_operand.vmem [shape: f32[1,256], index: 7, kind: input, shape index: {}]   ;;  %s4344_s8 = inlined_call_operand.vmem [shape: f32[256,1], index: 8, kind: input, shape index: {}]   ;;  %s4345_s9 = inlined_call_operand.vmem [shape: f32[1,256], index: 9, kind: input, shape index: {}]   ;;  %s4346_s10 = inlined_call_operand.vmem [shape: f32[256,1], index: 10, kind: input, shape index: {}]   ;;  %s4347_s11 = inlined_call_operand.vmem [shape: f32[1,256], index: 11, kind: input, shape index: {}]   ;;  %s4348_s12 = inlined_call_operand.hbm [shape: f32[16,128], index: 12, kind: output, shape index: {}]   ;;  %s4349_s1 = inlined_call_operand.vmem [shape: s32[4], index: 1, kind: input, shape index: {}]   ;;  %s4350_s2 = inlined_call_operand.vmem [shape: s32[4], index: 2, kind: input, shape index: {}]   ;;  %s4351_s3 = inlined_call_operand.<no memory space> [shape: f32[1], index: 3, kind: input, shape index: {}]  }
   0x1   :  { %4368 = sst [smem:[#allocation25_spill]] %s4340_s4  ;;  %s17_s23 = sshll.u32 %s4339_s0, 4  ;;  %s18_s23 = int_to_ptr.vmem [resolvable:$true] %s17_s23 }
   0x2   :  { %4369 = sst [smem:[#allocation26_spill]] %s4341_s5  ;;  %s21_s26 = sshll.u32 %s4349_s1, 4  ;;  %s22_s26 = int_to_ptr.vmem [resolvable:$true] %s21_s26 }
   0x3   :  { %4370 = sst [smem:[#allocation27_spill]] %s4348_s12  ;;  %s3195_s27 = scalar_lea.vmem %s18_s23, 16 }
   0x4   :  { %p3196_p0 = scmp.ne.s32.totalorder %s18_s23, %s3195_s27  ;;  %p3200_p1 = scmp.lt.s32.totalorder %s18_s23, %s18_s23 }
   0x5   :  { %p3201_p2 = scmp.lt.s32.totalorder %s3195_s27, %s3195_s27 }
   0x7   :  { %p3202_p3 = por %p3201_p2, %p3200_p1 }
   0x9   :  { %p3203_p4 = pnand %p3202_p3, %p3196_p0 }
   0xb   :  { %3206 = shalt.err (!%p3203_p4)  }
   0xc   :  { %s3329_s28 = smov [#allocation4]   ;;  %s3207_s29 = scalar_lea.vmem %s22_s26, 16 }
   0xd   :  { %20 = dma.vmem_to_smem %s18_s23, 16, %s3329_s28, [#allocation3] }
   0xe   :  { %p3208_p5 = scmp.ne.s32.totalorder %s22_s26, %s3207_s29  ;;  %p3212_p6 = scmp.lt.s32.totalorder %s22_s26, %s22_s26 }
   0xf   :  { %p3213_p7 = scmp.lt.s32.totalorder %s3207_s29, %s3207_s29 }
  0x11   :  { %p3214_p8 = por %p3213_p7, %p3212_p6 }
  0x13   :  { %p3215_p9 = pnand %p3214_p8, %p3208_p5 }
  0x15   :  { %3218 = shalt.err (!%p3215_p9)  }
  0x16   :  { %s3330_s0 = smov [#allocation5]   ;;  %s25_s13 = sshll.u32 %s4350_s2, 4  ;;  %s26_s13 = int_to_ptr.vmem [resolvable:$true] %s25_s13 }
  0x17   :  { %24 = dma.vmem_to_smem %s22_s26, 16, %s3330_s0, [#allocation3] }
  0x18   :  { %29 = sst [smem:[#allocation7]] %s4351_s3  ;;  %s3219_s16 = scalar_lea.vmem %s26_s13, 16 }
  0x19   :  { %p3220_p10 = scmp.ne.s32.totalorder %s26_s13, %s3219_s16  ;;  %p3224_p11 = scmp.lt.s32.totalorder %s26_s13, %s26_s13 }
  0x1a   :  { %p3225_p12 = scmp.lt.s32.totalorder %s3219_s16, %s3219_s16 }
  0x1c   :  { %p3226_p13 = por %p3225_p12, %p3224_p11 }
  0x1e   :  { %p3227_p0 = pnand %p3226_p13, %p3220_p10 }
  0x20   :  { %3230 = shalt.err (!%p3227_p0)  }
  0x21   :  { %s3331_s17 = smov [#allocation6]  }
  0x22   :  { %28 = dma.vmem_to_smem %s26_s13, 16, %s3331_s17, [#allocation3] }
  0x23   :  { %3291 = dma.done.wait [#allocation3], 48 }
  0x24   :  { %3292 = vsyncadd [#allocation3], 4294967248 }
  0x25   :  { %31 = sfence }
  0x26   :  { %32 = vsyncpa [#allocation9], 0 }
  0x27   :  { %34 = vsyncpa [#allocation9 + $0x1], 0  ;;  %s3418_s2 = smov 0   ;;  %s3420_s18 = smov 0  }
  0x28   :  { %s3422_s19 = smov 0   ;;  %s3424_s3 = smov 0  }
  0x29   :  { %s3426_s20 = smov 0   ;;  %s3428_s21 = smov 0  }
  0x2a   :  { %s3430_s22 = smov 0   ;;  %s3432_s23 = smov 0  }
  0x2b LB: > { %4371 = sst [smem:[#allocation12_spill]] %s3299_s2  ;;  %s2868_s24 = sadd.s32 4294967295, %s3327_s23   ;;  %s3327_s23 = sphi %s3432_s23, %s40_s23   ;;  %s3323_s22 = sphi %s3430_s22, %s4413_s22   ;;  %s3319_s21 = sphi %s3428_s21, %s4412_s21   ;;  %s3315_s20 = sphi %s3426_s20, %s4411_s20   ;;  %s3311_s3 = sphi %s3424_s3, %s4410_s3   ;;  %s3307_s19 = sphi %s3422_s19, %s4409_s19   ;;  %s3303_s18 = sphi %s3420_s18, %s4408_s18   ;;  %s3299_s2 = sphi %s3418_s2, %s4407_s2  }
  0x2c   : > { %4372 = sst [smem:[#allocation13_spill]] %s3303_s18  ;;  %s2869_s25 = sadd.s32 4294967294, %s3327_s23  }
  0x2d   : > { %4373 = sst [smem:[#allocation14_spill]] %s3307_s19  ;;  %s49_s26 = sadd.s32 1, %s3319_s21 }
  0x2e   : > { %4374 = sst [smem:[#allocation15_spill]] %s3315_s20  ;;  %p50_p1 = scmp.ge.s32.totalorder %s49_s26, 2 }
  0x2f   : > { %4375 = sst [smem:[#allocation16_spill]] %s3319_s21  ;;  %s52_s27 = sadd.s32 1, %s3323_s22 }
  0x30   : > { %4376 = sst [smem:[#allocation17_spill]] %s3323_s22  ;;  %p325_p2 = scmp.ne.s32.totalorder %s3307_s19, %s3303_s18 }
  0x31   : > { %4377 = sst [smem:[#allocation18_spill]] %s3327_s23  ;;  %p326_p3 = scmp.eq.s32.totalorder %s2868_s24, 3 }
  0x32   : > { %s4415_s26 = smov (%p50_p1, %s49_s26), 0  ;;  %s4417_s27 = smov (!%p50_p1, %s52_s27), %s3323_s22 }
  0x33   : > { %4378 = sst [smem:[#allocation19_spill]] %s4415_s26  ;;  %p3467_p4 = por %p326_p3, %p325_p2 }
  0x34   : > { %p331_p5 = scmp.ne.s32.totalorder %s3303_s18, %s3299_s2  ;;  %p54_p6 = scmp.ge.s32.totalorder %s4417_s27, 2 }
  0x35   : > { %s4379_s28 = scalar_select %p3467_p4, 1, 0 }
  0x36   : > { %p332_p7 = scmp.eq.s32.totalorder %s2869_s25, 3  ;;  %p2888_p8 = scmp.ge.s32.totalorder %s3327_s23, 1 }
  0x37   : > { %4380 = sst [smem:[#allocation20_spill]] %s4379_s28  ;;  %p461_p9 = scmp.lt.s32.totalorder %s3327_s23, 5 }
  0x38   : > { %s4419_s27 = smov (%p54_p6, %s4417_s27), 0  ;;  %p3477_p10 = por %p332_p7, %p331_p5 }
  0x39   : > { %4381 = sst [smem:[#allocation21_spill]] %s4419_s27  ;;  %p462_p11 = pnand %p2888_p8, %p461_p9 }
  0x3a   : > { %s4382_s29 = scalar_select %p3477_p10, 1, 0 }
  0x3b   : > { %s312_s0 = ssub.s32 %s3323_s22, %s4419_s27  ;;  %s315_s1 = sadd.s32 1, %s3307_s19 }
  0x3c   : > { %4383 = sst [smem:[#allocation22_spill]] %s4382_s29  ;;  %p313_p12 = scmp.eq.s32.totalorder %s312_s0, 0 }
  0x3d   : > { %465 = sbr.rel (%p462_p11) target bundleno = 2873 (0xb39), region = 52 }
  0x3e   : > { %s3485_s30 = scalar_select %p313_p12, %s3307_s19, %s315_s1  }
  0x40   : > { %4384 = sst [smem:[#allocation23_spill]] %s3485_s30 }
  0x44   : > { %s4352_s13 = sand.u32 1, %s3303_s18   ;;  %s2890_s14 = sshll.u32 %s3315_s20, 1 }
  0x45   : > { %s3491_s15 = sshll.u32 %s4352_s13, 3  ;;  %s3494_s16 = sadd.s32 %s3311_s3, %s2890_s14 }
  0x46   : > { %s550_s17 = sld [smem:[#allocation4 + %s3494_s16]]  ;;  %p2909_p8 = scmp.ne.s32.totalorder %s3311_s3, 0 }
  0x47   : > { %s562_s24 = sld [smem:[#allocation5 + %s3494_s16]]  ;;  %v3332_v0 = vmov (!%p2909_p8), 0.0  }
  0x48   : > { %s574_s25 = sld [smem:[#allocation4 + %s3494_s16]]  ;;  %644 = vst [vmem:[#allocation2] sm:$0xff] (!%p2909_p8), %v3332_v0 }
  0x49   : > { %s586_s0 = sld [smem:[#allocation5 + %s3494_s16]] }
  0x4a   : > { %s3501_s1 = sld [smem:[#allocation4 + %s3494_s16]] }
  0x4b   : > { %s607_s13 = sld [smem:[#allocation5 + %s3494_s16]] }
  0x4c   : > { %s3505_s27 = sld [smem:[#allocation4 + %s3494_s16]]  ;;  %s2891_s22 = sshll.u32 %s550_s17, 4 }
  0x4d   : > { %s3508_s14 = sld [smem:[#allocation4 + %s3494_s16]]  ;;  %p552_p13 = scmp.lt.s32.totalorder %s2891_s22, 31 }
  0x4e   : > { %s3511_s26 = sld [smem:[#allocation5 + %s3494_s16]]  ;;  %s2894_s30 = sshll.u32 %s562_s24, 4 }
  0x4f   : > { %s3514_s21 = sld [smem:[#allocation5 + %s3494_s16]]  ;;  %p564_p0 = scmp.lt.s32.totalorder %s2894_s30, 31 }
  0x50   : > { %s2897_s19 = sshll.u32 %s574_s25, 4  ;;  %s4421_s22 = smov (!%p552_p13, %s2891_s22), 31 }
  0x51   : > { %s4423_s30 = smov (!%p564_p0, %s2894_s30), 31  ;;  %s2892_s29 = sshll.u32 %s4421_s22, 2 }
  0x52   : > { %4385 = sst [smem:[#allocation24_spill]] %s3505_s27  ;;  %p576_p1 = scmp.lt.s32.totalorder %s2897_s19, 31 }
  0x53   : > { %s4386_s4 = sld [smem:[#allocation25_spill]]  ;;  %s2895_s28 = sshll.u32 %s4423_s30, 2 }
  0x54   : > { %s4387_s5 = sld [smem:[#allocation26_spill]]  ;;  %p587_p2 = scmp.lt.s32.totalorder %s586_s0, 1 }
  0x55   : > { %s4425_s19 = smov (!%p576_p1, %s2897_s19), 31  ;;  %s2901_s22 = sshll.u32 %s3501_s1, 4 }
  0x56   : > { %s4427_s0 = smov (!%p587_p2, %s586_s0), 1  ;;  %s2898_s24 = sshll.u32 %s4425_s19, 3 }
  0x57   : > { %s3532_s2 = scalar_lea.vmem %s4342_s6, %s2898_s24  ;;  %p597_p3 = scmp.lt.s32.totalorder %s2901_s22, 31 }
  0x58   : > { %p608_p5 = scmp.lt.s32.totalorder %s607_s13, 1  ;;  %s2905_s18 = sshll.u32 %s3508_s14, 4 }
  0x59   : > { %s3519_s12 = scalar_lea.vmem %s4386_s4, %s2892_s29  ;;  %p629_p6 = scmp.lt.s32.totalorder %s3514_s21, 1 }
  0x5a   : > { %s3524_s20 = scalar_lea.vmem %s4387_s5, %s2895_s28  ;;  %s4429_s22 = smov (!%p597_p3, %s2901_s22), 31 }
  0x5b   : > { %s4431_s13 = smov (!%p608_p5, %s607_s13), 1  ;;  %s2902_s28 = sshll.u32 %s4429_s22, 3 }
  0x5c   : > { %p618_p7 = scmp.lt.s32.totalorder %s2905_s18, 31  ;;  %s3543_s17 = scalar_lea.vmem %s4344_s8, %s2902_s28 }
  0x5d   : > { %s3548_s25 = scalar_lea.vmem %s4345_s9, %s4431_s13  ;;  %s4435_s21 = smov (!%p629_p6, %s3514_s21), 1 }
  0x5e   : > { %s4433_s18 = smov (!%p618_p7, %s2905_s18), 31  ;;  %s3559_s5 = scalar_lea.vmem %s4347_s11, %s4435_s21 }
  0x5f   : > { %s2906_s23 = sshll.u32 %s4433_s18, 3  ;;  %s547_s28 = scalar_lea.vmem [#allocation8], %s3491_s15 }
  0x60   : > { %s3554_s30 = scalar_lea.vmem %s4346_s10, %s2906_s23  ;;  %643 = sbr.rel (%p2909_p8) target bundleno = 103 (0x67), region = 56 }
  0x67 PF: > { %s645_s13 = sld [smem:[#allocation6 + %s3494_s16]] }
  0x6d   : > { %p2910_p9 = scmp.eq.s32.totalorder %s645_s13, 0 }
  0x6e   : > { %v3103_v1 = vld [vmem:[%s3524_s20] sm:$0xff] (!%p2910_p9)   ;;  %v3104_v2 = vld [vmem:[%s3524_s20 + $0x8] sm:$0xff] (!%p2910_p9)   ;;  %v3333_v3 = vmov (!%p2910_p9), 0   ;;  %v3105_v4 = vld [vmem:[%s3524_s20 + $0x10] sm:$0xff] (!%p2910_p9)   ;;  %s1042_s4 = sld [smem:[#allocation7]] (!%p2910_p9)  ;;  %s4388_s21 = scalar_lea.vmem (!%p2910_p9), %s4343_s7, %s4427_s0 }
  0x6f   : > { %649 = sbr.rel (%p2910_p9) target bundleno = 2838 (0xb16), region = 60  ;;  %3102 = vset.pattern.permute.xlu1 (!%p2910_p9), %v3333_v3  ;;  %3101 = vset.pattern.permute.xlu0 (!%p2910_p9), %v3333_v3  ;;  %v3111_v5 = vld [vmem:[%s3519_s12] sm:$0xff] (!%p2910_p9)   ;;  %v3106_v7 = vld [vmem:[%s3524_s20 + $0x18] sm:$0xff] (!%p2910_p9)   ;;  %v877_v8 = vld [vmem:[%s3532_s2 + $0x10] sm:$0xff] (!%p2910_p9)  ;;  %s4389_s16 = sld [smem:[#allocation24_spill]] (!%p2910_p9) }
  0x70   : > { %2959 = vmatprep.subr.bf16.mxu0 (!%p2910_p9), %v3103_v1  ;;  %2991 = vmatprep.subr.bf16.mxu1 (!%p2910_p9), %v3103_v1  ;;  %v3112_v6 = vld [vmem:[%s3519_s12 + $0x20] sm:$0xff] (!%p2910_p9)   ;;  %v878_v10 = vld [vmem:[%s3532_s2 + $0x18] sm:$0xff] (!%p2910_p9)  ;;  %v876_v11 = vld [vmem:[%s3532_s2 + $0x8] sm:$0xff] (!%p2910_p9) }
  0x71   : > { %2960 = vmatpush3.bf16.xpose.msra.mxu0 (!%p2910_p9), %v3103_v1  ;;  %2999 = vmatpush3.bf16.xpose.msra.mxu1 (!%p2910_p9), %v3103_v1  ;;  %v875_v9 = vld [vmem:[%s3532_s2] sm:$0xff] (!%p2910_p9)  ;;  %v880_v12 = vld [vmem:[%s3532_s2 + $0x28] sm:$0xff] (!%p2910_p9)  ;;  %v882_v15 = vld [vmem:[%s3532_s2 + $0x38] sm:$0xff] (!%p2910_p9) }
  0x72   : > { %2961 = vmatprep.subr.bf16.mxu0 (!%p2910_p9), %v3104_v2  ;;  %2992 = vmatprep.subr.bf16.mxu1 (!%p2910_p9), %v3104_v2  ;;  %v879_v13 = vld [vmem:[%s3532_s2 + $0x20] sm:$0xff] (!%p2910_p9)  ;;  %v881_v16 = vld [vmem:[%s3532_s2 + $0x30] sm:$0xff] (!%p2910_p9)  ;;  %v884_v17 = vld [vmem:[%s3532_s2 + $0x48] sm:$0xff] (!%p2910_p9) }
  0x73   : > { %2975 = vmatprep.mubr.bf16.mxu0 (!%p2910_p9), %v3111_v5  ;;  %2983 = vmatprep.mubr.bf16.mxu1 (!%p2910_p9), %v3112_v6  ;;  %v3107_v14 = vld [vmem:[%s3524_s20 + $0x20] sm:$0xff] (!%p2910_p9)   ;;  %v3108_v19 = vld [vmem:[%s3524_s20 + $0x28] sm:$0xff] (!%p2910_p9)   ;;  %v886_v20 = vld [vmem:[%s3532_s2 + $0x58] sm:$0xff] (!%p2910_p9) }
  0x74   : > { %904 = vperm.xlu1 (!%p2910_p9), %3102, %v877_v8   ;;  %894 = vperm.xlu0 (!%p2910_p9), %3101, %v875_v9   ;;  %v883_v18 = vld [vmem:[%s3532_s2 + $0x40] sm:$0xff] (!%p2910_p9)  ;;  %v885_v21 = vld [vmem:[%s3532_s2 + $0x50] sm:$0xff] (!%p2910_p9)  ;;  %v888_v22 = vld [vmem:[%s3532_s2 + $0x68] sm:$0xff] (!%p2910_p9)  ;;  %v3623_v62 = vstv (!%p2910_p9), %s1042_s4 }
  0x75   : > { %v887_v23 = vld [vmem:[%s3532_s2 + $0x60] sm:$0xff] (!%p2910_p9)  ;;  %v3109_v24 = vld [vmem:[%s3524_s20 + $0x30] sm:$0xff] (!%p2910_p9)   ;;  %v890_v25 = vld [vmem:[%s3532_s2 + $0x78] sm:$0xff] (!%p2910_p9)  ;;  %p2928_p11 = scmp.eq.s32.totalorder (!%p2910_p9), %s4389_s16, %s3511_s26 }
  0x76   : > { %v889_v26 = vld [vmem:[%s3532_s2 + $0x70] sm:$0xff]  ;;  %v3110_v27 = vld [vmem:[%s3524_s20 + $0x38] sm:$0xff]   ;;  %v3113_v28 = vld [vmem:[%s3519_s12 + $0x8] sm:$0xff]   ;;  %s4390_s0 = sld [smem:[#allocation24_spill]] (!%p2928_p11)  ;;  %p1273_p13 = scmp.lt.s32.totalorder (!%p2928_p11), %s3511_s26, 1 }
  0x77   : > { %v3114_v29 = vld [vmem:[%s3519_s12 + $0x28] sm:$0xff]   ;;  %v3115_v30 = vld [vmem:[%s3519_s12 + $0x10] sm:$0xff]   ;;  %v3117_v32 = vld [vmem:[%s3519_s12 + $0x18] sm:$0xff]  }
  0x78   : > { %909 = vperm.xlu1 %3102, %v878_v10   ;;  %899 = vperm.xlu0 %3101, %v876_v11   ;;  %v3116_v31 = vld [vmem:[%s3519_s12 + $0x30] sm:$0xff]   ;;  %v3118_v33 = vld [vmem:[%s3519_s12 + $0x38] sm:$0xff]   ;;  %v3605_v48 = vld [vmem:[%s4388_s21] ss:$0 sm:$0xff] }
  0x79   : > { %2962 = vmatpush3.bf16.xpose.msra.mxu0 %v3104_v2  ;;  %3000 = vmatpush3.bf16.xpose.msra.mxu1 %v3104_v2 }
  0x7a   : > { %2963 = vmatprep.subr.bf16.mxu0 %v3105_v4  ;;  %2993 = vmatprep.subr.bf16.mxu1 %v3105_v4 }
  0x7c   : > { %919 = vperm.xlu1 %3102, %v880_v12   ;;  %914 = vperm.xlu0 %3101, %v879_v13   ;;  %p1272_p12 = scmp.lt.s32.totalorder (!%p2928_p11), %s4390_s0, 1 }
  0x7e   : > { %p1274_p0 = pnand (!%p2928_p11), %p1273_p13, %p1272_p12 }
  0x80   : > { %929 = vperm.xlu1 %3102, %v882_v15   ;;  %924 = vperm.xlu0 %3101, %v881_v16  }
  0x81   : > { %2964 = vmatpush3.bf16.xpose.msra.mxu0 %v3105_v4  ;;  %3001 = vmatpush3.bf16.xpose.msra.mxu1 %v3105_v4 }
  0x82   : > { %2965 = vmatprep.subr.bf16.mxu0 %v3106_v7  ;;  %2994 = vmatprep.subr.bf16.mxu1 %v3106_v7 }
  0x84   : > { %939 = vperm.xlu1 %3102, %v884_v17   ;;  %934 = vperm.xlu0 %3101, %v883_v18  }
  0x88   : > { %949 = vperm.xlu1 %3102, %v886_v20   ;;  %944 = vperm.xlu0 %3101, %v885_v21  }
  0x89   : > { %2966 = vmatpush3.bf16.xpose.msra.mxu0 %v3106_v7  ;;  %3002 = vmatpush3.bf16.xpose.msra.mxu1 %v3106_v7 }
  0x8a   : > { %2967 = vmatprep.subr.bf16.mxu0 %v3107_v14  ;;  %2995 = vmatprep.subr.bf16.mxu1 %v3107_v14 }
  0x8c   : > { %959 = vperm.xlu1 %3102, %v888_v22   ;;  %954 = vperm.xlu0 %3101, %v887_v23  }
  0x90   : > { %969 = vperm.xlu1 %3102, %v890_v25   ;;  %964 = vperm.xlu0 %3101, %v889_v26  }
  0x91   : > { %2968 = vmatpush3.bf16.xpose.msra.mxu0 %v3107_v14  ;;  %3003 = vmatpush3.bf16.xpose.msra.mxu1 %v3107_v14 }
  0x92   : > { %2969 = vmatprep.subr.bf16.mxu0 %v3108_v19  ;;  %2996 = vmatprep.subr.bf16.mxu1 %v3108_v19 }
  0x99   : > { %2970 = vmatpush3.bf16.xpose.msra.mxu0 %v3108_v19  ;;  %3004 = vmatpush3.bf16.xpose.msra.mxu1 %v3108_v19 }
  0x9a   : > { %2971 = vmatprep.subr.bf16.mxu0 %v3109_v24  ;;  %2997 = vmatprep.subr.bf16.mxu1 %v3109_v24 }
  0xa1   : > { %2972 = vmatpush3.bf16.xpose.msra.mxu0 %v3109_v24  ;;  %3005 = vmatpush3.bf16.xpose.msra.mxu1 %v3109_v24 }
  0xa2   : > { %2973 = vmatprep.subr.bf16.mxu0 %v3110_v27  ;;  %2998 = vmatprep.subr.bf16.mxu1 %v3110_v27 }
  0xa9   : > { %2974 = vmatpush3.bf16.xpose.msra.mxu0 %v3110_v27  ;;  %3006 = vmatpush3.bf16.xpose.msra.mxu1 %v3110_v27 }
  0xb0   : > { %2976 = vmatmul.mubr.bf16.vlgmr.msra.gmra.mrb[0].mxu0 %v3113_v28  ;;  %2984 = vmatmul.mubr.bf16.vlgmr.msra.gmra.mrb[0].mxu1 %v3114_v29 }
  0xb1   : > { %2979 = vmatprep.mubr.bf16.mxu0 %v3115_v30  ;;  %2987 = vmatprep.mubr.bf16.mxu1 %v3116_v31 }
  0xb8   : > { %2980 = vmatmul.mubr.bf16.gmra.mrb[4].mxu0 %v3117_v32  ;;  %2988 = vmatmul.mubr.bf16.gmra.mrb[4].mxu1 %v3118_v33 }
  0xf3   : > { %v905_v34 = vpop.permute.xlu1 %904  ;;  %v895_v35 = vpop.permute.xlu0 %894 }
  0xf4   : > { %v980_v49 = vadd.f32 %v3605_v48, %v905_v34  ;;  %v978_v50 = vadd.f32 %v3605_v48, %v895_v35 }
  0xf7   : > { %v910_v36 = vpop.permute.xlu1 %909  ;;  %v900_v37 = vpop.permute.xlu0 %899 }
  0xf8   : > { %v981_v51 = vadd.f32 %v3605_v48, %v910_v36  ;;  %v979_v52 = vadd.f32 %v3605_v48, %v900_v37 }
  0xfb   : > { %v3596_v38 = vpop.permute.xlu1 %919  ;;  %v915_v39 = vpop.permute.xlu0 %914 }
  0xfc   : > { %v3612_v53 = vadd.f32 %v3605_v48, %v915_v39 }
  0xff   : > { %v930_v40 = vpop.permute.xlu1 %929  ;;  %v925_v41 = vpop.permute.xlu0 %924 }
 0x100   : > { %v3615_v54 = vadd.f32 %v3605_v48, %v930_v40  ;;  %v3618_v55 = vadd.f32 %v3605_v48, %v925_v41 }
 0x103   : > { %v940_v42 = vpop.permute.xlu1 %939  ;;  %v935_v43 = vpop.permute.xlu0 %934 }
 0x104   : > { %v987_v58 = vadd.f32 %v3605_v48, %v940_v42  ;;  %v986_v59 = vadd.f32 %v3605_v48, %v935_v43 }
 0x107   : > { %v950_v44 = vpop.permute.xlu1 %949  ;;  %v945_v45 = vpop.permute.xlu0 %944 }
 0x108   : > { %v989_v60 = vadd.f32 %v3605_v48, %v950_v44  ;;  %v988_v0 = vadd.f32 %v3605_v48, %v945_v45 }
 0x10b   : > { %v3598_v46 = vpop.permute.xlu1 %959  ;;  %v955_v47 = vpop.permute.xlu0 %954 }
 0x10c   : > { %v3627_v1 = vadd.f32 %v3605_v48, %v955_v47 }
 0x10f   : > { %v970_v56 = vpop.permute.xlu1 %969  ;;  %v965_v57 = vpop.permute.xlu0 %964 }
 0x110   : > { %v3630_v6 = vadd.f32 %v3605_v48, %v970_v56  ;;  %v3633_v7 = vadd.f32 %v3605_v48, %v965_v57 }
 0x183   : > { %v2977_v61 = vpop.f32.mrb[0].mxu0  ;;  %v2985_v63 = vpop.f32.mrb[0].mxu1 }
 0x184   : > { %v996_v2 = vmul.f32 2.0, %v2977_v61  ;;  %v1004_v3 = vmul.f32 2.0, %v2985_v63  ;;  %v812_v4 = vpop.f32.mrb[1].mxu0  ;;  %v844_v5 = vpop.f32.mrb[1].mxu1 }
 0x185   : > { %v994_v8 = vmul.f32 2.0, %v812_v4  ;;  %v1002_v9 = vmul.f32 2.0, %v844_v5  ;;  %v2978_v10 = vpop.f32.mrb[2].mxu0  ;;  %v2986_v11 = vpop.f32.mrb[2].mxu1 }
 0x186   : > { %v1012_v12 = vsub.f32 %v980_v49, %v996_v2  ;;  %v1020_v13 = vsub.f32 %v988_v0, %v1004_v3  ;;  %v997_v14 = vmul.f32 2.0, %v2978_v10  ;;  %v1005_v15 = vmul.f32 2.0, %v2986_v11  ;;  %v815_v16 = vpop.f32.mrb[3].mxu0  ;;  %v847_v17 = vpop.f32.mrb[3].mxu1 }
 0x187   : > { %v1010_v18 = vsub.f32 %v978_v50, %v994_v8  ;;  %v1018_v19 = vsub.f32 %v986_v59, %v1002_v9  ;;  %v995_v20 = vmul.f32 2.0, %v815_v16  ;;  %v1003_v21 = vmul.f32 2.0, %v847_v17 }
 0x188   : > { %v1028_v22 = vmax.f32 %v1012_v12, 0.0  ;;  %v1036_v23 = vmax.f32 %v1020_v13, 0.0  ;;  %v1013_v24 = vsub.f32 %v981_v51, %v997_v14  ;;  %v1021_v25 = vsub.f32 %v989_v60, %v1005_v15 }
 0x189   : > { %v1026_v26 = vmax.f32 %v1010_v18, 0.0  ;;  %v1034_v27 = vmax.f32 %v1018_v19, 0.0  ;;  %v1011_v28 = vsub.f32 %v979_v52, %v995_v20  ;;  %v1019_v29 = vsub.f32 %v987_v58, %v1003_v21 }
 0x18a   : > { %v1045_v30 = vsub.f32 0.0, %v1028_v22  ;;  %v1053_v31 = vsub.f32 0.0, %v1036_v23  ;;  %v1029_v32 = vmax.f32 %v1013_v24, 0.0  ;;  %v1037_v33 = vmax.f32 %v1021_v25, 0.0 }
 0x18b   : > { %v1043_v34 = vsub.f32 0.0, %v1026_v26  ;;  %v1051_v35 = vsub.f32 0.0, %v1034_v27  ;;  %v1027_v36 = vmax.f32 %v1011_v28, 0.0  ;;  %v1035_v37 = vmax.f32 %v1019_v29, 0.0  ;;  %v2981_v39 = vpop.f32.mrb[4].mxu0  ;;  %v2989_v40 = vpop.f32.mrb[4].mxu1 }
 0x18c   : > { %v1062_v41 = vmul.f32 %v3623_v62, %v1045_v30  ;;  %v1070_v42 = vmul.f32 %v3623_v62, %v1053_v31  ;;  %v1046_v43 = vsub.f32 0.0, %v1029_v32  ;;  %v1054_v44 = vsub.f32 0.0, %v1037_v33  ;;  %v828_v45 = vpop.f32.mrb[5].mxu0  ;;  %v860_v47 = vpop.f32.mrb[5].mxu1 }
 0x18d   : > { %v1060_v49 = vmul.f32 %v3623_v62, %v1043_v34  ;;  %v1068_v50 = vmul.f32 %v3623_v62, %v1051_v35  ;;  %v1044_v51 = vsub.f32 0.0, %v1027_v36  ;;  %v1052_v52 = vsub.f32 0.0, %v1035_v37  ;;  %v2982_v56 = vpop.f32.mrb[6].mxu0  ;;  %v2990_v57 = vpop.f32.mrb[6].mxu1 }
 0x18e   : > { %v1080_v58 = vmul.f32 1.442695, %v1062_v41  ;;  %v1096_v59 = vmul.f32 1.442695, %v1070_v42  ;;  %v1063_v60 = vmul.f32 %v3623_v62, %v1046_v43  ;;  %v1071_v61 = vmul.f32 %v3623_v62, %v1054_v44  ;;  %v831_v63 = vpop.f32.mrb[7].mxu0  ;;  %v863_v0 = vpop.f32.mrb[7].mxu1 }
 0x18f   : > { %v1076_v2 = vmul.f32 1.442695, %v1060_v49  ;;  %v1092_v3 = vmul.f32 1.442695, %v1068_v50  ;;  %v1061_v4 = vmul.f32 %v3623_v62, %v1044_v51  ;;  %v1069_v5 = vmul.f32 %v3623_v62, %v1052_v52 }
 0x190   : > { %3119 = vpow2.f32 %v1080_v58  ;;  %v1082_v8 = vmul.f32 1.442695, %v1063_v60  ;;  %v1098_v9 = vmul.f32 1.442695, %v1071_v61  ;;  %v1000_v10 = vmul.f32 2.0, %v2981_v39 }
 0x191   : > { %3121 = vpow2.f32 %v1096_v59  ;;  %v1078_v11 = vmul.f32 1.442695, %v1061_v4  ;;  %v1094_v12 = vmul.f32 1.442695, %v1069_v5  ;;  %v1008_v13 = vmul.f32 2.0, %v2989_v40 }
 0x192   : > { %3123 = vpow2.f32 %v1076_v2  ;;  %v1016_v14 = vsub.f32 %v3618_v55, %v1000_v10  ;;  %v998_v15 = vmul.f32 2.0, %v828_v45  ;;  %v1006_v16 = vmul.f32 2.0, %v860_v47 }
 0x193   : > { %3125 = vpow2.f32 %v1092_v3  ;;  %v1024_v17 = vsub.f32 %v3633_v7, %v1008_v13  ;;  %v1001_v18 = vmul.f32 2.0, %v2982_v56  ;;  %v1009_v19 = vmul.f32 2.0, %v2990_v57 }
 0x194   : > { %3127 = vpow2.f32 %v1082_v8  ;;  %v1032_v20 = vmax.f32 %v1016_v14, 0.0  ;;  %v1014_v21 = vsub.f32 %v3612_v53, %v998_v15  ;;  %v1022_v22 = vsub.f32 %v3627_v1, %v1006_v16 }
 0x195   : > { %3129 = vpow2.f32 %v1098_v9  ;;  %v1040_v23 = vmax.f32 %v1024_v17, 0.0  ;;  %v1017_v24 = vsub.f32 %v3615_v54, %v1001_v18  ;;  %v1025_v25 = vsub.f32 %v3630_v6, %v1009_v19 }
 0x196   : > { %3131 = vpow2.f32 %v1078_v11  ;;  %v1049_v55 = vsub.f32 0.0, %v1032_v20  ;;  %v1030_v26 = vmax.f32 %v1014_v21, 0.0  ;;  %v1038_v27 = vmax.f32 %v1022_v22, 0.0 }
 0x197   : > { %3133 = vpow2.f32 %v1094_v12  ;;  %v1057_v7 = vsub.f32 0.0, %v1040_v23  ;;  %v3650_v29 = vmax.f32 %v1017_v24, 0.0  ;;  %v3652_v30 = vmax.f32 %v1025_v25, 0.0 }
 0x198   : > { %v1066_v28 = vmul.f32 %v3623_v62, %v1049_v55  ;;  %v1047_v1 = vsub.f32 0.0, %v1030_v26  ;;  %v1055_v31 = vsub.f32 0.0, %v1038_v27  ;;  %v3660_v54 = vadd.f32 %v3605_v48, %v3596_v38 }
 0x199   : > { %v3663_v6 = vmul.f32 2.0, %v831_v63  ;;  %v3669_v34 = vadd.f32 %v3605_v48, %v3598_v46  ;;  %v1074_v36 = vmul.f32 %v3623_v62, %v1057_v7  ;;  %v1050_v39 = vsub.f32 0.0, %v3650_v29 }
 0x19a   : > { %v3654_v53 = vpop.eup %3119  ;;  %v1088_v38 = vmul.f32 1.442695, %v1066_v28  ;;  %v1058_v40 = vsub.f32 0.0, %v3652_v30  ;;  %v3679_v41 = vmul.f32 2.0, %v863_v0  ;;  %v1064_v48 = vmul.f32 %v3623_v62, %v1047_v1 }
 0x19b   : > { %v3656_v32 = vpop.eup %3121  ;;  %3135 = vrsqrt.f32 %v3654_v53  ;;  %v1110_v35 = vmul.f32 %v3654_v53, %v3654_v53  ;;  %v1072_v43 = vmul.f32 %v3623_v62, %v1055_v31  ;;  %vm1156_vm0 = vcmp.eq.f32.partialorder %v3654_v53, inf }
 0x19c   : > { %v3665_v33 = vpop.eup %3123  ;;  %3137 = vrsqrt.f32 %v3656_v32  ;;  %v1118_v46 = vmul.f32 %v3656_v32, %v3656_v32  ;;  %v1015_v47 = vsub.f32 %v3660_v54, %v3663_v6  ;;  %vm1158_vm1 = vcmp.eq.f32.partialorder %v3654_v53, 0.0 }
 0x19d   : > { %v3675_v37 = vpop.eup %3125  ;;  %3139 = vrsqrt.f32 %v3665_v33  ;;  %v1108_v45 = vmul.f32 %v3665_v33, %v3665_v33  ;;  %v1126_v50 = vadd.f32 %v3654_v53, %v1110_v35  ;;  %v1159_v51 = vand.u32 2147483648, %v3654_v53 }
 0x19e   : > { %v3681_v42 = vpop.eup %3127  ;;  %3141 = vrsqrt.f32 %v3675_v37  ;;  %vm1212_vm2 = vcmp.eq.f32.partialorder %v3656_v32, inf  ;;  %v1116_v52 = vmul.f32 %v3675_v37, %v3675_v37  ;;  %vm1214_vm3 = vcmp.eq.f32.partialorder %v3656_v32, 0.0 }
 0x19f   : > { %v3688_v44 = vpop.eup %3129  ;;  %v1215_v56 = vand.u32 2147483648, %v3656_v32  ;;  %v1111_v57 = vmul.f32 %v3681_v42, %v3681_v42  ;;  %3143 = vrsqrt.f32 %v3681_v42  ;;  %v1134_v59 = vadd.f32 %v3656_v32, %v1118_v46 }
 0x1a0   : > { %v3696_v49 = vpop.eup %3131  ;;  %vm1142_vm4 = vcmp.eq.f32.partialorder %v3665_v33, inf  ;;  %v1119_v60 = vmul.f32 %v3688_v44, %v3688_v44  ;;  %3145 = vrsqrt.f32 %v3688_v44  ;;  %v1124_v61 = vadd.f32 %v3665_v33, %v1108_v45 }
 0x1a1   : > { %v3709_v58 = vpop.eup %3133  ;;  %vm1144_vm5 = vcmp.eq.f32.partialorder %v3665_v33, 0.0  ;;  %v1145_v63 = vand.u32 2147483648, %v3665_v33  ;;  %vm1198_vm6 = vcmp.eq.f32.partialorder %v3675_v37, inf  ;;  %v1109_v0 = vmul.f32 %v3696_v49, %v3696_v49 }
 0x1a2   : > { %v1132_v2 = vadd.f32 %v3675_v37, %v1116_v52  ;;  %vm1200_vm7 = vcmp.eq.f32.partialorder %v3675_v37, 0.0  ;;  %v1201_v3 = vand.u32 2147483648, %v3675_v37  ;;  %3147 = vrsqrt.f32 %v3696_v49 }
 0x1a3   : > { %v1127_v5 = vadd.f32 %v3681_v42, %v1111_v57  ;;  %vm1163_vm8 = vcmp.eq.f32.partialorder %v3681_v42, inf  ;;  %v1166_v8 = vand.u32 2147483648, %v3681_v42  ;;  %v1222_v9 = vand.u32 2147483648, %v3688_v44 }
 0x1a4   : > { %3149 = vrsqrt.f32 %v3709_v58  ;;  %vm1165_vm9 = vcmp.eq.f32.partialorder %v3681_v42, 0.0  ;;  %v1135_v12 = vadd.f32 %v3688_v44, %v1119_v60  ;;  %vm1219_vm10 = vcmp.eq.f32.partialorder %v3688_v44, inf }
 0x1a5   : > { %v3136_v4 = vpop.eup %3135  ;;  %v1125_v13 = vadd.f32 %v3696_v49, %v1109_v0  ;;  %v1152_v14 = vand.u32 2147483648, %v3696_v49  ;;  %vm1221_vm11 = vcmp.eq.f32.partialorder %v3688_v44, 0.0  ;;  %v1117_v16 = vmul.f32 %v3709_v58, %v3709_v58 }
 0x1a6   : > { %v3138_v10 = vpop.eup %3137  ;;  %v1155_v11 = vmul.f32 %v3136_v4, %v3654_v53  ;;  %3151 = vpow2.f32 %v1088_v38  ;;  %v1104_v17 = vmul.f32 1.442695, %v1074_v36  ;;  %vm1149_vm12 = vcmp.eq.f32.partialorder %v3696_v49, inf }
 0x1a7   : > { %v1211_v15 = vmul.f32 %v3138_v10, %v3656_v32  ;;  %v3140_v18 = vpop.eup %3139  ;;  %v1084_v20 = vmul.f32 1.442695, %v1064_v48  ;;  %v1100_v21 = vmul.f32 1.442695, %v1072_v43  ;;  %v1067_v22 = vmul.f32 %v3623_v62, %v1050_v39 }
 0x1a8   : > { %v1157_v19 = vsel %vm1156_vm0, %v3654_v53, %v1155_v11  ;;  %v3142_v23 = vpop.eup %3141  ;;  %v1141_v55 = vmul.f32 %v3140_v18, %v3665_v33  ;;  %vm1151_vm13 = vcmp.eq.f32.partialorder %v3696_v49, 0.0  ;;  %vm1205_vm14 = vcmp.eq.f32.partialorder %v3709_v58, inf }
 0x1a9   : > { %v1160_v24 = vsel %vm1158_vm1, %v1159_v51, %v1157_v19  ;;  %v1213_v25 = vsel %vm1212_vm2, %v3656_v32, %v1211_v15  ;;  %3153 = vpow2.f32 %v1104_v17  ;;  %v1197_v7 = vmul.f32 %v3142_v23, %v3675_v37  ;;  %v3144_v28 = vpop.eup %3143 }
 0x1aa   : > { %v3754_v26 = vadd.f32 %v1160_v24, %v1126_v50  ;;  %v1216_v27 = vsel %vm1214_vm3, %v1215_v56, %v1213_v25  ;;  %3155 = vpow2.f32 %v1084_v20  ;;  %v1143_v53 = vsel %vm1142_vm4, %v3665_v33, %v1141_v55  ;;  %v3146_v31 = vpop.eup %3145 }
 0x1ab   : > { %v3759_v29 = vadd.f32 %v1216_v27, %v1134_v59  ;;  %3157 = vpow2.f32 %v1100_v21  ;;  %v1090_v1 = vmul.f32 1.442695, %v1067_v22  ;;  %v1146_v35 = vsel %vm1144_vm5, %v1145_v63, %v1143_v53 }
 0x1ac   : > { %v1199_v32 = vsel %vm1198_vm6, %v3675_v37, %v1197_v7  ;;  %v1162_v36 = vmul.f32 %v3144_v28, %v3681_v42  ;;  %v1075_v38 = vmul.f32 %v3623_v62, %v1058_v40  ;;  %v3773_v39 = vadd.f32 %v1146_v35, %v1124_v61  ;;  %v3148_v33 = vpop.eup %3147 }
 0x1ad   : > { %v1202_v46 = vsel %vm1200_vm7, %v1201_v3, %v1199_v32  ;;  %v1218_v48 = vmul.f32 %v3146_v31, %v3688_v44  ;;  %3159 = vpow2.f32 %v1090_v1  ;;  %vm1207_vm15 = vcmp.eq.f32.partialorder %v3709_v58, 0.0 }
 0x1ae   : > { %v3778_v43 = vadd.f32 %v1202_v46, %v1132_v2  ;;  %v1164_v45 = vsel %vm1163_vm8, %v3681_v42, %v1162_v36  ;;  %v1106_v30 = vmul.f32 1.442695, %v1075_v38  ;;  %v3150_v50 = vpop.eup %3149  ;;  %v1148_v51 = vmul.f32 %v3148_v33, %v3696_v49 }
 0x1af   : > { %v1167_v40 = vsel %vm1165_vm9, %v1166_v8, %v1164_v45  ;;  %v1220_v37 = vsel %vm1219_vm10, %v3688_v44, %v1218_v48  ;;  %v1208_v52 = vand.u32 2147483648, %v3709_v58  ;;  %v1204_v59 = vmul.f32 %v3150_v50, %v3709_v58 }
 0x1b0   : > { %v3791_v56 = vadd.f32 %v1167_v40, %v1127_v5  ;;  %v1223_v57 = vsel %vm1221_vm11, %v1222_v9, %v1220_v37  ;;  %3161 = vpow2.f32 %v1106_v30  ;;  %v3152_v60 = vpop.eup %3151  ;;  %v1150_v42 = vsel %vm1149_vm12, %v3696_v49, %v1148_v51 }
 0x1b1   : > { %v3796_v61 = vadd.f32 %v1223_v57, %v1135_v12  ;;  %v1133_v63 = vadd.f32 %v3709_v58, %v1117_v16  ;;  %v1031_v0 = vmax.f32 %v1015_v47, 0.0  ;;  %v1153_v44 = vsel %vm1151_vm13, %v1152_v14, %v1150_v42 }
 0x1b2   : > { %v1206_v2 = vsel %vm1205_vm14, %v3709_v58, %v1204_v59  ;;  %3163 = vrsqrt.f32 %v3152_v60  ;;  %v1023_v3 = vsub.f32 %v3669_v34, %v3679_v41  ;;  %v3812_v5 = vadd.f32 %v1153_v44, %v1125_v13 }
 0x1b3   : > { %v3154_v4 = vpop.eup %3153  ;;  %v1209_v8 = vsel %vm1207_vm15, %v1208_v52, %v1206_v2  ;;  %v1048_v47 = vsub.f32 0.0, %v1031_v0  ;;  %v1114_v11 = vmul.f32 %v3152_v60, %v3152_v60  ;;  %vm1184_vm0 = vcmp.eq.f32.partialorder %v3152_v60, inf }
 0x1b4   : > { %v3156_v9 = vpop.eup %3155  ;;  %v3816_v54 = vadd.f32 %v1209_v8, %v1133_v63  ;;  %3165 = vrsqrt.f32 %v3154_v4  ;;  %v1039_v49 = vmax.f32 %v1023_v3, 0.0  ;;  %v1122_v34 = vmul.f32 %v3154_v4, %v3154_v4 }
 0x1b5   : > { %v3818_v6 = vpop.eup %3157  ;;  %3167 = vrsqrt.f32 %v3156_v9  ;;  %v1065_v58 = vmul.f32 %v3623_v62, %v1048_v47  ;;  %v1130_v13 = vadd.f32 %v3152_v60, %v1114_v11  ;;  %vm1186_vm1 = vcmp.eq.f32.partialorder %v3152_v60, 0.0 }
 0x1b6   : > { %3169 = vrsqrt.f32 %v3818_v6  ;;  %v1056_v12 = vsub.f32 0.0, %v1039_v49  ;;  %v1112_v14 = vmul.f32 %v3156_v9, %v3156_v9  ;;  %v1187_v16 = vand.u32 2147483648, %v3152_v60 }
 0x1b7   : > { %v3820_v10 = vpop.eup %3159  ;;  %vm1240_vm2 = vcmp.eq.f32.partialorder %v3154_v4, inf  ;;  %v1086_v17 = vmul.f32 1.442695, %v1065_v58  ;;  %v1138_v20 = vadd.f32 %v3154_v4, %v1122_v34  ;;  %vm1242_vm3 = vcmp.eq.f32.partialorder %v3154_v4, 0.0 }
 0x1b8   : > { %3171 = vrsqrt.f32 %v3820_v10  ;;  %v1073_v18 = vmul.f32 %v3623_v62, %v1056_v12  ;;  %v1243_v21 = vand.u32 2147483648, %v3154_v4  ;;  %vm1170_vm4 = vcmp.eq.f32.partialorder %v3156_v9, inf }
 0x1b9   : > { %v1120_v22 = vmul.f32 %v3818_v6, %v3818_v6  ;;  %v1128_v55 = vadd.f32 %v3156_v9, %v1112_v14  ;;  %vm1172_vm5 = vcmp.eq.f32.partialorder %v3156_v9, 0.0  ;;  %v1173_v27 = vand.u32 2147483648, %v3156_v9 }
 0x1ba   : > { %v3824_v41 = vpop.eup %3161  ;;  %v1102_v23 = vmul.f32 1.442695, %v1073_v18  ;;  %vm1226_vm6 = vcmp.eq.f32.partialorder %v3818_v6, inf  ;;  %vm1228_vm7 = vcmp.eq.f32.partialorder %v3818_v6, 0.0  ;;  %v1229_v35 = vand.u32 2147483648, %v3818_v6 }
 0x1bb   : > { %3173 = vrsqrt.f32 %v3824_v41  ;;  %v1136_v36 = vadd.f32 %v3818_v6, %v1120_v22  ;;  %v1115_v46 = vmul.f32 %v3820_v10, %v3820_v10  ;;  %vm1191_vm8 = vcmp.eq.f32.partialorder %v3820_v10, inf }
 0x1bc   : > { %v3164_v15 = vpop.eup %3163  ;;  %3175 = vpow2.f32 %v1086_v17  ;;  %v1123_v30 = vmul.f32 %v3824_v41, %v3824_v41  ;;  %vm1193_vm9 = vcmp.eq.f32.partialorder %v3820_v10, 0.0  ;;  %vm1247_vm10 = vcmp.eq.f32.partialorder %v3824_v41, inf }
 0x1bd   : > { %v1183_v19 = vmul.f32 %v3164_v15, %v3152_v60  ;;  %3177 = vpow2.f32 %v1102_v23  ;;  %v1131_v63 = vadd.f32 %v3820_v10, %v1115_v46  ;;  %v1250_v3 = vand.u32 2147483648, %v3824_v41 }
 0x1be   : > { %v3166_v24 = vpop.eup %3165  ;;  %vm1249_vm11 = vcmp.eq.f32.partialorder %v3824_v41, 0.0 }
 0x1bf   : > { %v1185_v25 = vsel %vm1184_vm0, %v3152_v60, %v1183_v19  ;;  %v3168_v7 = vpop.eup %3167  ;;  %v1239_v62 = vmul.f32 %v3166_v24, %v3154_v4  ;;  %v1194_v60 = vand.u32 2147483648, %v3820_v10 }
 0x1c0   : > { %v1188_v28 = vsel %vm1186_vm1, %v1187_v16, %v1185_v25  ;;  %v3170_v53 = vpop.eup %3169  ;;  %v1169_v31 = vmul.f32 %v3168_v7, %v3156_v9 }
 0x1c1   : > { %v3834_v1 = vadd.f32 %v1188_v28, %v1130_v13  ;;  %v1241_v32 = vsel %vm1240_vm2, %v3154_v4, %v1239_v62  ;;  %v1225_v38 = vmul.f32 %v3170_v53, %v3818_v6 }
 0x1c2   : > { %v3172_v48 = vpop.eup %3171  ;;  %v1244_v33 = vsel %vm1242_vm3, %v1243_v21, %v1241_v32  ;;  %v1171_v45 = vsel %vm1170_vm4, %v3156_v9, %v1169_v31  ;;  %v1139_v9 = vadd.f32 %v3824_v41, %v1123_v30 }
 0x1c3   : > { %v3848_v50 = vadd.f32 %v1244_v33, %v1138_v20  ;;  %v1174_v40 = vsel %vm1172_vm5, %v1173_v27, %v1171_v45  ;;  %v1227_v37 = vsel %vm1226_vm6, %v3818_v6, %v1225_v38  ;;  %v1190_v51 = vmul.f32 %v3172_v48, %v3820_v10 }
 0x1c4   : > { %v3855_v57 = vadd.f32 %v1174_v40, %v1128_v55  ;;  %v1230_v59 = vsel %vm1228_vm7, %v1229_v35, %v1227_v37 }
 0x1c5   : > { %v3174_v52 = vpop.eup %3173  ;;  %v3861_v42 = vadd.f32 %v1230_v59, %v1136_v36  ;;  %v1192_v0 = vsel %vm1191_vm8, %v3820_v10, %v1190_v51 }
 0x1c6   : > { %v1246_v44 = vmul.f32 %v3174_v52, %v3824_v41  ;;  %v1195_v2 = vsel %vm1193_vm9, %v1194_v60, %v1192_v0  ;;  %v3176_v4 = vpop.eup %3175 }
 0x1c7   : > { %v3868_v8 = vadd.f32 %v1195_v2, %v1131_v63  ;;  %3179 = vrsqrt.f32 %v3176_v4  ;;  %v3178_v49 = vpop.eup %3177  ;;  %v1113_v11 = vmul.f32 %v3176_v4, %v3176_v4  ;;  %vm1177_vm12 = vcmp.eq.f32.partialorder %v3176_v4, inf }
 0x1c8   : > { %v1248_v6 = vsel %vm1247_vm10, %v3824_v41, %v1246_v44  ;;  %3181 = vrsqrt.f32 %v3178_v49  ;;  %v1121_v12 = vmul.f32 %v3178_v49, %v3178_v49  ;;  %v1180_v14 = vand.u32 2147483648, %v3176_v4 }
 0x1c9   : > { %v1251_v47 = vsel %vm1249_vm11, %v1250_v3, %v1248_v6  ;;  %v1129_v15 = vadd.f32 %v3176_v4, %v1113_v11  ;;  %vm1179_vm13 = vcmp.eq.f32.partialorder %v3176_v4, 0.0  ;;  %vm1233_vm14 = vcmp.eq.f32.partialorder %v3178_v49, inf }
 0x1ca   : > { %v3873_v10 = vadd.f32 %v1251_v47, %v1139_v9  ;;  %v1236_v41 = vand.u32 2147483648, %v3178_v49  ;;  %v1137_v20 = vadd.f32 %v3178_v49, %v1121_v12  ;;  %vm1235_vm15 = vcmp.eq.f32.partialorder %v3178_v49, 0.0 }
 0x1d1   : > { %v3180_v34 = vpop.eup %3179  ;;  %1271 = sbr.rel (%p2928_p11) target bundleno = 1644 (0x66c), region = 64 }
 0x1d2   : > { %v1176_v58 = vmul.f32 %v3180_v34, %v3176_v4  ;;  %v3182_v13 = vpop.eup %3181 }
 0x1d3   : > { %v1232_v17 = vmul.f32 %v3182_v13, %v3178_v49 }
 0x1d4   : > { %v1178_v16 = vsel %vm1177_vm12, %v3176_v4, %v1176_v58 }
 0x1d5   : > { %v1181_v18 = vsel %vm1179_vm13, %v1180_v14, %v1178_v16  ;;  %v1234_v21 = vsel %vm1233_vm14, %v3178_v49, %v1232_v17 }
 0x1d6   : > { %v3875_v19 = vadd.f32 %v1181_v18, %v1129_v15  ;;  %v1237_v22 = vsel %vm1235_vm15, %v1236_v41, %v1234_v21 }
 0x1d7   : > { %v3877_v23 = vadd.f32 %v1237_v22, %v1137_v20 }
 0x1d8   : > { %1277 = sbr.rel (%p1274_p0) target bundleno = 849 (0x351), region = 68  ;;  %v1280_v24 = vld [vmem:[%s3543_s17 + $0x10] sm:$0xff] (!%p1274_p0)  ;;  %v1278_v25 = vld [vmem:[%s3543_s17] sm:$0xff] (!%p1274_p0)  ;;  %v1281_v55 = vld [vmem:[%s3543_s17 + $0x18] sm:$0xff] (!%p1274_p0)  ;;  %v3334_v27 = vmov (!%p1274_p0), 0  }
 0x1d9   : > { %3184 = vset.pattern.permute.xlu1 (!%p1274_p0), %v3334_v27  ;;  %3183 = vset.pattern.permute.xlu0 (!%p1274_p0), %v3334_v27  ;;  %v1296_v7 = vmul.f32 (!%p1274_p0), 0.035714287, %v1280_v24  ;;  %v1294_v28 = vmul.f32 (!%p1274_p0), 0.035714287, %v1278_v25  ;;  %v1279_v62 = vld [vmem:[%s3543_s17 + $0x8] sm:$0xff] (!%p1274_p0)  ;;  %v1282_v32 = vld [vmem:[%s3543_s17 + $0x20] sm:$0xff] (!%p1274_p0) }
 0x1da   : > { %v1297_v53 = vmul.f32 (!%p1274_p0), 0.035714287, %v1281_v55  ;;  %v1295_v31 = vmul.f32 (!%p1274_p0), 0.035714287, %v1279_v62  ;;  %v1283_v35 = vld [vmem:[%s3543_s17 + $0x28] sm:$0xff] (!%p1274_p0)  ;;  %v1285_v46 = vld [vmem:[%s3543_s17 + $0x38] sm:$0xff] (!%p1274_p0) }
 0x1db   : > { %1323 = vperm.xlu1 (!%p1274_p0), %3184, %v1296_v7   ;;  %1313 = vperm.xlu0 (!%p1274_p0), %3183, %v1294_v28   ;;  %v1299_v36 = vmul.f32 (!%p1274_p0), 0.035714287, %v1283_v35  ;;  %v1298_v38 = vmul.f32 (!%p1274_p0), 0.035714287, %v1282_v32  ;;  %v1284_v48 = vld [vmem:[%s3543_s17 + $0x30] sm:$0xff] (!%p1274_p0)  ;;  %v1287_v30 = vld [vmem:[%s3543_s17 + $0x48] sm:$0xff] (!%p1274_p0) }
 0x1dc   : > { %v1301_v33 = vmul.f32 (!%p1274_p0), 0.035714287, %v1285_v46  ;;  %v1300_v45 = vmul.f32 (!%p1274_p0), 0.035714287, %v1284_v48  ;;  %v1286_v40 = vld [vmem:[%s3543_s17 + $0x40] sm:$0xff] (!%p1274_p0)  ;;  %v1289_v52 = vld [vmem:[%s3543_s17 + $0x58] sm:$0xff] (!%p1274_p0) }
 0x1dd   : > { %v1303_v37 = vmul.f32 (!%p1274_p0), 0.035714287, %v1287_v30  ;;  %v1302_v51 = vmul.f32 (!%p1274_p0), 0.035714287, %v1286_v40  ;;  %v1288_v59 = vld [vmem:[%s3543_s17 + $0x50] sm:$0xff] (!%p1274_p0)  ;;  %v1291_v0 = vld [vmem:[%s3543_s17 + $0x68] sm:$0xff] (!%p1274_p0) }
 0x1de   : > { %v1305_v60 = vmul.f32 (!%p1274_p0), 0.035714287, %v1289_v52  ;;  %v1304_v63 = vmul.f32 (!%p1274_p0), 0.035714287, %v1288_v59  ;;  %v1290_v44 = vld [vmem:[%s3543_s17 + $0x60] sm:$0xff] (!%p1274_p0)  ;;  %v1293_v4 = vld [vmem:[%s3543_s17 + $0x78] sm:$0xff] (!%p1274_p0) }
 0x1df   : > { %1328 = vperm.xlu1 %3184, %v1297_v53   ;;  %1318 = vperm.xlu0 %3183, %v1295_v31   ;;  %v1307_v2 = vmul.f32 0.035714287, %v1291_v0  ;;  %v1306_v3 = vmul.f32 0.035714287, %v1290_v44  ;;  %v1292_v9 = vld [vmem:[%s3543_s17 + $0x70] sm:$0xff] }
 0x1e0   : > { %v1309_v6 = vmul.f32 0.035714287, %v1293_v4  ;;  %v1308_v47 = vmul.f32 0.035714287, %v1292_v9  ;;  %v2929_v49 = vld [vmem:[%s3548_s25] ss:$0 sm:$0xff] }
 0x1e3   : > { %1338 = vperm.xlu1 %3184, %v1299_v36   ;;  %1333 = vperm.xlu0 %3183, %v1298_v38  }
 0x1e7   : > { %1348 = vperm.xlu1 %3184, %v1301_v33   ;;  %1343 = vperm.xlu0 %3183, %v1300_v45  }
 0x1eb   : > { %1358 = vperm.xlu1 %3184, %v1303_v37   ;;  %1353 = vperm.xlu0 %3183, %v1302_v51  }
 0x1ef   : > { %1368 = vperm.xlu1 %3184, %v1305_v60   ;;  %1363 = vperm.xlu0 %3183, %v1304_v63  }
 0x1f3   : > { %1378 = vperm.xlu1 %3184, %v1307_v2   ;;  %1373 = vperm.xlu0 %3183, %v1306_v3  }
 0x1f7   : > { %1388 = vperm.xlu1 %3184, %v1309_v6   ;;  %1383 = vperm.xlu0 %3183, %v1308_v47  }
 0x25a   : > { %v1324_v11 = vpop.permute.xlu1 %1323  ;;  %v1314_v34 = vpop.permute.xlu0 %1313 }
 0x25b   : > { %v1397_v58 = vmul.f32 %v2929_v49, %v1314_v34  ;;  %v1399_v14 = vmul.f32 %v2929_v49, %v1324_v11 }
 0x25d   : > { %v1414_v16 = vmul.f32 %v1397_v58, %v3773_v39  ;;  %v1416_v21 = vmul.f32 %v1399_v14, %v3754_v26 }
 0x25e   : > { %v1329_v12 = vpop.permute.xlu1 %1328  ;;  %v1319_v13 = vpop.permute.xlu0 %1318 }
 0x25f   : > { %v1398_v15 = vmul.f32 %v2929_v49, %v1319_v13  ;;  %v1400_v17 = vmul.f32 %v2929_v49, %v1329_v12 }
 0x261   : > { %v1415_v18 = vmul.f32 %v1398_v15, %v3812_v5  ;;  %v1417_v25 = vmul.f32 %v1400_v17, %v3791_v56 }
 0x262   : > { %v1339_v41 = vpop.permute.xlu1 %1338  ;;  %v1334_v20 = vpop.permute.xlu0 %1333 }
 0x263   : > { %v1430_v22 = vadd.f32 %v1415_v18, %v1414_v16  ;;  %v1401_v24 = vmul.f32 %v2929_v49, %v1334_v20  ;;  %v1402_v27 = vmul.f32 %v2929_v49, %v1339_v41 }
 0x265   : > { %v1431_v55 = vadd.f32 %v1430_v22, %v1416_v21  ;;  %v1418_v53 = vmul.f32 %v1401_v24, %v3855_v57  ;;  %v1419_v35 = vmul.f32 %v1402_v27, %v3875_v19 }
 0x266   : > { %v1349_v7 = vpop.permute.xlu1 %1348  ;;  %v1344_v28 = vpop.permute.xlu0 %1343 }
 0x267   : > { %v1432_v62 = vadd.f32 %v1431_v55, %v1417_v25  ;;  %v1403_v31 = vmul.f32 %v2929_v49, %v1344_v28  ;;  %v1404_v36 = vmul.f32 %v2929_v49, %v1349_v7 }
 0x269   : > { %v1433_v32 = vadd.f32 %v1432_v62, %v1418_v53  ;;  %v1420_v33 = vmul.f32 %v1403_v31, %v3834_v1  ;;  %v1421_v30 = vmul.f32 %v1404_v36, %v3868_v8 }
 0x26a   : > { %v1359_v38 = vpop.permute.xlu1 %1358  ;;  %v1354_v46 = vpop.permute.xlu0 %1353 }
 0x26b   : > { %v1434_v48 = vadd.f32 %v1433_v32, %v1419_v35  ;;  %v1405_v45 = vmul.f32 %v2929_v49, %v1354_v46  ;;  %v1406_v37 = vmul.f32 %v2929_v49, %v1359_v38  ;;  %v1413_v35 = vld [vmem:[#allocation2] sm:$0xff] }
 0x26d   : > { %v1435_v40 = vadd.f32 %v1434_v48, %v1420_v33  ;;  %v1422_v60 = vmul.f32 %v1405_v45, %v3778_v43  ;;  %v1423_v0 = vmul.f32 %v1406_v37, %v3816_v54 }
 0x26e   : > { %v1369_v51 = vpop.permute.xlu1 %1368  ;;  %v1364_v52 = vpop.permute.xlu0 %1363 }
 0x26f   : > { %v1436_v59 = vadd.f32 %v1435_v40, %v1421_v30  ;;  %v1407_v63 = vmul.f32 %v2929_v49, %v1364_v52  ;;  %v1408_v2 = vmul.f32 %v2929_v49, %v1369_v51 }
 0x271   : > { %v1437_v44 = vadd.f32 %v1436_v59, %v1422_v60  ;;  %v1424_v6 = vmul.f32 %v1407_v63, %v3759_v29  ;;  %v1425_v11 = vmul.f32 %v1408_v2, %v3796_v61 }
 0x272   : > { %v1379_v3 = vpop.permute.xlu1 %1378  ;;  %v1374_v4 = vpop.permute.xlu0 %1373 }
 0x273   : > { %v1438_v9 = vadd.f32 %v1437_v44, %v1423_v0  ;;  %v1409_v47 = vmul.f32 %v2929_v49, %v1374_v4  ;;  %v1410_v58 = vmul.f32 %v2929_v49, %v1379_v3 }
 0x275   : > { %v1439_v34 = vadd.f32 %v1438_v9, %v1424_v6  ;;  %v1426_v15 = vmul.f32 %v1409_v47, %v3861_v42  ;;  %v1427_v17 = vmul.f32 %v1410_v58, %v3877_v23 }
 0x276   : > { %v1389_v12 = vpop.permute.xlu1 %1388  ;;  %v1384_v13 = vpop.permute.xlu0 %1383 }
 0x277   : > { %v1440_v14 = vadd.f32 %v1439_v34, %v1425_v11  ;;  %v1411_v16 = vmul.f32 %v2929_v49, %v1384_v13  ;;  %v1412_v41 = vmul.f32 %v2929_v49, %v1389_v12 }
 0x279   : > { %v1441_v18 = vadd.f32 %v1440_v14, %v1426_v15  ;;  %v1428_v21 = vmul.f32 %v1411_v16, %v3848_v50  ;;  %v1429_v22 = vmul.f32 %v1412_v41, %v3873_v10 }
 0x27b   : > { %v1442_v20 = vadd.f32 %v1441_v18, %v1427_v17 }
 0x27d   : > { %v1443_v24 = vadd.f32 %v1442_v20, %v1428_v21 }
 0x27f   : > { %v1444_v25 = vadd.f32 %v1443_v24, %v1429_v22 }
 0x281   : > { %1445 = vadd.xlane.f32.xlu0 %v1444_v25 }
 0x30e   : > { %v1446_v55 = vpop.xlane.xlu0 %1445 }
 0x30f   : > { %v1447_v27 = vrot.slane %v1446_v55, 4 }
 0x311   : > { %v1448_v7 = vadd.f32 %v1447_v27, %v1446_v55 }
 0x313   : > { %v1449_v28 = vrot.slane %v1448_v7, 2 }
 0x315   : > { %v1450_v62 = vadd.f32 %v1449_v28, %v1448_v7 }
 0x317   : > { %v1451_v53 = vrot.slane %v1450_v62, 1 }
 0x319   : > { %v1452_v31 = vadd.f32 %v1451_v53, %v1450_v62 }
 0x31b   : > { %3007 = vpush %v1452_v31 }
 0x34c   : > { %s3008_s2 = spop %3007 }
 0x34d   : > { %v1454_v32 = vstv %s3008_s2 }
 0x34e   : > { %v1455_v49 = vadd.f32 %v1454_v32, %v1413_v35 }
 0x350   : > { %1456 = vst [vmem:[#allocation2] sm:$0xff] %v1455_v49 }
 0x351 PF: > { %s4391_s18 = sld [smem:[#allocation24_spill]]  ;;  %p1458_p2 = scmp.ge.s32.totalorder %s3511_s26, 1 }
 0x357   : > { %p1457_p1 = scmp.ge.s32.totalorder %s4391_s18, 1 }
 0x359   : > { %p1459_p3 = pnand %p1458_p2, %p1457_p1 }
 0x35a   : > { %v1465_v36 = vld [vmem:[%s3554_s30 + $0x10] sm:$0xff] (!%p1459_p3)  ;;  %v1463_v38 = vld [vmem:[%s3554_s30] sm:$0xff] (!%p1459_p3)  ;;  %v1466_v46 = vld [vmem:[%s3554_s30 + $0x18] sm:$0xff] (!%p1459_p3)  ;;  %v3335_v48 = vmov (!%p1459_p3), 0  }
 0x35b   : > { %1462 = sbr.rel (%p1459_p3) target bundleno = 1235 (0x4d3), region = 72  ;;  %3186 = vset.pattern.permute.xlu1 (!%p1459_p3), %v3335_v48  ;;  %3185 = vset.pattern.permute.xlu0 (!%p1459_p3), %v3335_v48  ;;  %v1481_v33 = vmul.f32 (!%p1459_p3), 0.035714287, %v1465_v36  ;;  %v1479_v45 = vmul.f32 (!%p1459_p3), 0.035714287, %v1463_v38  ;;  %v1464_v30 = vld [vmem:[%s3554_s30 + $0x8] sm:$0xff] (!%p1459_p3) }
 0x35c   : > { %v1482_v40 = vmul.f32 (!%p1459_p3), 0.035714287, %v1466_v46  ;;  %v1480_v37 = vmul.f32 (!%p1459_p3), 0.035714287, %v1464_v30  ;;  %v1468_v51 = vld [vmem:[%s3554_s30 + $0x28] sm:$0xff] (!%p1459_p3)  ;;  %v1467_v52 = vld [vmem:[%s3554_s30 + $0x20] sm:$0xff] (!%p1459_p3) }
 0x35d   : > { %1508 = vperm.xlu1 (!%p1459_p3), %3186, %v1481_v33   ;;  %1498 = vperm.xlu0 (!%p1459_p3), %3185, %v1479_v45   ;;  %v1484_v59 = vmul.f32 (!%p1459_p3), 0.035714287, %v1468_v51  ;;  %v1483_v60 = vmul.f32 (!%p1459_p3), 0.035714287, %v1467_v52  ;;  %v1470_v63 = vld [vmem:[%s3554_s30 + $0x38] sm:$0xff] (!%p1459_p3)  ;;  %v1469_v0 = vld [vmem:[%s3554_s30 + $0x30] sm:$0xff] (!%p1459_p3) }
 0x35e   : > { %v1486_v44 = vmul.f32 (!%p1459_p3), 0.035714287, %v1470_v63  ;;  %v1485_v2 = vmul.f32 (!%p1459_p3), 0.035714287, %v1469_v0  ;;  %v1472_v3 = vld [vmem:[%s3554_s30 + $0x48] sm:$0xff] (!%p1459_p3)  ;;  %v1471_v4 = vld [vmem:[%s3554_s30 + $0x40] sm:$0xff] (!%p1459_p3) }
 0x35f   : > { %v1488_v9 = vmul.f32 (!%p1459_p3), 0.035714287, %v1472_v3  ;;  %v1487_v6 = vmul.f32 (!%p1459_p3), 0.035714287, %v1471_v4  ;;  %v1474_v47 = vld [vmem:[%s3554_s30 + $0x58] sm:$0xff] (!%p1459_p3)  ;;  %v1473_v11 = vld [vmem:[%s3554_s30 + $0x50] sm:$0xff] (!%p1459_p3) }
 0x360   : > { %v1490_v34 = vmul.f32 (!%p1459_p3), 0.035714287, %v1474_v47  ;;  %v1489_v58 = vmul.f32 (!%p1459_p3), 0.035714287, %v1473_v11  ;;  %v1476_v12 = vld [vmem:[%s3554_s30 + $0x68] sm:$0xff] (!%p1459_p3)  ;;  %v1475_v13 = vld [vmem:[%s3554_s30 + $0x60] sm:$0xff] (!%p1459_p3) }
 0x361   : > { %1513 = vperm.xlu1 (!%p1459_p3), %3186, %v1482_v40   ;;  %1503 = vperm.xlu0 (!%p1459_p3), %3185, %v1480_v37   ;;  %v1492_v14 = vmul.f32 (!%p1459_p3), 0.035714287, %v1476_v12  ;;  %v1491_v15 = vmul.f32 (!%p1459_p3), 0.035714287, %v1475_v13  ;;  %v1478_v16 = vld [vmem:[%s3554_s30 + $0x78] sm:$0xff] (!%p1459_p3)  ;;  %v1477_v17 = vld [vmem:[%s3554_s30 + $0x70] sm:$0xff] (!%p1459_p3) }
 0x362   : > { %v1494_v18 = vmul.f32 0.035714287, %v1478_v16  ;;  %v1493_v41 = vmul.f32 0.035714287, %v1477_v17  ;;  %v2930_v20 = vld [vmem:[%s3559_s5] ss:$0 sm:$0xff] }
 0x365   : > { %1523 = vperm.xlu1 %3186, %v1484_v59   ;;  %1518 = vperm.xlu0 %3185, %v1483_v60  }
 0x369   : > { %1533 = vperm.xlu1 %3186, %v1486_v44   ;;  %1528 = vperm.xlu0 %3185, %v1485_v2  }
 0x36d   : > { %1543 = vperm.xlu1 %3186, %v1488_v9   ;;  %1538 = vperm.xlu0 %3185, %v1487_v6  }
 0x371   : > { %1553 = vperm.xlu1 %3186, %v1490_v34   ;;  %1548 = vperm.xlu0 %3185, %v1489_v58  }
 0x375   : > { %1563 = vperm.xlu1 %3186, %v1492_v14   ;;  %1558 = vperm.xlu0 %3185, %v1491_v15  }
 0x379   : > { %1573 = vperm.xlu1 %3186, %v1494_v18   ;;  %1568 = vperm.xlu0 %3185, %v1493_v41  }
 0x3dc   : > { %v1509_v21 = vpop.permute.xlu1 %1508  ;;  %v1499_v22 = vpop.permute.xlu0 %1498 }
 0x3dd   : > { %v1582_v24 = vmul.f32 %v2930_v20, %v1499_v22  ;;  %v1584_v27 = vmul.f32 %v2930_v20, %v1509_v21 }
 0x3df   : > { %v1599_v28 = vmul.f32 %v1582_v24, %v3773_v39  ;;  %v1601_v32 = vmul.f32 %v1584_v27, %v3754_v26 }
 0x3e0   : > { %v1514_v25 = vpop.permute.xlu1 %1513  ;;  %v1504_v55 = vpop.permute.xlu0 %1503 }
 0x3e1   : > { %v1583_v7 = vmul.f32 %v2930_v20, %v1504_v55  ;;  %v1585_v62 = vmul.f32 %v2930_v20, %v1514_v25 }
 0x3e3   : > { %v1600_v53 = vmul.f32 %v1583_v7, %v3812_v5  ;;  %v1602_v38 = vmul.f32 %v1585_v62, %v3791_v56 }
 0x3e4   : > { %v1524_v31 = vpop.permute.xlu1 %1523  ;;  %v1519_v35 = vpop.permute.xlu0 %1518 }
 0x3e5   : > { %v1615_v49 = vadd.f32 %v1600_v53, %v1599_v28  ;;  %v1586_v36 = vmul.f32 %v2930_v20, %v1519_v35  ;;  %v1587_v48 = vmul.f32 %v2930_v20, %v1524_v31 }
 0x3e7   : > { %v1616_v46 = vadd.f32 %v1615_v49, %v1601_v32  ;;  %v1603_v40 = vmul.f32 %v1586_v36, %v3855_v57  ;;  %v1604_v51 = vmul.f32 %v1587_v48, %v3875_v19 }
 0x3e8   : > { %v1534_v33 = vpop.permute.xlu1 %1533  ;;  %v1529_v45 = vpop.permute.xlu0 %1528 }
 0x3e9   : > { %v1617_v30 = vadd.f32 %v1616_v46, %v1602_v38  ;;  %v1588_v37 = vmul.f32 %v2930_v20, %v1529_v45  ;;  %v1589_v59 = vmul.f32 %v2930_v20, %v1534_v33 }
 0x3eb   : > { %v1618_v52 = vadd.f32 %v1617_v30, %v1603_v40  ;;  %v1605_v44 = vmul.f32 %v1588_v37, %v3834_v1  ;;  %v1606_v3 = vmul.f32 %v1589_v59, %v3868_v8 }
 0x3ec   : > { %v1544_v60 = vpop.permute.xlu1 %1543  ;;  %v1539_v63 = vpop.permute.xlu0 %1538 }
 0x3ed   : > { %v1619_v0 = vadd.f32 %v1618_v52, %v1604_v51  ;;  %v1590_v2 = vmul.f32 %v2930_v20, %v1539_v63  ;;  %v1591_v9 = vmul.f32 %v2930_v20, %v1544_v60  ;;  %v1598_v51 = vld [vmem:[#allocation2] sm:$0xff] }
 0x3ef   : > { %v1620_v4 = vadd.f32 %v1619_v0, %v1605_v44  ;;  %v1607_v34 = vmul.f32 %v1590_v2, %v3778_v43  ;;  %v1608_v12 = vmul.f32 %v1591_v9, %v3816_v54 }
 0x3f0   : > { %v1554_v6 = vpop.permute.xlu1 %1553  ;;  %v1549_v47 = vpop.permute.xlu0 %1548 }
 0x3f1   : > { %v1621_v11 = vadd.f32 %v1620_v4, %v1606_v3  ;;  %v1592_v58 = vmul.f32 %v2930_v20, %v1549_v47  ;;  %v1593_v14 = vmul.f32 %v2930_v20, %v1554_v6 }
 0x3f3   : > { %v1622_v13 = vadd.f32 %v1621_v11, %v1607_v34  ;;  %v1609_v18 = vmul.f32 %v1592_v58, %v3759_v29  ;;  %v1610_v21 = vmul.f32 %v1593_v14, %v3796_v61 }
 0x3f4   : > { %v1564_v15 = vpop.permute.xlu1 %1563  ;;  %v1559_v16 = vpop.permute.xlu0 %1558 }
 0x3f5   : > { %v1623_v17 = vadd.f32 %v1622_v13, %v1608_v12  ;;  %v1594_v41 = vmul.f32 %v2930_v20, %v1559_v16  ;;  %v1595_v24 = vmul.f32 %v2930_v20, %v1564_v15 }
 0x3f7   : > { %v1624_v22 = vadd.f32 %v1623_v17, %v1609_v18  ;;  %v1611_v7 = vmul.f32 %v1594_v41, %v3861_v42  ;;  %v1612_v62 = vmul.f32 %v1595_v24, %v3877_v23 }
 0x3f8   : > { %v1574_v25 = vpop.permute.xlu1 %1573  ;;  %v1569_v55 = vpop.permute.xlu0 %1568 }
 0x3f9   : > { %v1625_v27 = vadd.f32 %v1624_v22, %v1610_v21  ;;  %v1596_v28 = vmul.f32 %v2930_v20, %v1569_v55  ;;  %v1597_v31 = vmul.f32 %v2930_v20, %v1574_v25 }
 0x3fb   : > { %v1626_v53 = vadd.f32 %v1625_v27, %v1611_v7  ;;  %v1613_v32 = vmul.f32 %v1596_v28, %v3848_v50  ;;  %v1614_v49 = vmul.f32 %v1597_v31, %v3873_v10 }
 0x3fd   : > { %v1627_v35 = vadd.f32 %v1626_v53, %v1612_v62 }
 0x3ff   : > { %v1628_v36 = vadd.f32 %v1627_v35, %v1613_v32 }
 0x401   : > { %v1629_v38 = vadd.f32 %v1628_v36, %v1614_v49 }
 0x403   : > { %1630 = vadd.xlane.f32.xlu0 %v1629_v38 }
 0x490   : > { %v1631_v46 = vpop.xlane.xlu0 %1630 }
 0x491   : > { %v1632_v48 = vrot.slane %v1631_v46, 4 }
 0x493   : > { %v1633_v33 = vadd.f32 %v1632_v48, %v1631_v46 }
 0x495   : > { %v1634_v45 = vrot.slane %v1633_v33, 2 }
 0x497   : > { %v1635_v30 = vadd.f32 %v1634_v45, %v1633_v33 }
 0x499   : > { %v1636_v40 = vrot.slane %v1635_v30, 1 }
 0x49b   : > { %v1637_v37 = vadd.f32 %v1636_v40, %v1635_v30 }
 0x49d   : > { %3009 = vpush %v1637_v37 }
 0x4ce   : > { %s3010_s19 = spop %3009 }
 0x4cf   : > { %v1639_v52 = vstv %s3010_s19 }
 0x4d0   : > { %v1640_v20 = vadd.f32 %v1639_v52, %v1598_v51 }
 0x4d2   : > { %1641 = vst [vmem:[#allocation2] sm:$0xff] %v1640_v20 }
 0x4d3 PF: > { %p1642_p5 = pnand %p1458_p2, %p1272_p12 }
 0x4d4   : > { %v1765_v59 = vld [vmem:[%s3554_s30] sm:$0xff] (!%p1642_p5)  ;;  %v3336_v63 = vmov (!%p1642_p5), 0   ;;  %v1766_v0 = vld [vmem:[%s3554_s30 + $0x8] sm:$0xff] (!%p1642_p5)  ;;  %v1767_v2 = vld [vmem:[%s3554_s30 + $0x10] sm:$0xff] (!%p1642_p5) }
 0x4d5   : > { %1645 = sbr.rel (%p1642_p5) target bundleno = 1644 (0x66c), region = 76  ;;  %v1646_v60 = vld [vmem:[%s3543_s17] sm:$0xff] (!%p1642_p5)  ;;  %3188 = vset.pattern.permute.xlu1 (!%p1642_p5), %v3336_v63  ;;  %3187 = vset.pattern.permute.xlu0 (!%p1642_p5), %v3336_v63  ;;  %v1647_v44 = vld [vmem:[%s3543_s17 + $0x8] sm:$0xff] (!%p1642_p5)  ;;  %v1648_v3 = vld [vmem:[%s3543_s17 + $0x10] sm:$0xff] (!%p1642_p5) }
 0x4d6   : > { %1784 = vperm.xlu1 (!%p1642_p5), %3188, %v1765_v59   ;;  %1665 = vperm.xlu0 (!%p1642_p5), %3187, %v1646_v60   ;;  %v1768_v4 = vld [vmem:[%s3554_s30 + $0x18] sm:$0xff] (!%p1642_p5)  ;;  %v1769_v6 = vld [vmem:[%s3554_s30 + $0x20] sm:$0xff] (!%p1642_p5)  ;;  %v1770_v11 = vld [vmem:[%s3554_s30 + $0x28] sm:$0xff] (!%p1642_p5) }
 0x4d7   : > { %v1649_v9 = vld [vmem:[%s3543_s17 + $0x18] sm:$0xff] (!%p1642_p5)  ;;  %v1650_v47 = vld [vmem:[%s3543_s17 + $0x20] sm:$0xff] (!%p1642_p5)  ;;  %v1651_v34 = vld [vmem:[%s3543_s17 + $0x28] sm:$0xff] (!%p1642_p5) }
 0x4d8   : > { %v1771_v58 = vld [vmem:[%s3554_s30 + $0x30] sm:$0xff] (!%p1642_p5)  ;;  %v1772_v13 = vld [vmem:[%s3554_s30 + $0x38] sm:$0xff] (!%p1642_p5)  ;;  %v1773_v15 = vld [vmem:[%s3554_s30 + $0x40] sm:$0xff] (!%p1642_p5) }
 0x4d9   : > { %v1652_v12 = vld [vmem:[%s3543_s17 + $0x30] sm:$0xff] (!%p1642_p5)  ;;  %v1653_v14 = vld [vmem:[%s3543_s17 + $0x38] sm:$0xff] (!%p1642_p5)  ;;  %v1654_v16 = vld [vmem:[%s3543_s17 + $0x40] sm:$0xff] (!%p1642_p5) }
 0x4da   : > { %1789 = vperm.xlu1 (!%p1642_p5), %3188, %v1766_v0   ;;  %1670 = vperm.xlu0 (!%p1642_p5), %3187, %v1647_v44   ;;  %v1774_v17 = vld [vmem:[%s3554_s30 + $0x48] sm:$0xff] (!%p1642_p5)  ;;  %v1775_v41 = vld [vmem:[%s3554_s30 + $0x50] sm:$0xff] (!%p1642_p5)  ;;  %v1776_v22 = vld [vmem:[%s3554_s30 + $0x58] sm:$0xff] (!%p1642_p5) }
 0x4db   : > { %v1655_v18 = vld [vmem:[%s3543_s17 + $0x48] sm:$0xff] (!%p1642_p5)  ;;  %v1656_v21 = vld [vmem:[%s3543_s17 + $0x50] sm:$0xff] (!%p1642_p5)  ;;  %v1657_v24 = vld [vmem:[%s3543_s17 + $0x58] sm:$0xff] (!%p1642_p5) }
 0x4dc   : > { %v1777_v25 = vld [vmem:[%s3554_s30 + $0x60] sm:$0xff]  ;;  %v1778_v27 = vld [vmem:[%s3554_s30 + $0x68] sm:$0xff]  ;;  %v1779_v28 = vld [vmem:[%s3554_s30 + $0x70] sm:$0xff] }
 0x4dd   : > { %v1658_v55 = vld [vmem:[%s3543_s17 + $0x60] sm:$0xff]  ;;  %v1659_v7 = vld [vmem:[%s3543_s17 + $0x68] sm:$0xff]  ;;  %v1660_v62 = vld [vmem:[%s3543_s17 + $0x70] sm:$0xff] }
 0x4de   : > { %1794 = vperm.xlu1 %3188, %v1767_v2   ;;  %1675 = vperm.xlu0 %3187, %v1648_v3   ;;  %v1780_v53 = vld [vmem:[%s3554_s30 + $0x78] sm:$0xff]  ;;  %v3992_v51 = vld [vmem:[%s3548_s25] ss:$0 sm:$0xff] }
 0x4df   : > { %v1661_v31 = vld [vmem:[%s3543_s17 + $0x78] sm:$0xff]  ;;  %v3995_v52 = vld [vmem:[%s3559_s5] ss:$0 sm:$0xff] }
 0x4e2   : > { %1799 = vperm.xlu1 %3188, %v1768_v4   ;;  %1680 = vperm.xlu0 %3187, %v1649_v9  }
 0x4e6   : > { %1804 = vperm.xlu1 %3188, %v1769_v6   ;;  %1685 = vperm.xlu0 %3187, %v1650_v47  }
 0x4ea   : > { %1809 = vperm.xlu1 %3188, %v1770_v11   ;;  %1690 = vperm.xlu0 %3187, %v1651_v34  }
 0x4ee   : > { %1814 = vperm.xlu1 %3188, %v1771_v58   ;;  %1695 = vperm.xlu0 %3187, %v1652_v12  }
 0x4f2   : > { %1819 = vperm.xlu1 %3188, %v1772_v13   ;;  %1700 = vperm.xlu0 %3187, %v1653_v14  }
 0x4f6   : > { %1824 = vperm.xlu1 %3188, %v1773_v15   ;;  %1705 = vperm.xlu0 %3187, %v1654_v16  }
 0x4fa   : > { %1829 = vperm.xlu1 %3188, %v1774_v17   ;;  %1710 = vperm.xlu0 %3187, %v1655_v18  }
 0x4fe   : > { %1834 = vperm.xlu1 %3188, %v1775_v41   ;;  %1715 = vperm.xlu0 %3187, %v1656_v21  }
 0x502   : > { %1839 = vperm.xlu1 %3188, %v1776_v22   ;;  %1720 = vperm.xlu0 %3187, %v1657_v24  }
 0x506   : > { %1844 = vperm.xlu1 %3188, %v1777_v25   ;;  %1725 = vperm.xlu0 %3187, %v1658_v55  }
 0x50a   : > { %1849 = vperm.xlu1 %3188, %v1778_v27   ;;  %1730 = vperm.xlu0 %3187, %v1659_v7  }
 0x50e   : > { %1854 = vperm.xlu1 %3188, %v1779_v28   ;;  %1735 = vperm.xlu0 %3187, %v1660_v62  }
 0x512   : > { %1859 = vperm.xlu1 %3188, %v1780_v53   ;;  %1740 = vperm.xlu0 %3187, %v1661_v31  }
 0x555   : > { %v1785_v35 = vpop.permute.xlu1 %1784  ;;  %v1666_v32 = vpop.permute.xlu0 %1665 }
 0x556   : > { %v1868_v0 = vmul.f32 %v3992_v51, %v1785_v35  ;;  %v1749_v44 = vmul.f32 %v3995_v52, %v1666_v32 }
 0x558   : > { %v1884_v34 = vadd.f32 %v1868_v0, %v1749_v44 }
 0x559   : > { %v1790_v49 = vpop.permute.xlu1 %1789  ;;  %v1671_v36 = vpop.permute.xlu0 %1670 }
 0x55a   : > { %v1869_v20 = vmul.f32 %v3992_v51, %v1790_v49  ;;  %v1750_v59 = vmul.f32 %v3995_v52, %v1671_v36  ;;  %v1900_v21 = vmul.f32 -0.015625, %v1884_v34 }
 0x55c   : > { %v1885_v4 = vadd.f32 %v1869_v20, %v1750_v59  ;;  %v1917_v32 = vmul.f32 %v1900_v21, %v3773_v39 }
 0x55d   : > { %v1795_v38 = vpop.permute.xlu1 %1794  ;;  %v1676_v46 = vpop.permute.xlu0 %1675 }
 0x55e   : > { %v1870_v2 = vmul.f32 %v3992_v51, %v1795_v38  ;;  %v1751_v3 = vmul.f32 %v3995_v52, %v1676_v46  ;;  %v1901_v14 = vmul.f32 -0.015625, %v1885_v4 }
 0x560   : > { %v1886_v58 = vadd.f32 %v1870_v2, %v1751_v3  ;;  %v1918_v27 = vmul.f32 %v1901_v14, %v3812_v5 }
 0x561   : > { %v1800_v48 = vpop.permute.xlu1 %1799  ;;  %v1681_v33 = vpop.permute.xlu0 %1680 }
 0x562   : > { %v1871_v9 = vmul.f32 %v3992_v51, %v1800_v48  ;;  %v1752_v6 = vmul.f32 %v3995_v52, %v1681_v33  ;;  %v1902_v22 = vmul.f32 -0.015625, %v1886_v58  ;;  %v1933_v33 = vadd.f32 %v1918_v27, %v1917_v32 }
 0x564   : > { %v1887_v15 = vadd.f32 %v1871_v9, %v1752_v6  ;;  %v1919_v49 = vmul.f32 %v1902_v22, %v3754_v26 }
 0x565   : > { %v1805_v45 = vpop.permute.xlu1 %1804  ;;  %v1686_v30 = vpop.permute.xlu0 %1685 }
 0x566   : > { %v1872_v12 = vmul.f32 %v3992_v51, %v1805_v45  ;;  %v1753_v13 = vmul.f32 %v3995_v52, %v1686_v30  ;;  %v1903_v7 = vmul.f32 -0.015625, %v1887_v15 }
 0x568   : > { %v1888_v24 = vadd.f32 %v1872_v12, %v1753_v13  ;;  %v1920_v45 = vmul.f32 %v1903_v7, %v3791_v56 }
 0x569   : > { %v1810_v40 = vpop.permute.xlu1 %1809  ;;  %v1691_v37 = vpop.permute.xlu0 %1690 }
 0x56a   : > { %v1873_v16 = vmul.f32 %v3992_v51, %v1810_v40  ;;  %v1754_v17 = vmul.f32 %v3995_v52, %v1691_v37  ;;  %v1904_v36 = vmul.f32 -0.015625, %v1888_v24 }
 0x56c   : > { %v1889_v28 = vadd.f32 %v1873_v16, %v1754_v17  ;;  %v1921_v0 = vmul.f32 %v1904_v36, %v3855_v57 }
 0x56d   : > { %v1815_v60 = vpop.permute.xlu1 %1814  ;;  %v1696_v63 = vpop.permute.xlu0 %1695 }
 0x56e   : > { %v1874_v25 = vmul.f32 %v3992_v51, %v1815_v60  ;;  %v1755_v55 = vmul.f32 %v3995_v52, %v1696_v63  ;;  %v1905_v30 = vmul.f32 -0.015625, %v1889_v28  ;;  %v1934_v63 = vadd.f32 %v1933_v33, %v1919_v49 }
 0x570   : > { %v1890_v38 = vadd.f32 %v1874_v25, %v1755_v55  ;;  %v1935_v9 = vadd.f32 %v1934_v63, %v1920_v45  ;;  %v1922_v6 = vmul.f32 %v1905_v30, %v3875_v19 }
 0x571   : > { %v1820_v47 = vpop.permute.xlu1 %1819  ;;  %v1701_v11 = vpop.permute.xlu0 %1700 }
 0x572   : > { %v1875_v62 = vmul.f32 %v3992_v51, %v1820_v47  ;;  %v1756_v53 = vmul.f32 %v3995_v52, %v1701_v11  ;;  %v1906_v44 = vmul.f32 -0.015625, %v1890_v38  ;;  %v1936_v14 = vadd.f32 %v1935_v9, %v1921_v0 }
 0x574   : > { %v1891_v40 = vadd.f32 %v1875_v62, %v1756_v53  ;;  %v1923_v15 = vmul.f32 %v1906_v44, %v3834_v1 }
 0x575   : > { %v1825_v18 = vpop.permute.xlu1 %1824  ;;  %v1706_v41 = vpop.permute.xlu0 %1705 }
 0x576   : > { %v1876_v46 = vmul.f32 %v3992_v51, %v1825_v18  ;;  %v1757_v48 = vmul.f32 %v3995_v52, %v1706_v41  ;;  %v1907_v47 = vmul.f32 -0.015625, %v1891_v40  ;;  %v1937_v18 = vadd.f32 %v1936_v14, %v1922_v6 }
 0x578   : > { %v1892_v2 = vadd.f32 %v1876_v46, %v1757_v48  ;;  %v1924_v41 = vmul.f32 %v1907_v47, %v3868_v8  ;;  %v1938_v7 = vadd.f32 %v1937_v18, %v1923_v15 }
 0x579   : > { %v1830_v31 = vpop.permute.xlu1 %1829  ;;  %v1711_v35 = vpop.permute.xlu0 %1710 }
 0x57a   : > { %v1877_v37 = vmul.f32 %v3992_v51, %v1830_v31  ;;  %v1758_v20 = vmul.f32 %v3995_v52, %v1711_v35  ;;  %v1908_v16 = vmul.f32 -0.015625, %v1892_v2  ;;  %v1939_v31 = vadd.f32 %v1938_v7, %v1924_v41 }
 0x57c   : > { %v1893_v11 = vadd.f32 %v1877_v37, %v1758_v20  ;;  %v1925_v28 = vmul.f32 %v1908_v16, %v3778_v43 }
 0x57d   : > { %v1835_v59 = vpop.permute.xlu1 %1834  ;;  %v1716_v60 = vpop.permute.xlu0 %1715 }
 0x57e   : > { %v1878_v3 = vmul.f32 %v3992_v51, %v1835_v59  ;;  %v1759_v4 = vmul.f32 %v3995_v52, %v1716_v60  ;;  %v1909_v21 = vmul.f32 -0.015625, %v1893_v11  ;;  %v1940_v48 = vadd.f32 %v1939_v31, %v1925_v28 }
 0x580   : > { %v1894_v17 = vadd.f32 %v1878_v3, %v1759_v4  ;;  %v1926_v35 = vmul.f32 %v1909_v21, %v3816_v54 }
 0x581   : > { %v1840_v34 = vpop.permute.xlu1 %1839  ;;  %v1721_v58 = vpop.permute.xlu0 %1720 }
 0x582   : > { %v1879_v12 = vmul.f32 %v3992_v51, %v1840_v34  ;;  %v1760_v13 = vmul.f32 %v3995_v52, %v1721_v58  ;;  %v1910_v62 = vmul.f32 -0.015625, %v1894_v17  ;;  %v1941_v40 = vadd.f32 %v1940_v48, %v1926_v35 }
 0x584   : > { %v1895_v22 = vadd.f32 %v1879_v12, %v1760_v13  ;;  %v1927_v33 = vmul.f32 %v1910_v62, %v3759_v29 }
 0x585   : > { %v1845_v24 = vpop.permute.xlu1 %1844  ;;  %v1726_v25 = vpop.permute.xlu0 %1725 }
 0x586   : > { %v1880_v55 = vmul.f32 %v3992_v51, %v1845_v24  ;;  %v1761_v27 = vmul.f32 %v3995_v52, %v1726_v25  ;;  %v1911_v32 = vmul.f32 -0.015625, %v1895_v22  ;;  %v1942_v44 = vadd.f32 %v1941_v40, %v1927_v33 }
 0x588   : > { %v1896_v53 = vadd.f32 %v1880_v55, %v1761_v27  ;;  %v1928_v37 = vmul.f32 %v1911_v32, %v3796_v61 }
 0x589   : > { %v1850_v49 = vpop.permute.xlu1 %1849  ;;  %v1731_v36 = vpop.permute.xlu0 %1730 }
 0x58a   : > { %v1881_v38 = vmul.f32 %v3992_v51, %v1850_v49  ;;  %v1762_v46 = vmul.f32 %v3995_v52, %v1731_v36  ;;  %v1912_v45 = vmul.f32 -0.015625, %v1896_v53  ;;  %v1943_v4 = vadd.f32 %v1942_v44, %v1928_v37 }
 0x58c   : > { %v1897_v30 = vadd.f32 %v1881_v38, %v1762_v46  ;;  %v1929_v2 = vmul.f32 %v1912_v45, %v3861_v42 }
 0x58d   : > { %v1855_v20 = vpop.permute.xlu1 %1854  ;;  %v1736_v59 = vpop.permute.xlu0 %1735 }
 0x58e   : > { %v1913_v60 = vmul.f32 -0.015625, %v1897_v30  ;;  %v1882_v63 = vmul.f32 %v3992_v51, %v1855_v20  ;;  %v1763_v0 = vmul.f32 %v3995_v52, %v1736_v59  ;;  %v1944_v12 = vadd.f32 %v1943_v4, %v1929_v2 }
 0x590   : > { %v1898_v3 = vadd.f32 %v1882_v63, %v1763_v0  ;;  %v1930_v47 = vmul.f32 %v1913_v60, %v3877_v23 }
 0x591   : > { %v1860_v9 = vpop.permute.xlu1 %1859  ;;  %v1741_v6 = vpop.permute.xlu0 %1740 }
 0x592   : > { %v1914_v11 = vmul.f32 -0.015625, %v1898_v3  ;;  %v1883_v34 = vmul.f32 %v3992_v51, %v1860_v9  ;;  %v1764_v58 = vmul.f32 %v3995_v52, %v1741_v6  ;;  %v1945_v16 = vadd.f32 %v1944_v12, %v1930_v47  ;;  %v1916_v52 = vld [vmem:[#allocation2] sm:$0xff] }
 0x594   : > { %v1931_v13 = vmul.f32 %v1914_v11, %v3848_v50  ;;  %v1899_v14 = vadd.f32 %v1883_v34, %v1764_v58 }
 0x596   : > { %v1915_v15 = vmul.f32 -0.015625, %v1899_v14  ;;  %v1946_v18 = vadd.f32 %v1945_v16, %v1931_v13 }
 0x598   : > { %v1932_v17 = vmul.f32 %v1915_v15, %v3873_v10 }
 0x59a   : > { %v1947_v41 = vadd.f32 %v1946_v18, %v1932_v17 }
 0x59c   : > { %1948 = vadd.xlane.f32.xlu0 %v1947_v41 }
 0x629   : > { %v1949_v21 = vpop.xlane.xlu0 %1948 }
 0x62a   : > { %v1950_v22 = vrot.slane %v1949_v21, 4 }
 0x62c   : > { %v1951_v24 = vadd.f32 %v1950_v22, %v1949_v21 }
 0x62e   : > { %v1952_v25 = vrot.slane %v1951_v24, 2 }
 0x630   : > { %v1953_v55 = vadd.f32 %v1952_v25, %v1951_v24 }
 0x632   : > { %v1954_v27 = vrot.slane %v1953_v55, 1 }
 0x634   : > { %v1955_v51 = vadd.f32 %v1954_v27, %v1953_v55 }
 0x636   : > { %3011 = vpush %v1955_v51 }
 0x667   : > { %s3012_s27 = spop %3011 }
 0x668   : > { %v1957_v7 = vstv %s3012_s27 }
 0x669   : > { %v1958_v28 = vadd.f32 %v1957_v7, %v1916_v52 }
 0x66b   : > { %1959 = vst [vmem:[#allocation2] sm:$0xff] %v1958_v28 }
 0x66c PF: > { %s4393_s24 = sld [smem:[#allocation24_spill]] }
 0x672   : > { %p2933_p6 = scmp.ne.s32.totalorder %s4393_s24, %s3511_s26 }
 0x673   : > { %v1964_v62 = vlaneseq (!%p2933_p6)  ;;  %s4394_s23 = sld [smem:[#allocation24_spill]] (!%p2933_p6)  ;;  %p2016_p8 = scmp.lt.s32.totalorder (!%p2933_p6), %s3511_s26, 1 }
 0x674   : > { %1963 = sbr.rel (%p2933_p6) target bundleno = 2838 (0xb16), region = 80 }
 0x675   : > { %v1965_v53 = vshrl.u32 (!%p2933_p6), %v1964_v62, 7  ;;  %v1982_v31 = vand.u32 (!%p2933_p6), 127, %v1964_v62 }
 0x677   : > { %v1966_v35 = vadd.s32 (!%p2933_p6), 8, %v1965_v53  ;;  %v1967_v32 = vadd.s32 (!%p2933_p6), 16, %v1965_v53  ;;  %v1968_v49 = vadd.s32 (!%p2933_p6), 24, %v1965_v53  ;;  %v1969_v36 = vadd.s32 (!%p2933_p6), 32, %v1965_v53 }
 0x678   : > { %v1970_v38 = vadd.s32 (!%p2933_p6), 40, %v1965_v53  ;;  %v1971_v46 = vadd.s32 (!%p2933_p6), 48, %v1965_v53  ;;  %v1972_v48 = vadd.s32 (!%p2933_p6), 56, %v1965_v53  ;;  %v1973_v33 = vadd.s32 (!%p2933_p6), 64, %v1965_v53 }
 0x679   : > { %p2015_p7 = scmp.lt.s32.totalorder (!%p2933_p6), %s4394_s23, 1  ;;  %v1974_v45 = vadd.s32 (!%p2933_p6), 72, %v1965_v53  ;;  %v1975_v30 = vadd.s32 (!%p2933_p6), 80, %v1965_v53  ;;  %v1976_v40 = vadd.s32 (!%p2933_p6), 88, %v1965_v53  ;;  %v1977_v37 = vadd.s32 (!%p2933_p6), 96, %v1965_v53 }
 0x67a   : > { %v1978_v20 = vadd.s32 (!%p2933_p6), 104, %v1965_v53  ;;  %v1979_v59 = vadd.s32 (!%p2933_p6), 112, %v1965_v53  ;;  %v1980_v60 = vadd.s32 (!%p2933_p6), 120, %v1965_v53  ;;  %vm1983_vm0 = vcmp.lt.s32.totalorder (!%p2933_p6), %v1965_v53, %v1982_v31 }
 0x67b   : > { %p4051_p9 = pnand %p2016_p8, %p2015_p7  ;;  %vm1984_vm1 = vcmp.lt.s32.totalorder %v1966_v35, %v1982_v31  ;;  %vm1985_vm2 = vcmp.lt.s32.totalorder %v1967_v32, %v1982_v31  ;;  %vm1986_vm3 = vcmp.lt.s32.totalorder %v1968_v49, %v1982_v31  ;;  %vm1987_vm4 = vcmp.lt.s32.totalorder %v1969_v36, %v1982_v31 }
 0x67c   : > { %vm1988_vm5 = vcmp.lt.s32.totalorder %v1970_v38, %v1982_v31  ;;  %vm1989_vm6 = vcmp.lt.s32.totalorder %v1971_v46, %v1982_v31  ;;  %vm1990_vm7 = vcmp.lt.s32.totalorder %v1972_v48, %v1982_v31  ;;  %vm1991_vm8 = vcmp.lt.s32.totalorder %v1973_v33, %v1982_v31  ;;  %v2022_v9 = vld [vmem:[%s3543_s17 + $0x8] sm:$0xff] (!%p4051_p9)  ;;  %v2025_v34 = vld [vmem:[%s3543_s17 + $0x20] sm:$0xff] (!%p4051_p9)  ;;  %v2028_v13 = vld [vmem:[%s3543_s17 + $0x38] sm:$0xff] (!%p4051_p9) }
 0x67d   : > { %vm1992_vm9 = vcmp.lt.s32.totalorder %v1974_v45, %v1982_v31  ;;  %vm1993_vm10 = vcmp.lt.s32.totalorder %v1975_v30, %v1982_v31  ;;  %vm1994_vm11 = vcmp.lt.s32.totalorder %v1976_v40, %v1982_v31  ;;  %vm1995_vm12 = vcmp.lt.s32.totalorder %v1977_v37, %v1982_v31  ;;  %2020 = sbr.rel (%p4051_p9) target bundleno = 2043 (0x7fb), region = 84  ;;  %v2026_v11 = vld [vmem:[%s3543_s17 + $0x28] sm:$0xff] (!%p4051_p9)  ;;  %v2027_v14 = vld [vmem:[%s3543_s17 + $0x30] sm:$0xff] (!%p4051_p9)  ;;  %v2029_v18 = vld [vmem:[%s3543_s17 + $0x40] sm:$0xff] (!%p4051_p9) }
 0x67e   : > { %vm1996_vm13 = vcmp.lt.s32.totalorder %v1978_v20, %v1982_v31  ;;  %vm1997_vm14 = vcmp.lt.s32.totalorder %v1979_v59, %v1982_v31  ;;  %vm1998_vm15 = vcmp.lt.s32.totalorder %v1980_v60, %v1982_v31  ;;  %v4057_v63 = vsel %vm1983_vm0, %v3773_v39, 0.0  ;;  %v2030_v17 = vld [vmem:[%s3543_s17 + $0x48] sm:$0xff] (!%p4051_p9)  ;;  %v2032_v22 = vld [vmem:[%s3543_s17 + $0x58] sm:$0xff] (!%p4051_p9)  ;;  %v2031_v24 = vld [vmem:[%s3543_s17 + $0x50] sm:$0xff] (!%p4051_p9) }
 0x67f   : > { %v4061_v0 = vsel %vm1984_vm1, %v3812_v5, 0.0  ;;  %v4065_v44 = vsel %vm1985_vm2, %v3754_v26, 0.0  ;;  %v4069_v2 = vsel %vm1986_vm3, %v3791_v56, 0.0  ;;  %v4073_v3 = vsel %vm1987_vm4, %v3855_v57, 0.0  ;;  %v2034_v27 = vld [vmem:[%s3543_s17 + $0x68] sm:$0xff] (!%p4051_p9)  ;;  %v2033_v51 = vld [vmem:[%s3543_s17 + $0x60] sm:$0xff] (!%p4051_p9) }
 0x680   : > { %v4077_v39 = vsel %vm1988_vm5, %v3875_v19, 0.0  ;;  %v4081_v5 = vsel %vm1989_vm6, %v3834_v1, 0.0  ;;  %v4085_v26 = vsel %vm1990_vm7, %v3868_v8, 0.0  ;;  %v4089_v56 = vsel %vm1991_vm8, %v3778_v43, 0.0  ;;  %v2036_v28 = vld [vmem:[%s3543_s17 + $0x78] sm:$0xff] (!%p4051_p9)  ;;  %v2035_v62 = vld [vmem:[%s3543_s17 + $0x70] sm:$0xff] (!%p4051_p9) }
 0x681   : > { %v4093_v57 = vsel %vm1992_vm9, %v3816_v54, 0.0  ;;  %v4097_v19 = vsel %vm1993_vm10, %v3759_v29, 0.0  ;;  %v4101_v1 = vsel %vm1994_vm11, %v3796_v61, 0.0  ;;  %v4105_v8 = vsel %vm1995_vm12, %v3861_v42, 0.0  ;;  %v2023_v61 = vld [vmem:[%s3543_s17 + $0x10] sm:$0xff] (!%p4051_p9)  ;;  %v2021_v42 = vld [vmem:[%s3543_s17] sm:$0xff] (!%p4051_p9) }
 0x682   : > { %v4109_v43 = vsel %vm1996_vm13, %v3877_v23, 0.0  ;;  %v4113_v54 = vsel %vm1997_vm14, %v3848_v50, 0.0  ;;  %v4117_v29 = vsel %vm1998_vm15, %v3873_v10, 0.0  ;;  %v2024_v23 = vld [vmem:[%s3543_s17 + $0x18] sm:$0xff] (!%p4051_p9)  ;;  %v3337_v4 = vmov (!%p4051_p9), 0  }
 0x683   : > { %3190 = vset.pattern.permute.xlu1 (!%p4051_p9), %v3337_v4  ;;  %3189 = vset.pattern.permute.xlu0 (!%p4051_p9), %v3337_v4  ;;  %v2039_v50 = vmul.f32 (!%p4051_p9), 0.035714287, %v2023_v61  ;;  %v2037_v10 = vmul.f32 (!%p4051_p9), 0.035714287, %v2021_v42  ;;  %v2040_v6 = vmul.f32 (!%p4051_p9), 0.035714287, %v2024_v23 }
 0x684   : > { %v2038_v47 = vmul.f32 0.035714287, %v2022_v9  ;;  %v2042_v58 = vmul.f32 0.035714287, %v2026_v11  ;;  %v2041_v12 = vmul.f32 0.035714287, %v2025_v34 }
 0x685   : > { %2066 = vperm.xlu1 %3190, %v2039_v50   ;;  %2056 = vperm.xlu0 %3189, %v2037_v10   ;;  %v2044_v15 = vmul.f32 0.035714287, %v2028_v13  ;;  %v2043_v16 = vmul.f32 0.035714287, %v2027_v14  ;;  %v2046_v41 = vmul.f32 0.035714287, %v2030_v17 }
 0x686   : > { %v2045_v21 = vmul.f32 0.035714287, %v2029_v18  ;;  %v2048_v25 = vmul.f32 0.035714287, %v2032_v22  ;;  %v2047_v55 = vmul.f32 0.035714287, %v2031_v24 }
 0x687   : > { %v2050_v52 = vmul.f32 0.035714287, %v2034_v27  ;;  %v2049_v7 = vmul.f32 0.035714287, %v2033_v51  ;;  %v2052_v53 = vmul.f32 0.035714287, %v2036_v28 }
 0x688   : > { %v2051_v31 = vmul.f32 0.035714287, %v2035_v62  ;;  %v2934_v35 = vld [vmem:[%s3548_s25] ss:$0 sm:$0xff] }
 0x689   : > { %2071 = vperm.xlu1 %3190, %v2040_v6   ;;  %2061 = vperm.xlu0 %3189, %v2038_v47  }
 0x68d   : > { %2081 = vperm.xlu1 %3190, %v2042_v58   ;;  %2076 = vperm.xlu0 %3189, %v2041_v12  }
 0x691   : > { %2091 = vperm.xlu1 %3190, %v2044_v15   ;;  %2086 = vperm.xlu0 %3189, %v2043_v16  }
 0x695   : > { %2101 = vperm.xlu1 %3190, %v2046_v41   ;;  %2096 = vperm.xlu0 %3189, %v2045_v21  }
 0x699   : > { %2111 = vperm.xlu1 %3190, %v2048_v25   ;;  %2106 = vperm.xlu0 %3189, %v2047_v55  }
 0x69d   : > { %2121 = vperm.xlu1 %3190, %v2050_v52   ;;  %2116 = vperm.xlu0 %3189, %v2049_v7  }
 0x6a1   : > { %2131 = vperm.xlu1 %3190, %v2052_v53   ;;  %2126 = vperm.xlu0 %3189, %v2051_v31  }
 0x704   : > { %v2067_v32 = vpop.permute.xlu1 %2066  ;;  %v2057_v49 = vpop.permute.xlu0 %2056 }
 0x705   : > { %v2140_v36 = vmul.f32 %v2934_v35, %v2057_v49  ;;  %v2142_v48 = vmul.f32 %v2934_v35, %v2067_v32 }
 0x707   : > { %v2157_v45 = vmul.f32 %v2140_v36, %v4057_v63  ;;  %v2159_v59 = vmul.f32 %v2142_v48, %v4065_v44 }
 0x708   : > { %v2072_v38 = vpop.permute.xlu1 %2071  ;;  %v2062_v46 = vpop.permute.xlu0 %2061 }
 0x709   : > { %v2141_v33 = vmul.f32 %v2934_v35, %v2062_v46  ;;  %v2143_v30 = vmul.f32 %v2934_v35, %v2072_v38 }
 0x70b   : > { %v2158_v40 = vmul.f32 %v2141_v33, %v4061_v0  ;;  %v2160_v42 = vmul.f32 %v2143_v30, %v4069_v2 }
 0x70c   : > { %v2082_v37 = vpop.permute.xlu1 %2081  ;;  %v2077_v20 = vpop.permute.xlu0 %2076 }
 0x70d   : > { %v2173_v60 = vadd.f32 %v2158_v40, %v2157_v45  ;;  %v2144_v61 = vmul.f32 %v2934_v35, %v2077_v20  ;;  %v2145_v4 = vmul.f32 %v2934_v35, %v2082_v37 }
 0x70f   : > { %v2174_v23 = vadd.f32 %v2173_v60, %v2159_v59  ;;  %v2161_v6 = vmul.f32 %v2144_v61, %v4073_v3  ;;  %v2162_v11 = vmul.f32 %v2145_v4, %v4077_v39 }
 0x710   : > { %v2092_v50 = vpop.permute.xlu1 %2091  ;;  %v2087_v10 = vpop.permute.xlu0 %2086 }
 0x711   : > { %v2175_v9 = vadd.f32 %v2174_v23, %v2160_v42  ;;  %v2146_v47 = vmul.f32 %v2934_v35, %v2087_v10  ;;  %v2147_v58 = vmul.f32 %v2934_v35, %v2092_v50 }
 0x713   : > { %v2176_v34 = vadd.f32 %v2175_v9, %v2161_v6  ;;  %v2163_v15 = vmul.f32 %v2146_v47, %v4081_v5  ;;  %v2164_v17 = vmul.f32 %v2147_v58, %v4085_v26 }
 0x714   : > { %v2102_v12 = vpop.permute.xlu1 %2101  ;;  %v2097_v13 = vpop.permute.xlu0 %2096 }
 0x715   : > { %v2177_v14 = vadd.f32 %v2176_v34, %v2162_v11  ;;  %v2148_v16 = vmul.f32 %v2934_v35, %v2097_v13  ;;  %v2149_v41 = vmul.f32 %v2934_v35, %v2102_v12  ;;  %v2156_v11 = vld [vmem:[#allocation2] sm:$0xff] }
 0x717   : > { %v2178_v18 = vadd.f32 %v2177_v14, %v2163_v15  ;;  %v2165_v25 = vmul.f32 %v2148_v16, %v4089_v56  ;;  %v2166_v27 = vmul.f32 %v2149_v41, %v4093_v57 }
 0x718   : > { %v2112_v21 = vpop.permute.xlu1 %2111  ;;  %v2107_v22 = vpop.permute.xlu0 %2106 }
 0x719   : > { %v2179_v24 = vadd.f32 %v2178_v18, %v2164_v17  ;;  %v2150_v55 = vmul.f32 %v2934_v35, %v2107_v22  ;;  %v2151_v52 = vmul.f32 %v2934_v35, %v2112_v21 }
 0x71b   : > { %v2180_v51 = vadd.f32 %v2179_v24, %v2165_v25  ;;  %v2167_v53 = vmul.f32 %v2150_v55, %v4097_v19  ;;  %v2168_v32 = vmul.f32 %v2151_v52, %v4101_v1 }
 0x71c   : > { %v2122_v7 = vpop.permute.xlu1 %2121  ;;  %v2117_v28 = vpop.permute.xlu0 %2116 }
 0x71d   : > { %v2181_v62 = vadd.f32 %v2180_v51, %v2166_v27  ;;  %v2152_v31 = vmul.f32 %v2934_v35, %v2117_v28  ;;  %v2153_v36 = vmul.f32 %v2934_v35, %v2122_v7 }
 0x71f   : > { %v2182_v49 = vadd.f32 %v2181_v62, %v2167_v53  ;;  %v2169_v33 = vmul.f32 %v2152_v31, %v4105_v8  ;;  %v2170_v30 = vmul.f32 %v2153_v36, %v4109_v43 }
 0x720   : > { %v2132_v38 = vpop.permute.xlu1 %2131  ;;  %v2127_v46 = vpop.permute.xlu0 %2126 }
 0x721   : > { %v2183_v48 = vadd.f32 %v2182_v49, %v2168_v32  ;;  %v2154_v45 = vmul.f32 %v2934_v35, %v2127_v46  ;;  %v2155_v37 = vmul.f32 %v2934_v35, %v2132_v38 }
 0x723   : > { %v2184_v40 = vadd.f32 %v2183_v48, %v2169_v33  ;;  %v2171_v59 = vmul.f32 %v2154_v45, %v4113_v54  ;;  %v2172_v60 = vmul.f32 %v2155_v37, %v4117_v29 }
 0x725   : > { %v2185_v20 = vadd.f32 %v2184_v40, %v2170_v30 }
 0x727   : > { %v2186_v61 = vadd.f32 %v2185_v20, %v2171_v59 }
 0x729   : > { %v2187_v42 = vadd.f32 %v2186_v61, %v2172_v60 }
 0x72b   : > { %2188 = vadd.xlane.f32.xlu0 %v2187_v42 }
 0x7b8   : > { %v2189_v23 = vpop.xlane.xlu0 %2188 }
 0x7b9   : > { %v2190_v4 = vrot.slane %v2189_v23, 4 }
 0x7bb   : > { %v2191_v50 = vadd.f32 %v2190_v4, %v2189_v23 }
 0x7bd   : > { %v2192_v10 = vrot.slane %v2191_v50, 2 }
 0x7bf   : > { %v2193_v9 = vadd.f32 %v2192_v10, %v2191_v50 }
 0x7c1   : > { %v2194_v6 = vrot.slane %v2193_v9, 1 }
 0x7c3   : > { %v2195_v47 = vadd.f32 %v2194_v6, %v2193_v9 }
 0x7c5   : > { %3013 = vpush %v2195_v47 }
 0x7f6   : > { %s3014_s14 = spop %3013 }
 0x7f7   : > { %v2197_v34 = vstv %s3014_s14 }
 0x7f8   : > { %v2198_v35 = vadd.f32 %v2197_v34, %v2156_v11 }
 0x7fa   : > { %2199 = vst [vmem:[#allocation2] sm:$0xff] %v2198_v35 }
 0x7fb PF: > { %s4396_s22 = sld [smem:[#allocation24_spill]]  ;;  %p2201_p12 = scmp.ge.s32.totalorder %s3511_s26, 1 }
 0x801   : > { %p2200_p11 = scmp.ge.s32.totalorder %s4396_s22, 1 }
 0x803   : > { %p2202_p13 = pnand %p2201_p12, %p2200_p11 }
 0x804   : > { %v2208_v58 = vld [vmem:[%s3554_s30 + $0x10] sm:$0xff] (!%p2202_p13)  ;;  %v2206_v12 = vld [vmem:[%s3554_s30] sm:$0xff] (!%p2202_p13)  ;;  %v2209_v13 = vld [vmem:[%s3554_s30 + $0x18] sm:$0xff] (!%p2202_p13)  ;;  %v3338_v14 = vmov (!%p2202_p13), 0  }
 0x805   : > { %2205 = sbr.rel (%p2202_p13) target bundleno = 2429 (0x97d), region = 88  ;;  %3192 = vset.pattern.permute.xlu1 (!%p2202_p13), %v3338_v14  ;;  %3191 = vset.pattern.permute.xlu0 (!%p2202_p13), %v3338_v14  ;;  %v2224_v15 = vmul.f32 (!%p2202_p13), 0.035714287, %v2208_v58  ;;  %v2222_v16 = vmul.f32 (!%p2202_p13), 0.035714287, %v2206_v12  ;;  %v2207_v17 = vld [vmem:[%s3554_s30 + $0x8] sm:$0xff] (!%p2202_p13) }
 0x806   : > { %v2225_v18 = vmul.f32 (!%p2202_p13), 0.035714287, %v2209_v13  ;;  %v2223_v41 = vmul.f32 (!%p2202_p13), 0.035714287, %v2207_v17  ;;  %v2211_v21 = vld [vmem:[%s3554_s30 + $0x28] sm:$0xff] (!%p2202_p13)  ;;  %v2210_v22 = vld [vmem:[%s3554_s30 + $0x20] sm:$0xff] (!%p2202_p13) }
 0x807   : > { %2251 = vperm.xlu1 (!%p2202_p13), %3192, %v2224_v15   ;;  %2241 = vperm.xlu0 (!%p2202_p13), %3191, %v2222_v16   ;;  %v2227_v24 = vmul.f32 (!%p2202_p13), 0.035714287, %v2211_v21  ;;  %v2226_v25 = vmul.f32 (!%p2202_p13), 0.035714287, %v2210_v22  ;;  %v2213_v55 = vld [vmem:[%s3554_s30 + $0x38] sm:$0xff] (!%p2202_p13)  ;;  %v2212_v27 = vld [vmem:[%s3554_s30 + $0x30] sm:$0xff] (!%p2202_p13) }
 0x808   : > { %v2229_v51 = vmul.f32 (!%p2202_p13), 0.035714287, %v2213_v55  ;;  %v2228_v52 = vmul.f32 (!%p2202_p13), 0.035714287, %v2212_v27  ;;  %v2215_v7 = vld [vmem:[%s3554_s30 + $0x48] sm:$0xff] (!%p2202_p13)  ;;  %v2214_v28 = vld [vmem:[%s3554_s30 + $0x40] sm:$0xff] (!%p2202_p13) }
 0x809   : > { %v2231_v62 = vmul.f32 (!%p2202_p13), 0.035714287, %v2215_v7  ;;  %v2230_v53 = vmul.f32 (!%p2202_p13), 0.035714287, %v2214_v28  ;;  %v2217_v31 = vld [vmem:[%s3554_s30 + $0x58] sm:$0xff] (!%p2202_p13)  ;;  %v2216_v32 = vld [vmem:[%s3554_s30 + $0x50] sm:$0xff] (!%p2202_p13) }
 0x80a   : > { %v2233_v49 = vmul.f32 (!%p2202_p13), 0.035714287, %v2217_v31  ;;  %v2232_v36 = vmul.f32 (!%p2202_p13), 0.035714287, %v2216_v32  ;;  %v2219_v38 = vld [vmem:[%s3554_s30 + $0x68] sm:$0xff] (!%p2202_p13)  ;;  %v2218_v46 = vld [vmem:[%s3554_s30 + $0x60] sm:$0xff] (!%p2202_p13) }
 0x80b   : > { %2256 = vperm.xlu1 (!%p2202_p13), %3192, %v2225_v18   ;;  %2246 = vperm.xlu0 (!%p2202_p13), %3191, %v2223_v41   ;;  %v2235_v48 = vmul.f32 (!%p2202_p13), 0.035714287, %v2219_v38  ;;  %v2234_v33 = vmul.f32 (!%p2202_p13), 0.035714287, %v2218_v46  ;;  %v2221_v45 = vld [vmem:[%s3554_s30 + $0x78] sm:$0xff] (!%p2202_p13)  ;;  %v2220_v30 = vld [vmem:[%s3554_s30 + $0x70] sm:$0xff] (!%p2202_p13) }
 0x80c   : > { %v2237_v40 = vmul.f32 0.035714287, %v2221_v45  ;;  %v2236_v37 = vmul.f32 0.035714287, %v2220_v30  ;;  %v2935_v20 = vld [vmem:[%s3559_s5] ss:$0 sm:$0xff] }
 0x80f   : > { %2266 = vperm.xlu1 %3192, %v2227_v24   ;;  %2261 = vperm.xlu0 %3191, %v2226_v25  }
 0x813   : > { %2276 = vperm.xlu1 %3192, %v2229_v51   ;;  %2271 = vperm.xlu0 %3191, %v2228_v52  }
 0x817   : > { %2286 = vperm.xlu1 %3192, %v2231_v62   ;;  %2281 = vperm.xlu0 %3191, %v2230_v53  }
 0x81b   : > { %2296 = vperm.xlu1 %3192, %v2233_v49   ;;  %2291 = vperm.xlu0 %3191, %v2232_v36  }
 0x81f   : > { %2306 = vperm.xlu1 %3192, %v2235_v48   ;;  %2301 = vperm.xlu0 %3191, %v2234_v33  }
 0x823   : > { %2316 = vperm.xlu1 %3192, %v2237_v40   ;;  %2311 = vperm.xlu0 %3191, %v2236_v37  }
 0x886   : > { %v2252_v59 = vpop.permute.xlu1 %2251  ;;  %v2242_v60 = vpop.permute.xlu0 %2241 }
 0x887   : > { %v2325_v61 = vmul.f32 %v2935_v20, %v2242_v60  ;;  %v2327_v4 = vmul.f32 %v2935_v20, %v2252_v59 }
 0x889   : > { %v2342_v10 = vmul.f32 %v2325_v61, %v4057_v63  ;;  %v2344_v34 = vmul.f32 %v2327_v4, %v4065_v44 }
 0x88a   : > { %v2257_v42 = vpop.permute.xlu1 %2256  ;;  %v2247_v23 = vpop.permute.xlu0 %2246 }
 0x88b   : > { %v2326_v50 = vmul.f32 %v2935_v20, %v2247_v23  ;;  %v2328_v9 = vmul.f32 %v2935_v20, %v2257_v42 }
 0x88d   : > { %v2343_v6 = vmul.f32 %v2326_v50, %v4061_v0  ;;  %v2345_v12 = vmul.f32 %v2328_v9, %v4069_v2 }
 0x88e   : > { %v2267_v47 = vpop.permute.xlu1 %2266  ;;  %v2262_v11 = vpop.permute.xlu0 %2261 }
 0x88f   : > { %v2358_v35 = vadd.f32 %v2343_v6, %v2342_v10  ;;  %v2329_v58 = vmul.f32 %v2935_v20, %v2262_v11  ;;  %v2330_v14 = vmul.f32 %v2935_v20, %v2267_v47 }
 0x891   : > { %v2359_v13 = vadd.f32 %v2358_v35, %v2344_v34  ;;  %v2346_v18 = vmul.f32 %v2329_v58, %v4073_v3  ;;  %v2347_v21 = vmul.f32 %v2330_v14, %v4077_v39 }
 0x892   : > { %v2277_v15 = vpop.permute.xlu1 %2276  ;;  %v2272_v16 = vpop.permute.xlu0 %2271 }
 0x893   : > { %v2360_v17 = vadd.f32 %v2359_v13, %v2345_v12  ;;  %v2331_v41 = vmul.f32 %v2935_v20, %v2272_v16  ;;  %v2332_v24 = vmul.f32 %v2935_v20, %v2277_v15 }
 0x895   : > { %v2361_v22 = vadd.f32 %v2360_v17, %v2346_v18  ;;  %v2348_v51 = vmul.f32 %v2331_v41, %v4081_v5  ;;  %v2349_v7 = vmul.f32 %v2332_v24, %v4085_v26 }
 0x896   : > { %v2287_v25 = vpop.permute.xlu1 %2286  ;;  %v2282_v55 = vpop.permute.xlu0 %2281 }
 0x897   : > { %v2362_v27 = vadd.f32 %v2361_v22, %v2347_v21  ;;  %v2333_v52 = vmul.f32 %v2935_v20, %v2282_v55  ;;  %v2334_v62 = vmul.f32 %v2935_v20, %v2287_v25  ;;  %v2341_v21 = vld [vmem:[#allocation2] sm:$0xff] }
 0x899   : > { %v2363_v28 = vadd.f32 %v2362_v27, %v2348_v51  ;;  %v2350_v49 = vmul.f32 %v2333_v52, %v4089_v56  ;;  %v2351_v38 = vmul.f32 %v2334_v62, %v4093_v57 }
 0x89a   : > { %v2297_v53 = vpop.permute.xlu1 %2296  ;;  %v2292_v31 = vpop.permute.xlu0 %2291 }
 0x89b   : > { %v2364_v32 = vadd.f32 %v2363_v28, %v2349_v7  ;;  %v2335_v36 = vmul.f32 %v2935_v20, %v2292_v31  ;;  %v2336_v48 = vmul.f32 %v2935_v20, %v2297_v53 }
 0x89d   : > { %v2365_v46 = vadd.f32 %v2364_v32, %v2350_v49  ;;  %v2352_v40 = vmul.f32 %v2335_v36, %v4097_v19  ;;  %v2353_v59 = vmul.f32 %v2336_v48, %v4101_v1 }
 0x89e   : > { %v2307_v33 = vpop.permute.xlu1 %2306  ;;  %v2302_v45 = vpop.permute.xlu0 %2301 }
 0x89f   : > { %v2366_v30 = vadd.f32 %v2365_v46, %v2351_v38  ;;  %v2337_v37 = vmul.f32 %v2935_v20, %v2302_v45  ;;  %v2338_v61 = vmul.f32 %v2935_v20, %v2307_v33 }
 0x8a1   : > { %v2367_v60 = vadd.f32 %v2366_v30, %v2352_v40  ;;  %v2354_v50 = vmul.f32 %v2337_v37, %v4105_v8  ;;  %v2355_v9 = vmul.f32 %v2338_v61, %v4109_v43 }
 0x8a2   : > { %v2317_v42 = vpop.permute.xlu1 %2316  ;;  %v2312_v23 = vpop.permute.xlu0 %2311 }
 0x8a3   : > { %v2368_v4 = vadd.f32 %v2367_v60, %v2353_v59  ;;  %v2339_v10 = vmul.f32 %v2935_v20, %v2312_v23  ;;  %v2340_v47 = vmul.f32 %v2935_v20, %v2317_v42 }
 0x8a5   : > { %v2369_v6 = vadd.f32 %v2368_v4, %v2354_v50  ;;  %v2356_v34 = vmul.f32 %v2339_v10, %v4113_v54  ;;  %v2357_v35 = vmul.f32 %v2340_v47, %v4117_v29 }
 0x8a7   : > { %v2370_v11 = vadd.f32 %v2369_v6, %v2355_v9 }
 0x8a9   : > { %v2371_v58 = vadd.f32 %v2370_v11, %v2356_v34 }
 0x8ab   : > { %v2372_v12 = vadd.f32 %v2371_v58, %v2357_v35 }
 0x8ad   : > { %2373 = vadd.xlane.f32.xlu0 %v2372_v12 }
 0x93a   : > { %v2374_v13 = vpop.xlane.xlu0 %2373 }
 0x93b   : > { %v2375_v14 = vrot.slane %v2374_v13, 4 }
 0x93d   : > { %v2376_v15 = vadd.f32 %v2375_v14, %v2374_v13 }
 0x93f   : > { %v2377_v16 = vrot.slane %v2376_v15, 2 }
 0x941   : > { %v2378_v17 = vadd.f32 %v2377_v16, %v2376_v15 }
 0x943   : > { %v2379_v18 = vrot.slane %v2378_v17, 1 }
 0x945   : > { %v2380_v41 = vadd.f32 %v2379_v18, %v2378_v17 }
 0x947   : > { %3015 = vpush %v2380_v41 }
 0x978   : > { %s3016_s13 = spop %3015 }
 0x979   : > { %v2382_v22 = vstv %s3016_s13 }
 0x97a   : > { %v2383_v20 = vadd.f32 %v2382_v22, %v2341_v21 }
 0x97c   : > { %2384 = vst [vmem:[#allocation2] sm:$0xff] %v2383_v20 }
 0x97d PF: > { %p2385_p0 = pnand %p2201_p12, %p2015_p7 }
 0x97e   : > { %v2508_v24 = vld [vmem:[%s3554_s30] sm:$0xff] (!%p2385_p0)  ;;  %v3339_v55 = vmov (!%p2385_p0), 0   ;;  %v2509_v27 = vld [vmem:[%s3554_s30 + $0x8] sm:$0xff] (!%p2385_p0)  ;;  %v2510_v52 = vld [vmem:[%s3554_s30 + $0x10] sm:$0xff] (!%p2385_p0) }
 0x97f   : > { %2388 = sbr.rel (%p2385_p0) target bundleno = 2838 (0xb16), region = 92  ;;  %v2389_v25 = vld [vmem:[%s3543_s17] sm:$0xff] (!%p2385_p0)  ;;  %3194 = vset.pattern.permute.xlu1 (!%p2385_p0), %v3339_v55  ;;  %3193 = vset.pattern.permute.xlu0 (!%p2385_p0), %v3339_v55  ;;  %v2390_v51 = vld [vmem:[%s3543_s17 + $0x8] sm:$0xff] (!%p2385_p0)  ;;  %v2391_v7 = vld [vmem:[%s3543_s17 + $0x10] sm:$0xff] (!%p2385_p0) }
 0x980   : > { %2527 = vperm.xlu1 (!%p2385_p0), %3194, %v2508_v24   ;;  %2408 = vperm.xlu0 (!%p2385_p0), %3193, %v2389_v25   ;;  %v2511_v28 = vld [vmem:[%s3554_s30 + $0x18] sm:$0xff] (!%p2385_p0)  ;;  %v2512_v53 = vld [vmem:[%s3554_s30 + $0x20] sm:$0xff] (!%p2385_p0)  ;;  %v2513_v32 = vld [vmem:[%s3554_s30 + $0x28] sm:$0xff] (!%p2385_p0) }
 0x981   : > { %v2392_v62 = vld [vmem:[%s3543_s17 + $0x18] sm:$0xff] (!%p2385_p0)  ;;  %v2393_v31 = vld [vmem:[%s3543_s17 + $0x20] sm:$0xff] (!%p2385_p0)  ;;  %v2394_v49 = vld [vmem:[%s3543_s17 + $0x28] sm:$0xff] (!%p2385_p0) }
 0x982   : > { %v2514_v36 = vld [vmem:[%s3554_s30 + $0x30] sm:$0xff] (!%p2385_p0)  ;;  %v2515_v46 = vld [vmem:[%s3554_s30 + $0x38] sm:$0xff] (!%p2385_p0)  ;;  %v2516_v33 = vld [vmem:[%s3554_s30 + $0x40] sm:$0xff] (!%p2385_p0) }
 0x983   : > { %v2395_v38 = vld [vmem:[%s3543_s17 + $0x30] sm:$0xff] (!%p2385_p0)  ;;  %v2396_v48 = vld [vmem:[%s3543_s17 + $0x38] sm:$0xff] (!%p2385_p0)  ;;  %v2397_v45 = vld [vmem:[%s3543_s17 + $0x40] sm:$0xff] (!%p2385_p0) }
 0x984   : > { %2532 = vperm.xlu1 (!%p2385_p0), %3194, %v2509_v27   ;;  %2413 = vperm.xlu0 (!%p2385_p0), %3193, %v2390_v51   ;;  %v2517_v30 = vld [vmem:[%s3554_s30 + $0x48] sm:$0xff] (!%p2385_p0)  ;;  %v2518_v37 = vld [vmem:[%s3554_s30 + $0x50] sm:$0xff] (!%p2385_p0)  ;;  %v2519_v60 = vld [vmem:[%s3554_s30 + $0x58] sm:$0xff] (!%p2385_p0) }
 0x985   : > { %v2398_v40 = vld [vmem:[%s3543_s17 + $0x48] sm:$0xff] (!%p2385_p0)  ;;  %v2399_v59 = vld [vmem:[%s3543_s17 + $0x50] sm:$0xff] (!%p2385_p0)  ;;  %v2400_v61 = vld [vmem:[%s3543_s17 + $0x58] sm:$0xff] (!%p2385_p0) }
 0x986   : > { %v2520_v42 = vld [vmem:[%s3554_s30 + $0x60] sm:$0xff]  ;;  %v2521_v4 = vld [vmem:[%s3554_s30 + $0x68] sm:$0xff]  ;;  %v2522_v10 = vld [vmem:[%s3554_s30 + $0x70] sm:$0xff] }
 0x987   : > { %v2401_v23 = vld [vmem:[%s3543_s17 + $0x60] sm:$0xff]  ;;  %v2402_v50 = vld [vmem:[%s3543_s17 + $0x68] sm:$0xff]  ;;  %v2403_v9 = vld [vmem:[%s3543_s17 + $0x70] sm:$0xff] }
 0x988   : > { %2537 = vperm.xlu1 %3194, %v2510_v52   ;;  %2418 = vperm.xlu0 %3193, %v2391_v7   ;;  %v2523_v6 = vld [vmem:[%s3554_s30 + $0x78] sm:$0xff]  ;;  %v4228_v21 = vld [vmem:[%s3548_s25] ss:$0 sm:$0xff] }
 0x989   : > { %v2404_v47 = vld [vmem:[%s3543_s17 + $0x78] sm:$0xff]  ;;  %v4231_v22 = vld [vmem:[%s3559_s5] ss:$0 sm:$0xff] }
 0x98c   : > { %2542 = vperm.xlu1 %3194, %v2511_v28   ;;  %2423 = vperm.xlu0 %3193, %v2392_v62  }
 0x990   : > { %2547 = vperm.xlu1 %3194, %v2512_v53   ;;  %2428 = vperm.xlu0 %3193, %v2393_v31  }
 0x994   : > { %2552 = vperm.xlu1 %3194, %v2513_v32   ;;  %2433 = vperm.xlu0 %3193, %v2394_v49  }
 0x998   : > { %2557 = vperm.xlu1 %3194, %v2514_v36   ;;  %2438 = vperm.xlu0 %3193, %v2395_v38  }
 0x99c   : > { %2562 = vperm.xlu1 %3194, %v2515_v46   ;;  %2443 = vperm.xlu0 %3193, %v2396_v48  }
 0x9a0   : > { %2567 = vperm.xlu1 %3194, %v2516_v33   ;;  %2448 = vperm.xlu0 %3193, %v2397_v45  }
 0x9a4   : > { %2572 = vperm.xlu1 %3194, %v2517_v30   ;;  %2453 = vperm.xlu0 %3193, %v2398_v40  }
 0x9a8   : > { %2577 = vperm.xlu1 %3194, %v2518_v37   ;;  %2458 = vperm.xlu0 %3193, %v2399_v59  }
 0x9ac   : > { %2582 = vperm.xlu1 %3194, %v2519_v60   ;;  %2463 = vperm.xlu0 %3193, %v2400_v61  }
 0x9b0   : > { %2587 = vperm.xlu1 %3194, %v2520_v42   ;;  %2468 = vperm.xlu0 %3193, %v2401_v23  }
 0x9b4   : > { %2592 = vperm.xlu1 %3194, %v2521_v4   ;;  %2473 = vperm.xlu0 %3193, %v2402_v50  }
 0x9b8   : > { %2597 = vperm.xlu1 %3194, %v2522_v10   ;;  %2478 = vperm.xlu0 %3193, %v2403_v9  }
 0x9bc   : > { %2602 = vperm.xlu1 %3194, %v2523_v6   ;;  %2483 = vperm.xlu0 %3193, %v2404_v47  }
 0x9ff   : > { %v2528_v11 = vpop.permute.xlu1 %2527  ;;  %v2409_v34 = vpop.permute.xlu0 %2408 }
 0xa00   : > { %v2611_v27 = vmul.f32 %v4228_v21, %v2528_v11  ;;  %v2492_v51 = vmul.f32 %v4231_v22, %v2409_v34 }
 0xa02   : > { %v2627_v49 = vadd.f32 %v2611_v27, %v2492_v51 }
 0xa03   : > { %v2533_v35 = vpop.permute.xlu1 %2532  ;;  %v2414_v58 = vpop.permute.xlu0 %2413 }
 0xa04   : > { %v2612_v20 = vmul.f32 %v4228_v21, %v2533_v35  ;;  %v2493_v24 = vmul.f32 %v4231_v22, %v2414_v58  ;;  %v2643_v59 = vmul.f32 -0.015625, %v2627_v49 }
 0xa06   : > { %v2628_v28 = vadd.f32 %v2612_v20, %v2493_v24  ;;  %v2660_v34 = vmul.f32 %v2643_v59, %v4057_v63 }
 0xa07   : > { %v2538_v12 = vpop.permute.xlu1 %2537  ;;  %v2419_v13 = vpop.permute.xlu0 %2418 }
 0xa08   : > { %v2613_v52 = vmul.f32 %v4228_v21, %v2538_v12  ;;  %v2494_v7 = vmul.f32 %v4231_v22, %v2419_v13  ;;  %v2644_v48 = vmul.f32 -0.015625, %v2628_v28 }
 0xa0a   : > { %v2629_v36 = vadd.f32 %v2613_v52, %v2494_v7  ;;  %v2661_v4 = vmul.f32 %v2644_v48, %v4061_v0 }
 0xa0b   : > { %v2543_v14 = vpop.permute.xlu1 %2542  ;;  %v2424_v15 = vpop.permute.xlu0 %2423 }
 0xa0c   : > { %v2614_v62 = vmul.f32 %v4228_v21, %v2543_v14  ;;  %v2495_v53 = vmul.f32 %v4231_v22, %v2424_v15  ;;  %v2645_v60 = vmul.f32 -0.015625, %v2629_v36  ;;  %v2676_v15 = vadd.f32 %v2661_v4, %v2660_v34 }
 0xa0e   : > { %v2630_v33 = vadd.f32 %v2614_v62, %v2495_v53  ;;  %v2662_v35 = vmul.f32 %v2645_v60, %v4065_v44 }
 0xa0f   : > { %v2548_v16 = vpop.permute.xlu1 %2547  ;;  %v2429_v17 = vpop.permute.xlu0 %2428 }
 0xa10   : > { %v2615_v38 = vmul.f32 %v4228_v21, %v2548_v16  ;;  %v2496_v46 = vmul.f32 %v4231_v22, %v2429_v17  ;;  %v2646_v50 = vmul.f32 -0.015625, %v2630_v33  ;;  %v2677_v63 = vadd.f32 %v2676_v15, %v2662_v35 }
 0xa12   : > { %v2631_v61 = vadd.f32 %v2615_v38, %v2496_v46  ;;  %v2663_v0 = vmul.f32 %v2646_v50, %v4069_v2 }
 0xa13   : > { %v2553_v18 = vpop.permute.xlu1 %2552  ;;  %v2434_v41 = vpop.permute.xlu0 %2433 }
 0xa14   : > { %v2616_v45 = vmul.f32 %v4228_v21, %v2553_v18  ;;  %v2497_v30 = vmul.f32 %v4231_v22, %v2434_v41  ;;  %v2647_v58 = vmul.f32 -0.015625, %v2631_v61  ;;  %v2678_v52 = vadd.f32 %v2677_v63, %v2663_v0 }
 0xa16   : > { %v2632_v10 = vadd.f32 %v2616_v45, %v2497_v30  ;;  %v2664_v44 = vmul.f32 %v2647_v58, %v4073_v3 }
 0xa17   : > { %v2558_v25 = vpop.permute.xlu1 %2557  ;;  %v2439_v55 = vpop.permute.xlu0 %2438 }
 0xa18   : > { %v2617_v42 = vmul.f32 %v4228_v21, %v2558_v25  ;;  %v2498_v23 = vmul.f32 %v4231_v22, %v2439_v55  ;;  %v2648_v16 = vmul.f32 -0.015625, %v2632_v10  ;;  %v2679_v49 = vadd.f32 %v2678_v52, %v2664_v44 }
 0xa1a   : > { %v2633_v12 = vadd.f32 %v2617_v42, %v2498_v23  ;;  %v2665_v2 = vmul.f32 %v2648_v16, %v4077_v39 }
 0xa1b   : > { %v2563_v31 = vpop.permute.xlu1 %2562  ;;  %v2444_v32 = vpop.permute.xlu0 %2443 }
 0xa1c   : > { %v2618_v9 = vmul.f32 %v4228_v21, %v2563_v31  ;;  %v2499_v6 = vmul.f32 %v4231_v22, %v2444_v32  ;;  %v2649_v25 = vmul.f32 -0.015625, %v2633_v12  ;;  %v2680_v46 = vadd.f32 %v2679_v49, %v2665_v2 }
 0xa1e   : > { %v2634_v17 = vadd.f32 %v2618_v9, %v2499_v6  ;;  %v2666_v3 = vmul.f32 %v2649_v25, %v4081_v5 }
 0xa1f   : > { %v2568_v40 = vpop.permute.xlu1 %2567  ;;  %v2449_v37 = vpop.permute.xlu0 %2448 }
 0xa20   : > { %v2619_v13 = vmul.f32 %v4228_v21, %v2568_v40  ;;  %v2500_v14 = vmul.f32 %v4231_v22, %v2449_v37  ;;  %v2650_v7 = vmul.f32 -0.015625, %v2634_v17  ;;  %v2681_v59 = vadd.f32 %v2680_v46, %v2666_v3 }
 0xa22   : > { %v2635_v55 = vadd.f32 %v2619_v13, %v2500_v14  ;;  %v2667_v48 = vmul.f32 %v2650_v7, %v4085_v26 }
 0xa23   : > { %v2573_v47 = vpop.permute.xlu1 %2572  ;;  %v2454_v11 = vpop.permute.xlu0 %2453 }
 0xa24   : > { %v2620_v18 = vmul.f32 %v4228_v21, %v2573_v47  ;;  %v2501_v41 = vmul.f32 %v4231_v22, %v2454_v11  ;;  %v2651_v36 = vmul.f32 -0.015625, %v2635_v55  ;;  %v2682_v23 = vadd.f32 %v2681_v59, %v2667_v48 }
 0xa26   : > { %v2636_v28 = vadd.f32 %v2620_v18, %v2501_v41  ;;  %v2668_v60 = vmul.f32 %v2651_v36, %v4089_v56 }
 0xa27   : > { %v2578_v20 = vpop.permute.xlu1 %2577  ;;  %v2459_v24 = vpop.permute.xlu0 %2458 }
 0xa28   : > { %v2621_v27 = vmul.f32 %v4228_v21, %v2578_v20  ;;  %v2502_v51 = vmul.f32 %v4231_v22, %v2459_v24  ;;  %v2652_v33 = vmul.f32 -0.015625, %v2636_v28  ;;  %v2683_v6 = vadd.f32 %v2682_v23, %v2668_v60 }
 0xa2a   : > { %v2637_v38 = vadd.f32 %v2621_v27, %v2502_v51  ;;  %v2669_v5 = vmul.f32 %v2652_v33, %v4093_v57 }
 0xa2b   : > { %v2583_v62 = vpop.permute.xlu1 %2582  ;;  %v2464_v53 = vpop.permute.xlu0 %2463 }
 0xa2c   : > { %v2622_v31 = vmul.f32 %v4228_v21, %v2583_v62  ;;  %v2503_v32 = vmul.f32 %v4231_v22, %v2464_v53  ;;  %v2653_v61 = vmul.f32 -0.015625, %v2637_v38  ;;  %v2684_v35 = vadd.f32 %v2683_v6, %v2669_v5 }
 0xa2e   : > { %v2638_v45 = vadd.f32 %v2622_v31, %v2503_v32  ;;  %v2670_v47 = vmul.f32 %v2653_v61, %v4097_v19 }
 0xa2f   : > { %v2588_v30 = vpop.permute.xlu1 %2587  ;;  %v2469_v39 = vpop.permute.xlu0 %2468 }
 0xa30   : > { %v2623_v40 = vmul.f32 %v4228_v21, %v2588_v30  ;;  %v2504_v37 = vmul.f32 %v4231_v22, %v2469_v39  ;;  %v2654_v4 = vmul.f32 -0.015625, %v2638_v45  ;;  %v2685_v15 = vadd.f32 %v2684_v35, %v2670_v47 }
 0xa32   : > { %v2639_v42 = vadd.f32 %v2623_v40, %v2504_v37  ;;  %v2671_v56 = vmul.f32 %v2654_v4, %v4101_v1 }
 0xa33   : > { %v2593_v50 = vpop.permute.xlu1 %2592  ;;  %v2474_v10 = vpop.permute.xlu0 %2473 }
 0xa34   : > { %v2624_v26 = vmul.f32 %v4228_v21, %v2593_v50  ;;  %v2505_v9 = vmul.f32 %v4231_v22, %v2474_v10  ;;  %v2655_v11 = vmul.f32 -0.015625, %v2639_v42  ;;  %v2686_v17 = vadd.f32 %v2685_v15, %v2671_v56 }
 0xa36   : > { %v2640_v34 = vadd.f32 %v2624_v26, %v2505_v9  ;;  %v2672_v0 = vmul.f32 %v2655_v11, %v4105_v8 }
 0xa37   : > { %v2598_v58 = vpop.permute.xlu1 %2597  ;;  %v2479_v12 = vpop.permute.xlu0 %2478 }
 0xa38   : > { %v2656_v13 = vmul.f32 -0.015625, %v2640_v34  ;;  %v2625_v57 = vmul.f32 %v4228_v21, %v2598_v58  ;;  %v2506_v14 = vmul.f32 %v4231_v22, %v2479_v12  ;;  %v2687_v63 = vadd.f32 %v2686_v17, %v2672_v0 }
 0xa3a   : > { %v2641_v16 = vadd.f32 %v2625_v57, %v2506_v14  ;;  %v2673_v19 = vmul.f32 %v2656_v13, %v4109_v43 }
 0xa3b   : > { %v2603_v18 = vpop.permute.xlu1 %2602  ;;  %v2484_v41 = vpop.permute.xlu0 %2483 }
 0xa3c   : > { %v2657_v20 = vmul.f32 -0.015625, %v2641_v16  ;;  %v2626_v24 = vmul.f32 %v4228_v21, %v2603_v18  ;;  %v2507_v1 = vmul.f32 %v4231_v22, %v2484_v41  ;;  %v2688_v27 = vadd.f32 %v2687_v63, %v2673_v19  ;;  %v2659_v22 = vld [vmem:[#allocation2] sm:$0xff] }
 0xa3e   : > { %v2674_v44 = vmul.f32 %v2657_v20, %v4113_v54  ;;  %v2642_v25 = vadd.f32 %v2626_v24, %v2507_v1 }
 0xa40   : > { %v2658_v55 = vmul.f32 -0.015625, %v2642_v25  ;;  %v2689_v8 = vadd.f32 %v2688_v27, %v2674_v44 }
 0xa42   : > { %v2675_v51 = vmul.f32 %v2658_v55, %v4117_v29 }
 0xa44   : > { %v2690_v52 = vadd.f32 %v2689_v8, %v2675_v51 }
 0xa46   : > { %2691 = vadd.xlane.f32.xlu0 %v2690_v52 }
 0xad3   : > { %v2692_v2 = vpop.xlane.xlu0 %2691 }
 0xad4   : > { %v2693_v7 = vrot.slane %v2692_v2, 4 }
 0xad6   : > { %v2694_v28 = vadd.f32 %v2693_v7, %v2692_v2 }
 0xad8   : > { %v2695_v43 = vrot.slane %v2694_v28, 2 }
 0xada   : > { %v2696_v62 = vadd.f32 %v2695_v43, %v2694_v28 }
 0xadc   : > { %v2697_v53 = vrot.slane %v2696_v62, 1 }
 0xade   : > { %v2698_v21 = vadd.f32 %v2697_v53, %v2696_v62 }
 0xae0   : > { %3017 = vpush %v2698_v21 }
 0xb11   : > { %s3018_s5 = spop %3017 }
 0xb12   : > { %v2700_v31 = vstv %s3018_s5 }
 0xb13   : > { %v2701_v54 = vadd.f32 %v2700_v31, %v2659_v22 }
 0xb15   : > { %2702 = vst [vmem:[#allocation2] sm:$0xff] %v2701_v54 }
 0xb16 PF: > { %p2938_p1 = scmp.ne.s32.totalorder %s3311_s3, 1 }
 0xb18   : > { %2706 = sbr.rel (%p2938_p1) target bundleno = 2847 (0xb1f), region = 96 }
 0xb1c   : > { %v2707_v29 = vld [vmem:[#allocation2] sm:$0xff] (!%p2938_p1) }
 0xb1d   : > { %2708 = vst [vmem:[%s547_s28] sm:$0xff] (!%p2938_p1), %v2707_v29 }
 0xb1f PF: > { %s4398_s26 = sld [smem:[#allocation15_spill]]  ;;  %s4401_s21 = sld [smem:[#allocation27_spill]] }
 0xb20   : > { %s4399_s30 = sld [smem:[#allocation13_spill]]  ;;  %s2723_s2 = sshll.u32 %s547_s28, 4  ;;  %s2724_s2 = int_to_ptr.vmem [resolvable:$true] %s2723_s2 }
 0xb21   : > { %s3231_s19 = scalar_lea.vmem %s2724_s2, 128  ;;  %s3340_s1 = smov [#allocation8]  }
 0xb22   : > { %p3232_p2 = scmp.ne.s32.totalorder %s2724_s2, %s3231_s19  ;;  %s3235_s27 = sshll.u32 %s3340_s1, 4  ;;  %s3236_s27 = int_to_ptr.vmem [resolvable:$false] %s3235_s27 }
 0xb23   : > { %s3237_s24 = scalar_lea.vmem %s3236_s27, 256  ;;  %p3238_p6 = scmp.lt.s32.totalorder %s2724_s2, %s3236_s27 }
 0xb24   : > { %p3233_p3 = pnand %p3232_p2, %p3467_p4  ;;  %p3239_p7 = scmp.lt.s32.totalorder %s3237_s24, %s3231_s19 }
 0xb25   : > { %s2940_s25 = sshll.u32 %s4398_s26, 7  ;;  %s4402_s16 = smov %s4401_s21 }
 0xb26   : > { %s4288_s0 = scalar_lea.hbm %s4401_s21, %s2940_s25  ;;  %s4403_s3 = sand.u32 1, %s4399_s30  }
 0xb27   : > { %s2710_s18 = scalar_lea.sflag [#allocation9], %s4403_s3  ;;  %p3234_p5 = pneg %p3233_p3 }
 0xb28   : > { %p3240_p8 = por %p3239_p7, %p3238_p6 }
 0xb2a   : > { %p3241_p9 = pnand %p3240_p8, %p3234_p5 }
 0xb2c   : > { %3244 = shalt.err (!%p3241_p9)
}
 0xb2d   : > { %s3245_s15 = scalar_lea.hbm %s4288_s0, 128  ;;  %s3249_s29 = scalar_lea.hbm %s4402_s16, 256 }
 0xb2e   : > { %p3246_p11 = scmp.ne.s32.totalorder %s4288_s0, %s3245_s15  ;;  %p3250_p0 = scmp.lt.u32.totalorder %s4288_s0, %s4402_s16 }
 0xb2f   : > { %p3251_p1 = scmp.lt.u32.totalorder %s3249_s29, %s3245_s15  ;;  %p3253_p3 = scmp.lt.u32.totalorder %s3245_s15, %s4288_s0 }
 0xb30   : > { %p3247_p12 = pnand %p3246_p11, %p3467_p4 }
 0xb31   : > { %p3252_p2 = por %p3251_p1, %p3250_p0 }
 0xb32   : > { %p3248_p13 = pneg %p3247_p12 }
 0xb33   : > { %p3254_p5 = por %p3253_p3, %p3252_p2 }
 0xb35   : > { %p3255_p6 = pnand %p3254_p5, %p3248_p13 }
 0xb37   : > { %3258 = shalt.err (!%p3255_p6)
}
 0xb38   : > { %3019 = dma.vmem_to_hbm [thread:$0]  (%p3467_p4), %s2724_s2, 128, %s4288_s0, %s2710_s18  }
 0xb39 PF: > { %s4404_s13 = sld [smem:[#allocation18_spill]]  ;;  %s4405_s4 = sld [smem:[#allocation12_spill]] }
 0xb3f   : > { %p3025_p7 = scmp.ge.s32.totalorder %s4404_s13, 2  ;;  %s2735_s26 = sand.u32 1, %s4405_s4  }
 0xb40   : > { %s2736_s30 = scalar_lea.sflag [#allocation9], %s2735_s26 }
 0xb41   : > { %p3022_p8 = pnand %p3025_p7, %p3477_p10 }
 0xb43   : > { %3294 = dma.done.wait (!%p3022_p8), %s2736_s30, 128  }
 0xb44   : > { %3296 = vsyncadd (!%p3022_p8), %s2736_s30, 4294967168  ;;  %s40_s23 = sadd.s32 1, %s4404_s13   ;;  %s4407_s2 = sld [smem:[#allocation13_spill]] }
 0xb45   : > { %p37_p9 = scmp.ge.s32.totalorder %s40_s23, 6   ;;  %s4408_s18 = sld [smem:[#allocation14_spill]] }
 0xb46   : > { %s4409_s19 = sld [smem:[#allocation23_spill]]  ;;  %s4410_s3 = sld [smem:[#allocation16_spill]] }
 0xb47   : > { %s4411_s20 = sld [smem:[#allocation17_spill]]  ;;  %s4412_s21 = sld [smem:[#allocation19_spill]] }
 0xb48   : > { %s4413_s22 = sld [smem:[#allocation21_spill]]  ;;  %39 = sbr.rel (!%p37_p9) target bundleno = 43 (0x2b), region = 152 }
 0xb4f   :  { %2741 = vsyncpa [#allocation9], 1 }
 0xb50   :  { %2743 = vsyncpa [#allocation9 + $0x1], 1 }

</bundles_post_ra>
